<compile_context>
chip_gen: v7x
topology: tpu7x:2x2x1
jax: 0.10.0
libtpu: 0.0.40
codegen_flags: <defaults>
</compile_context>

<pallas_src>
import functools

import jax
import jax.numpy as jnp
from jax.experimental import pallas as pl
from jax.experimental.pallas import tpu as pltpu

LANE = 128    # lane padding multiple
EPS = 1e-5    # BatchNorm eps


def _round_up(n, m):
    return (n + m - 1) // m * m


def _pick_row_tile(rows):
    """Largest row tile (multiple of 128, <= 512) that evenly divides rows."""
    for t in (512, 256, 128):
        if rows % t == 0:
            return t
    return rows


# ----------------------------- Pallas kernels -----------------------------

def _gmm_stats_kernel(a_ref, b_ref, o_ref, sum_ref, sq_ref):
    """Grouped conv-as-matmul tile + per-channel sum / sum-sq accumulation.

    Blocks: a=(1,TM,Kp) bf16, b=(1,Kp,Np) bf16, o=(1,TM,Np) bf16,
            sum/sq=(1,1,Np) f32 (resident across the m grid axis).
    """
    acc = jnp.dot(a_ref[0], b_ref[0], preferred_element_type=jnp.float32)
    o_ref[...] = acc[None].astype(o_ref.dtype)

    @pl.when(pl.program_id(1) == 0)
    def _():
        sum_ref[...] = jnp.zeros_like(sum_ref)
        sq_ref[...] = jnp.zeros_like(sq_ref)

    sum_ref[...] = sum_ref[...] + jnp.sum(acc, axis=0, keepdims=True)[None]
    sq_ref[...] = sq_ref[...] + jnp.sum(acc * acc, axis=0, keepdims=True)[None]


def _gmm_tanh_kernel(a_ref, b_ref, o_ref):
    acc = jnp.dot(a_ref[0], b_ref[0], preferred_element_type=jnp.float32)
    o_ref[...] = jnp.tanh(acc)[None]


def _bn_relu_kernel(x_ref, scale_ref, bias_ref, o_ref):
    y = x_ref[...].astype(jnp.float32) * scale_ref[...] + bias_ref[...]
    o_ref[...] = jnp.maximum(y, 0.0).astype(o_ref.dtype)


# ----------------------------- kernel wrappers -----------------------------

def group_matmul_stats(a, b):
    """a: (G, Mp, Kp) bf16, b: (G, Kp, Np) bf16 ->
       conv (G, Mp, Np) bf16, sum (G, 1, Np) f32, sq (G, 1, Np) f32."""
    G, Mp, Kp = a.shape
    Np = b.shape[2]
    tm = _pick_row_tile(Mp)
    return pl.pallas_call(
        _gmm_stats_kernel,
        out_shape=(jax.ShapeDtypeStruct((G, Mp, Np), jnp.bfloat16),
                   jax.ShapeDtypeStruct((G, 1, Np), jnp.float32),
                   jax.ShapeDtypeStruct((G, 1, Np), jnp.float32)),
        grid=(G, Mp // tm),
        in_specs=[pl.BlockSpec((1, tm, Kp), lambda g, i: (g, i, 0)),
                  pl.BlockSpec((1, Kp, Np), lambda g, i: (g, 0, 0))],
        out_specs=(pl.BlockSpec((1, tm, Np), lambda g, i: (g, i, 0)),
                   pl.BlockSpec((1, 1, Np), lambda g, i: (g, 0, 0)),
                   pl.BlockSpec((1, 1, Np), lambda g, i: (g, 0, 0))),
        compiler_params=pltpu.CompilerParams(
            dimension_semantics=("parallel", "arbitrary")),
    )(a, b)


def group_matmul_tanh(a, b):
    """a: (G, Mp, Kp) bf16, b: (G, Kp, Np) bf16 -> (G, Mp, Np) f32 (tanh)."""
    G, Mp, Kp = a.shape
    Np = b.shape[2]
    tm = _pick_row_tile(Mp)
    return pl.pallas_call(
        _gmm_tanh_kernel,
        out_shape=jax.ShapeDtypeStruct((G, Mp, Np), jnp.float32),
        grid=(G, Mp // tm),
        in_specs=[pl.BlockSpec((1, tm, Kp), lambda g, i: (g, i, 0)),
                  pl.BlockSpec((1, Kp, Np), lambda g, i: (g, 0, 0))],
        out_specs=pl.BlockSpec((1, tm, Np), lambda g, i: (g, i, 0)),
        compiler_params=pltpu.CompilerParams(
            dimension_semantics=("parallel", "parallel")),
    )(a, b)


def bn_relu(x2d, scale, bias):
    """x2d: (R, Np) bf16; scale/bias: (1, Np) f32 -> (R, Np) bf16."""
    R, Np = x2d.shape
    t = _pick_row_tile(R)
    return pl.pallas_call(
        _bn_relu_kernel,
        out_shape=jax.ShapeDtypeStruct((R, Np), jnp.bfloat16),
        grid=(R // t,),
        in_specs=[pl.BlockSpec((t, Np), lambda i: (i, 0)),
                  pl.BlockSpec((1, Np), lambda i: (0, 0)),
                  pl.BlockSpec((1, Np), lambda i: (0, 0))],
        out_specs=pl.BlockSpec((t, Np), lambda i: (i, 0)),
        compiler_params=pltpu.CompilerParams(
            dimension_semantics=("parallel",)),
    )(x2d, scale, bias)


# ------------------------------ JAX glue ------------------------------

def _prep_stride1(x_nhwc, w_pt, padding):
    """ConvTranspose2d stride=1 -> flipped-kernel conv im2col (deconv1 only)."""
    N, H, W, C = x_nhwc.shape
    Ci, Co, K, _ = w_pt.shape
    pp = K - 1 - padding
    xp = jnp.pad(x_nhwc, ((0, 0), (pp, pp), (pp, pp), (0, 0)))
    Ho = H - 2 * padding + K - 1
    Wo = W - 2 * padding + K - 1
    cols, wtaps = [], []
    for kh in range(K):
        for kw in range(K):
            cols.append(xp[:, kh:kh + Ho, kw:kw + Wo, :])
            wtaps.append(w_pt[:, :, K - 1 - kh, K - 1 - kw])
    a = jnp.stack(cols, axis=3).reshape(N * Ho * Wo, K * K * C)
    b = jnp.stack(wtaps, axis=0).reshape(K * K * Ci, Co)
    return a[None], b[None], (N, Ho, Wo, Co)


def _prep_stride2(x_nhwc, w_pt):
    """ConvTranspose2d(4x4, stride=2, pad=1) -> 4 parity 2x2 sub-convolutions.

    out[n, 2m+ph, 2w+pw, co] = sum_{dh,dw,ci} xp[n, m+ph+dh, w+pw+dw, ci]
                               * W[ci, co, 3-ph-2*dh, 3-pw-2*dw]
    where xp is x padded by 1 on each spatial side.
    """
    N, H, W, C = x_nhwc.shape
    Ci, Co, K, _ = w_pt.shape
    xp = jnp.pad(x_nhwc, ((0, 0), (1, 1), (1, 1), (0, 0)))
    a_groups, b_groups = [], []
    for ph in range(2):
        for pw in range(2):
            taps, wtaps = [], []
            for dh in range(2):
                for dw in range(2):
                    taps.append(xp[:, ph + dh:ph + dh + H,
                                   pw + dw:pw + dw + W, :])
                    wtaps.append(w_pt[:, :, 3 - ph - 2 * dh, 3 - pw - 2 * dw])
            a = jnp.stack(taps, axis=3)                    # (N, H, W, 4, C)
            a_groups.append(a.reshape(N * H * W, 4 * C))
            b_groups.append(jnp.stack(wtaps, axis=0).reshape(4 * Ci, Co))
    A = jnp.stack(a_groups, axis=0)                        # (4, N*H*W, 4C)
    B = jnp.stack(b_groups, axis=0)                        # (4, 4C, Co)
    return A, B, (N, H, W, Co)


def _pad_groups(A, B):
    G, M, Kd = A.shape
    Co = B.shape[2]
    Mp, Kp, Np = _round_up(M, LANE), _round_up(Kd, LANE), _round_up(Co, LANE)
    A_p = jnp.pad(A, ((0, 0), (0, Mp - M), (0, Kp - Kd))).astype(jnp.bfloat16)
    B_p = jnp.pad(B, ((0, 0), (0, Kp - Kd), (0, Np - Co))).astype(jnp.bfloat16)
    return A_p, B_p, Mp, Np


def _interleave_parities(y, N, H, W, Co):
    """y: (4, N*H*W, Co) with parity index ph*2+pw -> (N, 2H, 2W, Co)."""
    y = y.reshape(2, 2, N, H, W, Co)          # (ph, pw, N, H, W, Co)
    y = jnp.transpose(y, (2, 3, 0, 4, 1, 5))  # (N, H, ph, W, pw, Co)
    return y.reshape(N, 2 * H, 2 * W, Co)


def _bn_layer(x_nhwc, w, gamma, beta, stride, padding):
    if stride == 1:
        A, B, (N, Ho, Wo, Co) = _prep_stride1(x_nhwc, w, padding)
        Hh, Ww = Ho, Wo
    else:
        A, B, (N, Hh, Ww, Co) = _prep_stride2(x_nhwc, w)
    G, M1, _ = A.shape
    A_p, B_p, Mp, Np = _pad_groups(A, B)

    conv, ssum, ssq = group_matmul_stats(A_p, B_p)

    total = float(G * M1)                     # true N*Ho*Wo element count
    s = jnp.sum(ssum[:, 0, :], axis=0)
    sq = jnp.sum(ssq[:, 0, :], axis=0)
    mean = s / total
    var = sq / total - mean * mean            # biased variance (train-mode BN)
    gamma_p = jnp.pad(gamma, (0, Np - Co))
    beta_p = jnp.pad(beta, (0, Np - Co))
    scale = gamma_p * jax.lax.rsqrt(var + EPS)
    bias = beta_p - mean * scale

    y = bn_relu(conv.reshape(G * Mp, Np), scale[None, :], bias[None, :])
    y = y.reshape(G, Mp, Np)[:, :M1, :Co]
    if stride == 1:
        return y[0].reshape(N, Ho, Wo, Co)
    return _interleave_parities(y, N, Hh, Ww, Co)


def _tanh_layer(x_nhwc, w):
    A, B, (N, Hh, Ww, Co) = _prep_stride2(x_nhwc, w)
    G, M1, _ = A.shape
    A_p, B_p, Mp, Np = _pad_groups(A, B)
    y = group_matmul_tanh(A_p, B_p)           # (4, Mp, Np) f32
    y = y[:, :M1, :Co]
    return _interleave_parities(y, N, Hh, Ww, Co)


def generator_forward(x_nchw, params):
    x = jnp.transpose(x_nchw, (0, 2, 3, 1)).astype(jnp.float32)   # NHWC
    w, g, b = params["deconv1"]
    x = _bn_layer(x, w, g, b, stride=1, padding=0)
    w, g, b = params["deconv2"]
    x = _bn_layer(x, w, g, b, stride=2, padding=1)
    w, g, b = params["deconv3"]
    x = _bn_layer(x, w, g, b, stride=2, padding=1)
    w, g, b = params["deconv4"]
    x = _bn_layer(x, w, g, b, stride=2, padding=1)
    out = _tanh_layer(x, params["deconv5"])
    return jnp.transpose(out, (0, 3, 1, 2)).astype(jnp.float32)   # NCHW


# --------------------------- parameter init ---------------------------

def init_params(key, g_input_size, ngf, input_channels):
    """DCGAN weights_init: conv ~ N(0, 0.02); BN gamma ~ N(1, 0.02), beta = 0."""
    shapes = {
        "deconv1": (g_input_size, ngf * 8),
        "deconv2": (ngf * 8, ngf * 4),
        "deconv3": (ngf * 4, ngf * 2),
        "deconv4": (ngf * 2, ngf),
        "deconv5": (ngf, input_channels),
    }
    params = {}
    keys = jax.random.split(key, 2 * len(shapes))
    ki = 0
    for name, (ci, co) in shapes.items():
        w = 0.02 * jax.random.normal(keys[ki], (ci, co, 4, 4), jnp.float32)
        ki += 1
        if name != "deconv5":
            gamma = 1.0 + 0.02 * jax.random.normal(keys[ki], (co,), jnp.float32)
            beta = jnp.zeros((co,), jnp.float32)
            params[name] = (w, gamma, beta)
        else:
            params[name] = w
        ki += 1
    return params


if __name__ == "__main__":
    key = jax.random.PRNGKey(0)
    k_x, k_p = jax.random.split(key)

    # small config: g_input_size=16, num_filt_g=8, input_channels=3, batch=2
    batch, g_input_size, ngf, in_ch = 2, 16, 8, 3
    params = init_params(k_p, g_input_size, ngf, in_ch)
    x = jax.random.normal(k_x, (batch, g_input_size, 1, 1), jnp.float32)

    fwd = jax.jit(functools.partial(generator_forward, params=params))
    out = fwd(x)
    jax.block_until_ready(out)

    assert out.shape == (batch, in_ch, 64, 64), out.shape
    assert out.dtype == jnp.float32
    print("KERNEL_OK")
</pallas_src>

<mosaic_0001>
module attributes {stable_mosaic.version = 11 : i64} {
  func.func @_gmm_stats_kernel(%arg0: i32, %arg1: i32, %arg2: memref<1x128x256xbf16, #tpu.memory_space<vmem>>, %arg3: memref<1x256x128xbf16, #tpu.memory_space<vmem>>, %arg4: memref<1x128x128xbf16, #tpu.memory_space<vmem>>, %arg5: memref<1x1x128xf32, #tpu.memory_space<vmem>>, %arg6: memref<1x1x128xf32, #tpu.memory_space<vmem>>) attributes {dimension_semantics = [#tpu.dimension_semantics<parallel>, #tpu.dimension_semantics<arbitrary>], iteration_bounds = array<i64: 1, 1>, scalar_prefetch = 0 : i64, scratch_operands = 0 : i64, tpu.core_type = #tpu.core_type<tc>, window_params = [{transform_indices = @transform_0, window_bounds = array<i64: 1, 128, 256>}, {transform_indices = @transform_1, window_bounds = array<i64: 1, 256, 128>}, {transform_indices = @transform_2, window_bounds = array<i64: 1, 128, 128>}, {transform_indices = @transform_3, window_bounds = array<i64: 1, 1, 128>}, {transform_indices = @transform_4, window_bounds = array<i64: 1, 1, 128>}]} {
    %c0 = arith.constant 0 : index
    %c0_0 = arith.constant 0 : index
    %c0_1 = arith.constant 0 : index
    %0 = vector.load %arg2[%c0, %c0_0, %c0_1] : memref<1x128x256xbf16, #tpu.memory_space<vmem>>, vector<1x128x256xbf16>
    %1 = vector.shape_cast %0 : vector<1x128x256xbf16> to vector<128x256xbf16>
    %c0_2 = arith.constant 0 : index
    %c0_3 = arith.constant 0 : index
    %c0_4 = arith.constant 0 : index
    %2 = vector.load %arg3[%c0_2, %c0_3, %c0_4] : memref<1x256x128xbf16, #tpu.memory_space<vmem>>, vector<1x256x128xbf16>
    %3 = vector.shape_cast %2 : vector<1x256x128xbf16> to vector<256x128xbf16>
    %cst = arith.constant dense<0.000000e+00> : vector<128x128xf32>
    %4 = tpu.matmul %1, %3, %cst {dimension_numbers = #tpu.dot_dimension_numbers<[1], [0], [0], [1], [0, 0, 1, 1], [], []>} : vector<128x256xbf16>, vector<256x128xbf16>, vector<128x128xf32> -> vector<128x128xf32>
    %5 = vector.shape_cast %4 : vector<128x128xf32> to vector<1x128x128xf32>
    %6 = arith.truncf %5 : vector<1x128x128xf32> to vector<1x128x128xbf16>
    %c0_5 = arith.constant 0 : index
    %c0_6 = arith.constant 0 : index
    %c0_7 = arith.constant 0 : index
    %7 = vector.load %arg4[%c0_5, %c0_6, %c0_7] : memref<1x128x128xbf16, #tpu.memory_space<vmem>>, vector<1x128x128xbf16>
    tpu.vector_store %arg4[%c0_5, %c0_6, %c0_7], %6 {strides = array<i32>} : memref<1x128x128xbf16, #tpu.memory_space<vmem>>, vector<1x128x128xbf16>,
    %c0_i32 = arith.constant 0 : i32
    %8 = arith.cmpi eq, %arg1, %c0_i32 : i32
    %9 = arith.extui %8 : i1 to i32
    %c0_i32_8 = arith.constant 0 : i32
    %10 = arith.cmpi ne, %9, %c0_i32_8 : i32
    scf.if %10 {
      %cst_23 = arith.constant 0.000000e+00 : f32
      %24 = vector.broadcast %cst_23 : f32 to vector<1x1x128xf32>
      %c0_24 = arith.constant 0 : index
      %c0_25 = arith.constant 0 : index
      %c0_26 = arith.constant 0 : index
      %25 = vector.load %arg5[%c0_24, %c0_25, %c0_26] : memref<1x1x128xf32, #tpu.memory_space<vmem>>, vector<1x1x128xf32>
      tpu.vector_store %arg5[%c0_24, %c0_25, %c0_26], %24 {strides = array<i32>} : memref<1x1x128xf32, #tpu.memory_space<vmem>>, vector<1x1x128xf32>,
      %cst_27 = arith.constant 0.000000e+00 : f32
      %26 = vector.broadcast %cst_27 : f32 to vector<1x1x128xf32>
      %c0_28 = arith.constant 0 : index
      %c0_29 = arith.constant 0 : index
      %c0_30 = arith.constant 0 : index
      %27 = vector.load %arg6[%c0_28, %c0_29, %c0_30] : memref<1x1x128xf32, #tpu.memory_space<vmem>>, vector<1x1x128xf32>
      tpu.vector_store %arg6[%c0_28, %c0_29, %c0_30], %26 {strides = array<i32>} : memref<1x1x128xf32, #tpu.memory_space<vmem>>, vector<1x1x128xf32>,
    } else {
    }
    %c0_9 = arith.constant 0 : index
    %c0_10 = arith.constant 0 : index
    %c0_11 = arith.constant 0 : index
    %11 = vector.load %arg5[%c0_9, %c0_10, %c0_11] : memref<1x1x128xf32, #tpu.memory_space<vmem>>, vector<1x1x128xf32>
    %cst_12 = arith.constant dense<0.000000e+00> : vector<128xf32>
    %12 = vector.multi_reduction <add>, %4, %cst_12 [0] : vector<128x128xf32> to vector<128xf32>
    %13 = vector.shape_cast %12 : vector<128xf32> to vector<1x128xf32>
    %14 = vector.shape_cast %13 : vector<1x128xf32> to vector<1x1x128xf32>
    %15 = arith.addf %11, %14 : vector<1x1x128xf32>
    %c0_13 = arith.constant 0 : index
    %c0_14 = arith.constant 0 : index
    %c0_15 = arith.constant 0 : index
    %16 = vector.load %arg5[%c0_13, %c0_14, %c0_15] : memref<1x1x128xf32, #tpu.memory_space<vmem>>, vector<1x1x128xf32>
    tpu.vector_store %arg5[%c0_13, %c0_14, %c0_15], %15 {strides = array<i32>} : memref<1x1x128xf32, #tpu.memory_space<vmem>>, vector<1x1x128xf32>,
    %c0_16 = arith.constant 0 : index
    %c0_17 = arith.constant 0 : index
    %c0_18 = arith.constant 0 : index
    %17 = vector.load %arg6[%c0_16, %c0_17, %c0_18] : memref<1x1x128xf32, #tpu.memory_space<vmem>>, vector<1x1x128xf32>
    %18 = arith.mulf %4, %4 : vector<128x128xf32>
    %cst_19 = arith.constant dense<0.000000e+00> : vector<128xf32>
    %19 = vector.multi_reduction <add>, %18, %cst_19 [0] : vector<128x128xf32> to vector<128xf32>
    %20 = vector.shape_cast %19 : vector<128xf32> to vector<1x128xf32>
    %21 = vector.shape_cast %20 : vector<1x128xf32> to vector<1x1x128xf32>
    %22 = arith.addf %17, %21 : vector<1x1x128xf32>
    %c0_20 = arith.constant 0 : index
    %c0_21 = arith.constant 0 : index
    %c0_22 = arith.constant 0 : index
    %23 = vector.load %arg6[%c0_20, %c0_21, %c0_22] : memref<1x1x128xf32, #tpu.memory_space<vmem>>, vector<1x1x128xf32>
    tpu.vector_store %arg6[%c0_20, %c0_21, %c0_22], %22 {strides = array<i32>} : memref<1x1x128xf32, #tpu.memory_space<vmem>>, vector<1x1x128xf32>,
    return
  }
  func.func @transform_0(%arg0: i32, %arg1: i32) -> (i32, i32, i32) {
    %c0_i32 = arith.constant 0 : i32
    %c0_i32_0 = arith.constant 0 : i32
    return %arg0, %arg1, %c0_i32 : i32, i32, i32
  }
  func.func @transform_1(%arg0: i32, %arg1: i32) -> (i32, i32, i32) {
    %c0_i32 = arith.constant 0 : i32
    %c0_i32_0 = arith.constant 0 : i32
    %c0_i32_1 = arith.constant 0 : i32
    return %arg0, %c0_i32, %c0_i32_0 : i32, i32, i32
  }
  func.func @transform_2(%arg0: i32, %arg1: i32) -> (i32, i32, i32) {
    %c0_i32 = arith.constant 0 : i32
    %c0_i32_0 = arith.constant 0 : i32
    return %arg0, %arg1, %c0_i32 : i32, i32, i32
  }
  func.func @transform_3(%arg0: i32, %arg1: i32) -> (i32, i32, i32) {
    %c0_i32 = arith.constant 0 : i32
    %c0_i32_0 = arith.constant 0 : i32
    %c0_i32_1 = arith.constant 0 : i32
    return %arg0, %c0_i32, %c0_i32_0 : i32, i32, i32
  }
  func.func @transform_4(%arg0: i32, %arg1: i32) -> (i32, i32, i32) {
    %c0_i32 = arith.constant 0 : i32
    %c0_i32_0 = arith.constant 0 : i32
    %c0_i32_1 = arith.constant 0 : i32
    return %arg0, %c0_i32, %c0_i32_0 : i32, i32, i32
  }
}

module attributes {stable_mosaic.version = 11 : i64} {
  func.func @_bn_relu_kernel(%arg0: i32, %arg1: memref<128x128xbf16, #tpu.memory_space<vmem>>, %arg2: memref<1x128xf32, #tpu.memory_space<vmem>>, %arg3: memref<1x128xf32, #tpu.memory_space<vmem>>, %arg4: memref<128x128xbf16, #tpu.memory_space<vmem>>) attributes {dimension_semantics = [#tpu.dimension_semantics<parallel>], iteration_bounds = array<i64: 1>, scalar_prefetch = 0 : i64, scratch_operands = 0 : i64, tpu.core_type = #tpu.core_type<tc>, window_params = [{transform_indices = @transform_0, window_bounds = array<i64: 128, 128>}, {pipeline_mode = #tpu.pipeline_mode<synchronous>, transform_indices = @transform_1, window_bounds = array<i64: 1, 128>}, {pipeline_mode = #tpu.pipeline_mode<synchronous>, transform_indices = @transform_2, window_bounds = array<i64: 1, 128>}, {transform_indices = @transform_3, window_bounds = array<i64: 128, 128>}]} {
    %c0 = arith.constant 0 : index
    %c0_0 = arith.constant 0 : index
    %0 = vector.load %arg1[%c0, %c0_0] : memref<128x128xbf16, #tpu.memory_space<vmem>>, vector<128x128xbf16>
    %1 = arith.extf %0 : vector<128x128xbf16> to vector<128x128xf32>
    %c0_1 = arith.constant 0 : index
    %c0_2 = arith.constant 0 : index
    %2 = vector.load %arg2[%c0_1, %c0_2] : memref<1x128xf32, #tpu.memory_space<vmem>>, vector<1x128xf32>
    %3 = vector.broadcast %2 : vector<1x128xf32> to vector<128x128xf32>
    %4 = arith.mulf %1, %3 : vector<128x128xf32>
    %c0_3 = arith.constant 0 : index
    %c0_4 = arith.constant 0 : index
    %5 = vector.load %arg3[%c0_3, %c0_4] : memref<1x128xf32, #tpu.memory_space<vmem>>, vector<1x128xf32>
    %6 = vector.broadcast %5 : vector<1x128xf32> to vector<128x128xf32>
    %7 = arith.addf %4, %6 : vector<128x128xf32>
    %cst = arith.constant 0.000000e+00 : f32
    %8 = vector.broadcast %cst : f32 to vector<128x128xf32>
    %9 = arith.maximumf %7, %8 : vector<128x128xf32>
    %10 = arith.truncf %9 : vector<128x128xf32> to vector<128x128xbf16>
    %c0_5 = arith.constant 0 : index
    %c0_6 = arith.constant 0 : index
    %11 = vector.load %arg4[%c0_5, %c0_6] : memref<128x128xbf16, #tpu.memory_space<vmem>>, vector<128x128xbf16>
    tpu.vector_store %arg4[%c0_5, %c0_6], %10 {strides = array<i32>} : memref<128x128xbf16, #tpu.memory_space<vmem>>, vector<128x128xbf16>,
    return
  }
  func.func @transform_0(%arg0: i32) -> (i32, i32) {
    %c0_i32 = arith.constant 0 : i32
    %c0_i32_0 = arith.constant 0 : i32
    return %arg0, %c0_i32 : i32, i32
  }
  func.func @transform_1(%arg0: i32) -> (i32, i32) {
    %c0_i32 = arith.constant 0 : i32
    %c0_i32_0 = arith.constant 0 : i32
    %c0_i32_1 = arith.constant 0 : i32
    return %c0_i32, %c0_i32_0 : i32, i32
  }
  func.func @transform_2(%arg0: i32) -> (i32, i32) {
    %c0_i32 = arith.constant 0 : i32
    %c0_i32_0 = arith.constant 0 : i32
    %c0_i32_1 = arith.constant 0 : i32
    return %c0_i32, %c0_i32_0 : i32, i32
  }
  func.func @transform_3(%arg0: i32) -> (i32, i32) {
    %c0_i32 = arith.constant 0 : i32
    %c0_i32_0 = arith.constant 0 : i32
    return %arg0, %c0_i32 : i32, i32
  }
}

module attributes {stable_mosaic.version = 11 : i64} {
  func.func @_gmm_stats_kernel(%arg0: i32, %arg1: i32, %arg2: memref<1x128x256xbf16, #tpu.memory_space<vmem>>, %arg3: memref<1x256x128xbf16, #tpu.memory_space<vmem>>, %arg4: memref<1x128x128xbf16, #tpu.memory_space<vmem>>, %arg5: memref<1x1x128xf32, #tpu.memory_space<vmem>>, %arg6: memref<1x1x128xf32, #tpu.memory_space<vmem>>) attributes {dimension_semantics = [#tpu.dimension_semantics<parallel>, #tpu.dimension_semantics<arbitrary>], iteration_bounds = array<i64: 4, 1>, scalar_prefetch = 0 : i64, scratch_operands = 0 : i64, tpu.core_type = #tpu.core_type<tc>, window_params = [{transform_indices = @transform_0, window_bounds = array<i64: 1, 128, 256>}, {transform_indices = @transform_1, window_bounds = array<i64: 1, 256, 128>}, {transform_indices = @transform_2, window_bounds = array<i64: 1, 128, 128>}, {transform_indices = @transform_3, window_bounds = array<i64: 1, 1, 128>}, {transform_indices = @transform_4, window_bounds = array<i64: 1, 1, 128>}]} {
    %c0 = arith.constant 0 : index
    %c0_0 = arith.constant 0 : index
    %c0_1 = arith.constant 0 : index
    %0 = vector.load %arg2[%c0, %c0_0, %c0_1] : memref<1x128x256xbf16, #tpu.memory_space<vmem>>, vector<1x128x256xbf16>
    %1 = vector.shape_cast %0 : vector<1x128x256xbf16> to vector<128x256xbf16>
    %c0_2 = arith.constant 0 : index
    %c0_3 = arith.constant 0 : index
    %c0_4 = arith.constant 0 : index
    %2 = vector.load %arg3[%c0_2, %c0_3, %c0_4] : memref<1x256x128xbf16, #tpu.memory_space<vmem>>, vector<1x256x128xbf16>
    %3 = vector.shape_cast %2 : vector<1x256x128xbf16> to vector<256x128xbf16>
    %cst = arith.constant dense<0.000000e+00> : vector<128x128xf32>
    %4 = tpu.matmul %1, %3, %cst {dimension_numbers = #tpu.dot_dimension_numbers<[1], [0], [0], [1], [0, 0, 1, 1], [], []>} : vector<128x256xbf16>, vector<256x128xbf16>, vector<128x128xf32> -> vector<128x128xf32>
    %5 = vector.shape_cast %4 : vector<128x128xf32> to vector<1x128x128xf32>
    %6 = arith.truncf %5 : vector<1x128x128xf32> to vector<1x128x128xbf16>
    %c0_5 = arith.constant 0 : index
    %c0_6 = arith.constant 0 : index
    %c0_7 = arith.constant 0 : index
    %7 = vector.load %arg4[%c0_5, %c0_6, %c0_7] : memref<1x128x128xbf16, #tpu.memory_space<vmem>>, vector<1x128x128xbf16>
    tpu.vector_store %arg4[%c0_5, %c0_6, %c0_7], %6 {strides = array<i32>} : memref<1x128x128xbf16, #tpu.memory_space<vmem>>, vector<1x128x128xbf16>,
    %c0_i32 = arith.constant 0 : i32
    %8 = arith.cmpi eq, %arg1, %c0_i32 : i32
    %9 = arith.extui %8 : i1 to i32
    %c0_i32_8 = arith.constant 0 : i32
    %10 = arith.cmpi ne, %9, %c0_i32_8 : i32
    scf.if %10 {
      %cst_23 = arith.constant 0.000000e+00 : f32
      %24 = vector.broadcast %cst_23 : f32 to vector<1x1x128xf32>
      %c0_24 = arith.constant 0 : index
      %c0_25 = arith.constant 0 : index
      %c0_26 = arith.constant 0 : index
      %25 = vector.load %arg5[%c0_24, %c0_25, %c0_26] : memref<1x1x128xf32, #tpu.memory_space<vmem>>, vector<1x1x128xf32>
      tpu.vector_store %arg5[%c0_24, %c0_25, %c0_26], %24 {strides = array<i32>} : memref<1x1x128xf32, #tpu.memory_space<vmem>>, vector<1x1x128xf32>,
      %cst_27 = arith.constant 0.000000e+00 : f32
      %26 = vector.broadcast %cst_27 : f32 to vector<1x1x128xf32>
      %c0_28 = arith.constant 0 : index
      %c0_29 = arith.constant 0 : index
      %c0_30 = arith.constant 0 : index
      %27 = vector.load %arg6[%c0_28, %c0_29, %c0_30] : memref<1x1x128xf32, #tpu.memory_space<vmem>>, vector<1x1x128xf32>
      tpu.vector_store %arg6[%c0_28, %c0_29, %c0_30], %26 {strides = array<i32>} : memref<1x1x128xf32, #tpu.memory_space<vmem>>, vector<1x1x128xf32>,
    } else {
    }
    %c0_9 = arith.constant 0 : index
    %c0_10 = arith.constant 0 : index
    %c0_11 = arith.constant 0 : index
    %11 = vector.load %arg5[%c0_9, %c0_10, %c0_11] : memref<1x1x128xf32, #tpu.memory_space<vmem>>, vector<1x1x128xf32>
    %cst_12 = arith.constant dense<0.000000e+00> : vector<128xf32>
    %12 = vector.multi_reduction <add>, %4, %cst_12 [0] : vector<128x128xf32> to vector<128xf32>
    %13 = vector.shape_cast %12 : vector<128xf32> to vector<1x128xf32>
    %14 = vector.shape_cast %13 : vector<1x128xf32> to vector<1x1x128xf32>
    %15 = arith.addf %11, %14 : vector<1x1x128xf32>
    %c0_13 = arith.constant 0 : index
    %c0_14 = arith.constant 0 : index
    %c0_15 = arith.constant 0 : index
    %16 = vector.load %arg5[%c0_13, %c0_14, %c0_15] : memref<1x1x128xf32, #tpu.memory_space<vmem>>, vector<1x1x128xf32>
    tpu.vector_store %arg5[%c0_13, %c0_14, %c0_15], %15 {strides = array<i32>} : memref<1x1x128xf32, #tpu.memory_space<vmem>>, vector<1x1x128xf32>,
    %c0_16 = arith.constant 0 : index
    %c0_17 = arith.constant 0 : index
    %c0_18 = arith.constant 0 : index
    %17 = vector.load %arg6[%c0_16, %c0_17, %c0_18] : memref<1x1x128xf32, #tpu.memory_space<vmem>>, vector<1x1x128xf32>
    %18 = arith.mulf %4, %4 : vector<128x128xf32>
    %cst_19 = arith.constant dense<0.000000e+00> : vector<128xf32>
    %19 = vector.multi_reduction <add>, %18, %cst_19 [0] : vector<128x128xf32> to vector<128xf32>
    %20 = vector.shape_cast %19 : vector<128xf32> to vector<1x128xf32>
    %21 = vector.shape_cast %20 : vector<1x128xf32> to vector<1x1x128xf32>
    %22 = arith.addf %17, %21 : vector<1x1x128xf32>
    %c0_20 = arith.constant 0 : index
    %c0_21 = arith.constant 0 : index
    %c0_22 = arith.constant 0 : index
    %23 = vector.load %arg6[%c0_20, %c0_21, %c0_22] : memref<1x1x128xf32, #tpu.memory_space<vmem>>, vector<1x1x128xf32>
    tpu.vector_store %arg6[%c0_20, %c0_21, %c0_22], %22 {strides = array<i32>} : memref<1x1x128xf32, #tpu.memory_space<vmem>>, vector<1x1x128xf32>,
    return
  }
  func.func @transform_0(%arg0: i32, %arg1: i32) -> (i32, i32, i32) {
    %c0_i32 = arith.constant 0 : i32
    %c0_i32_0 = arith.constant 0 : i32
    return %arg0, %arg1, %c0_i32 : i32, i32, i32
  }
  func.func @transform_1(%arg0: i32, %arg1: i32) -> (i32, i32, i32) {
    %c0_i32 = arith.constant 0 : i32
    %c0_i32_0 = arith.constant 0 : i32
    %c0_i32_1 = arith.constant 0 : i32
    return %arg0, %c0_i32, %c0_i32_0 : i32, i32, i32
  }
  func.func @transform_2(%arg0: i32, %arg1: i32) -> (i32, i32, i32) {
    %c0_i32 = arith.constant 0 : i32
    %c0_i32_0 = arith.constant 0 : i32
    return %arg0, %arg1, %c0_i32 : i32, i32, i32
  }
  func.func @transform_3(%arg0: i32, %arg1: i32) -> (i32, i32, i32) {
    %c0_i32 = arith.constant 0 : i32
    %c0_i32_0 = arith.constant 0 : i32
    %c0_i32_1 = arith.constant 0 : i32
    return %arg0, %c0_i32, %c0_i32_0 : i32, i32, i32
  }
  func.func @transform_4(%arg0: i32, %arg1: i32) -> (i32, i32, i32) {
    %c0_i32 = arith.constant 0 : i32
    %c0_i32_0 = arith.constant 0 : i32
    %c0_i32_1 = arith.constant 0 : i32
    return %arg0, %c0_i32, %c0_i32_0 : i32, i32, i32
  }
}

module attributes {stable_mosaic.version = 11 : i64} {
  func.func @_bn_relu_kernel(%arg0: i32, %arg1: memref<512x128xbf16, #tpu.memory_space<vmem>>, %arg2: memref<1x128xf32, #tpu.memory_space<vmem>>, %arg3: memref<1x128xf32, #tpu.memory_space<vmem>>, %arg4: memref<512x128xbf16, #tpu.memory_space<vmem>>) attributes {dimension_semantics = [#tpu.dimension_semantics<parallel>], iteration_bounds = array<i64: 1>, scalar_prefetch = 0 : i64, scratch_operands = 0 : i64, tpu.core_type = #tpu.core_type<tc>, window_params = [{transform_indices = @transform_0, window_bounds = array<i64: 512, 128>}, {pipeline_mode = #tpu.pipeline_mode<synchronous>, transform_indices = @transform_1, window_bounds = array<i64: 1, 128>}, {pipeline_mode = #tpu.pipeline_mode<synchronous>, transform_indices = @transform_2, window_bounds = array<i64: 1, 128>}, {transform_indices = @transform_3, window_bounds = array<i64: 512, 128>}]} {
    %c0 = arith.constant 0 : index
    %c0_0 = arith.constant 0 : index
    %0 = vector.load %arg1[%c0, %c0_0] : memref<512x128xbf16, #tpu.memory_space<vmem>>, vector<512x128xbf16>
    %1 = arith.extf %0 : vector<512x128xbf16> to vector<512x128xf32>
    %c0_1 = arith.constant 0 : index
    %c0_2 = arith.constant 0 : index
    %2 = vector.load %arg2[%c0_1, %c0_2] : memref<1x128xf32, #tpu.memory_space<vmem>>, vector<1x128xf32>
    %3 = vector.broadcast %2 : vector<1x128xf32> to vector<512x128xf32>
    %4 = arith.mulf %1, %3 : vector<512x128xf32>
    %c0_3 = arith.constant 0 : index
    %c0_4 = arith.constant 0 : index
    %5 = vector.load %arg3[%c0_3, %c0_4] : memref<1x128xf32, #tpu.memory_space<vmem>>, vector<1x128xf32>
    %6 = vector.broadcast %5 : vector<1x128xf32> to vector<512x128xf32>
    %7 = arith.addf %4, %6 : vector<512x128xf32>
    %cst = arith.constant 0.000000e+00 : f32
    %8 = vector.broadcast %cst : f32 to vector<512x128xf32>
    %9 = arith.maximumf %7, %8 : vector<512x128xf32>
    %10 = arith.truncf %9 : vector<512x128xf32> to vector<512x128xbf16>
    %c0_5 = arith.constant 0 : index
    %c0_6 = arith.constant 0 : index
    %11 = vector.load %arg4[%c0_5, %c0_6] : memref<512x128xbf16, #tpu.memory_space<vmem>>, vector<512x128xbf16>
    tpu.vector_store %arg4[%c0_5, %c0_6], %10 {strides = array<i32>} : memref<512x128xbf16, #tpu.memory_space<vmem>>, vector<512x128xbf16>,
    return
  }
  func.func @transform_0(%arg0: i32) -> (i32, i32) {
    %c0_i32 = arith.constant 0 : i32
    %c0_i32_0 = arith.constant 0 : i32
    return %arg0, %c0_i32 : i32, i32
  }
  func.func @transform_1(%arg0: i32) -> (i32, i32) {
    %c0_i32 = arith.constant 0 : i32
    %c0_i32_0 = arith.constant 0 : i32
    %c0_i32_1 = arith.constant 0 : i32
    return %c0_i32, %c0_i32_0 : i32, i32
  }
  func.func @transform_2(%arg0: i32) -> (i32, i32) {
    %c0_i32 = arith.constant 0 : i32
    %c0_i32_0 = arith.constant 0 : i32
    %c0_i32_1 = arith.constant 0 : i32
    return %c0_i32, %c0_i32_0 : i32, i32
  }
  func.func @transform_3(%arg0: i32) -> (i32, i32) {
    %c0_i32 = arith.constant 0 : i32
    %c0_i32_0 = arith.constant 0 : i32
    return %arg0, %c0_i32 : i32, i32
  }
}

module attributes {stable_mosaic.version = 11 : i64} {
  func.func @_gmm_stats_kernel(%arg0: i32, %arg1: i32, %arg2: memref<1x128x128xbf16, #tpu.memory_space<vmem>>, %arg3: memref<1x128x128xbf16, #tpu.memory_space<vmem>>, %arg4: memref<1x128x128xbf16, #tpu.memory_space<vmem>>, %arg5: memref<1x1x128xf32, #tpu.memory_space<vmem>>, %arg6: memref<1x1x128xf32, #tpu.memory_space<vmem>>) attributes {dimension_semantics = [#tpu.dimension_semantics<parallel>, #tpu.dimension_semantics<arbitrary>], iteration_bounds = array<i64: 4, 1>, scalar_prefetch = 0 : i64, scratch_operands = 0 : i64, tpu.core_type = #tpu.core_type<tc>, window_params = [{transform_indices = @transform_0, window_bounds = array<i64: 1, 128, 128>}, {transform_indices = @transform_1, window_bounds = array<i64: 1, 128, 128>}, {transform_indices = @transform_2, window_bounds = array<i64: 1, 128, 128>}, {transform_indices = @transform_3, window_bounds = array<i64: 1, 1, 128>}, {transform_indices = @transform_4, window_bounds = array<i64: 1, 1, 128>}]} {
    %c0 = arith.constant 0 : index
    %c0_0 = arith.constant 0 : index
    %c0_1 = arith.constant 0 : index
    %0 = vector.load %arg2[%c0, %c0_0, %c0_1] : memref<1x128x128xbf16, #tpu.memory_space<vmem>>, vector<1x128x128xbf16>
    %1 = vector.shape_cast %0 : vector<1x128x128xbf16> to vector<128x128xbf16>
    %c0_2 = arith.constant 0 : index
    %c0_3 = arith.constant 0 : index
    %c0_4 = arith.constant 0 : index
    %2 = vector.load %arg3[%c0_2, %c0_3, %c0_4] : memref<1x128x128xbf16, #tpu.memory_space<vmem>>, vector<1x128x128xbf16>
    %3 = vector.shape_cast %2 : vector<1x128x128xbf16> to vector<128x128xbf16>
    %cst = arith.constant dense<0.000000e+00> : vector<128x128xf32>
    %4 = tpu.matmul %1, %3, %cst {dimension_numbers = #tpu.dot_dimension_numbers<[1], [0], [0], [1], [0, 0, 1, 1], [], []>} : vector<128x128xbf16>, vector<128x128xbf16>, vector<128x128xf32> -> vector<128x128xf32>
    %5 = vector.shape_cast %4 : vector<128x128xf32> to vector<1x128x128xf32>
    %6 = arith.truncf %5 : vector<1x128x128xf32> to vector<1x128x128xbf16>
    %c0_5 = arith.constant 0 : index
    %c0_6 = arith.constant 0 : index
    %c0_7 = arith.constant 0 : index
    %7 = vector.load %arg4[%c0_5, %c0_6, %c0_7] : memref<1x128x128xbf16, #tpu.memory_space<vmem>>, vector<1x128x128xbf16>
    tpu.vector_store %arg4[%c0_5, %c0_6, %c0_7], %6 {strides = array<i32>} : memref<1x128x128xbf16, #tpu.memory_space<vmem>>, vector<1x128x128xbf16>,
    %c0_i32 = arith.constant 0 : i32
    %8 = arith.cmpi eq, %arg1, %c0_i32 : i32
    %9 = arith.extui %8 : i1 to i32
    %c0_i32_8 = arith.constant 0 : i32
    %10 = arith.cmpi ne, %9, %c0_i32_8 : i32
    scf.if %10 {
      %cst_23 = arith.constant 0.000000e+00 : f32
      %24 = vector.broadcast %cst_23 : f32 to vector<1x1x128xf32>
      %c0_24 = arith.constant 0 : index
      %c0_25 = arith.constant 0 : index
      %c0_26 = arith.constant 0 : index
      %25 = vector.load %arg5[%c0_24, %c0_25, %c0_26] : memref<1x1x128xf32, #tpu.memory_space<vmem>>, vector<1x1x128xf32>
      tpu.vector_store %arg5[%c0_24, %c0_25, %c0_26], %24 {strides = array<i32>} : memref<1x1x128xf32, #tpu.memory_space<vmem>>, vector<1x1x128xf32>,
      %cst_27 = arith.constant 0.000000e+00 : f32
      %26 = vector.broadcast %cst_27 : f32 to vector<1x1x128xf32>
      %c0_28 = arith.constant 0 : index
      %c0_29 = arith.constant 0 : index
      %c0_30 = arith.constant 0 : index
      %27 = vector.load %arg6[%c0_28, %c0_29, %c0_30] : memref<1x1x128xf32, #tpu.memory_space<vmem>>, vector<1x1x128xf32>
      tpu.vector_store %arg6[%c0_28, %c0_29, %c0_30], %26 {strides = array<i32>} : memref<1x1x128xf32, #tpu.memory_space<vmem>>, vector<1x1x128xf32>,
    } else {
    }
    %c0_9 = arith.constant 0 : index
    %c0_10 = arith.constant 0 : index
    %c0_11 = arith.constant 0 : index
    %11 = vector.load %arg5[%c0_9, %c0_10, %c0_11] : memref<1x1x128xf32, #tpu.memory_space<vmem>>, vector<1x1x128xf32>
    %cst_12 = arith.constant dense<0.000000e+00> : vector<128xf32>
    %12 = vector.multi_reduction <add>, %4, %cst_12 [0] : vector<128x128xf32> to vector<128xf32>
    %13 = vector.shape_cast %12 : vector<128xf32> to vector<1x128xf32>
    %14 = vector.shape_cast %13 : vector<1x128xf32> to vector<1x1x128xf32>
    %15 = arith.addf %11, %14 : vector<1x1x128xf32>
    %c0_13 = arith.constant 0 : index
    %c0_14 = arith.constant 0 : index
    %c0_15 = arith.constant 0 : index
    %16 = vector.load %arg5[%c0_13, %c0_14, %c0_15] : memref<1x1x128xf32, #tpu.memory_space<vmem>>, vector<1x1x128xf32>
    tpu.vector_store %arg5[%c0_13, %c0_14, %c0_15], %15 {strides = array<i32>} : memref<1x1x128xf32, #tpu.memory_space<vmem>>, vector<1x1x128xf32>,
    %c0_16 = arith.constant 0 : index
    %c0_17 = arith.constant 0 : index
    %c0_18 = arith.constant 0 : index
    %17 = vector.load %arg6[%c0_16, %c0_17, %c0_18] : memref<1x1x128xf32, #tpu.memory_space<vmem>>, vector<1x1x128xf32>
    %18 = arith.mulf %4, %4 : vector<128x128xf32>
    %cst_19 = arith.constant dense<0.000000e+00> : vector<128xf32>
    %19 = vector.multi_reduction <add>, %18, %cst_19 [0] : vector<128x128xf32> to vector<128xf32>
    %20 = vector.shape_cast %19 : vector<128xf32> to vector<1x128xf32>
    %21 = vector.shape_cast %20 : vector<1x128xf32> to vector<1x1x128xf32>
    %22 = arith.addf %17, %21 : vector<1x1x128xf32>
    %c0_20 = arith.constant 0 : index
    %c0_21 = arith.constant 0 : index
    %c0_22 = arith.constant 0 : index
    %23 = vector.load %arg6[%c0_20, %c0_21, %c0_22] : memref<1x1x128xf32, #tpu.memory_space<vmem>>, vector<1x1x128xf32>
    tpu.vector_store %arg6[%c0_20, %c0_21, %c0_22], %22 {strides = array<i32>} : memref<1x1x128xf32, #tpu.memory_space<vmem>>, vector<1x1x128xf32>,
    return
  }
  func.func @transform_0(%arg0: i32, %arg1: i32) -> (i32, i32, i32) {
    %c0_i32 = arith.constant 0 : i32
    %c0_i32_0 = arith.constant 0 : i32
    return %arg0, %arg1, %c0_i32 : i32, i32, i32
  }
  func.func @transform_1(%arg0: i32, %arg1: i32) -> (i32, i32, i32) {
    %c0_i32 = arith.constant 0 : i32
    %c0_i32_0 = arith.constant 0 : i32
    %c0_i32_1 = arith.constant 0 : i32
    return %arg0, %c0_i32, %c0_i32_0 : i32, i32, i32
  }
  func.func @transform_2(%arg0: i32, %arg1: i32) -> (i32, i32, i32) {
    %c0_i32 = arith.constant 0 : i32
    %c0_i32_0 = arith.constant 0 : i32
    return %arg0, %arg1, %c0_i32 : i32, i32, i32
  }
  func.func @transform_3(%arg0: i32, %arg1: i32) -> (i32, i32, i32) {
    %c0_i32 = arith.constant 0 : i32
    %c0_i32_0 = arith.constant 0 : i32
    %c0_i32_1 = arith.constant 0 : i32
    return %arg0, %c0_i32, %c0_i32_0 : i32, i32, i32
  }
  func.func @transform_4(%arg0: i32, %arg1: i32) -> (i32, i32, i32) {
    %c0_i32 = arith.constant 0 : i32
    %c0_i32_0 = arith.constant 0 : i32
    %c0_i32_1 = arith.constant 0 : i32
    return %arg0, %c0_i32, %c0_i32_0 : i32, i32, i32
  }
}

module attributes {stable_mosaic.version = 11 : i64} {
  func.func @_gmm_stats_kernel(%arg0: i32, %arg1: i32, %arg2: memref<1x512x128xbf16, #tpu.memory_space<vmem>>, %arg3: memref<1x128x128xbf16, #tpu.memory_space<vmem>>, %arg4: memref<1x512x128xbf16, #tpu.memory_space<vmem>>, %arg5: memref<1x1x128xf32, #tpu.memory_space<vmem>>, %arg6: memref<1x1x128xf32, #tpu.memory_space<vmem>>) attributes {dimension_semantics = [#tpu.dimension_semantics<parallel>, #tpu.dimension_semantics<arbitrary>], iteration_bounds = array<i64: 4, 1>, scalar_prefetch = 0 : i64, scratch_operands = 0 : i64, tpu.core_type = #tpu.core_type<tc>, window_params = [{transform_indices = @transform_0, window_bounds = array<i64: 1, 512, 128>}, {transform_indices = @transform_1, window_bounds = array<i64: 1, 128, 128>}, {transform_indices = @transform_2, window_bounds = array<i64: 1, 512, 128>}, {transform_indices = @transform_3, window_bounds = array<i64: 1, 1, 128>}, {transform_indices = @transform_4, window_bounds = array<i64: 1, 1, 128>}]} {
    %c0 = arith.constant 0 : index
    %c0_0 = arith.constant 0 : index
    %c0_1 = arith.constant 0 : index
    %0 = vector.load %arg2[%c0, %c0_0, %c0_1] : memref<1x512x128xbf16, #tpu.memory_space<vmem>>, vector<1x512x128xbf16>
    %1 = vector.shape_cast %0 : vector<1x512x128xbf16> to vector<512x128xbf16>
    %c0_2 = arith.constant 0 : index
    %c0_3 = arith.constant 0 : index
    %c0_4 = arith.constant 0 : index
    %2 = vector.load %arg3[%c0_2, %c0_3, %c0_4] : memref<1x128x128xbf16, #tpu.memory_space<vmem>>, vector<1x128x128xbf16>
    %3 = vector.shape_cast %2 : vector<1x128x128xbf16> to vector<128x128xbf16>
    %cst = arith.constant dense<0.000000e+00> : vector<512x128xf32>
    %4 = tpu.matmul %1, %3, %cst {dimension_numbers = #tpu.dot_dimension_numbers<[1], [0], [0], [1], [0, 0, 1, 1], [], []>} : vector<512x128xbf16>, vector<128x128xbf16>, vector<512x128xf32> -> vector<512x128xf32>
    %5 = vector.shape_cast %4 : vector<512x128xf32> to vector<1x512x128xf32>
    %6 = arith.truncf %5 : vector<1x512x128xf32> to vector<1x512x128xbf16>
    %c0_5 = arith.constant 0 : index
    %c0_6 = arith.constant 0 : index
    %c0_7 = arith.constant 0 : index
    %7 = vector.load %arg4[%c0_5, %c0_6, %c0_7] : memref<1x512x128xbf16, #tpu.memory_space<vmem>>, vector<1x512x128xbf16>
    tpu.vector_store %arg4[%c0_5, %c0_6, %c0_7], %6 {strides = array<i32>} : memref<1x512x128xbf16, #tpu.memory_space<vmem>>, vector<1x512x128xbf16>,
    %c0_i32 = arith.constant 0 : i32
    %8 = arith.cmpi eq, %arg1, %c0_i32 : i32
    %9 = arith.extui %8 : i1 to i32
    %c0_i32_8 = arith.constant 0 : i32
    %10 = arith.cmpi ne, %9, %c0_i32_8 : i32
    scf.if %10 {
      %cst_23 = arith.constant 0.000000e+00 : f32
      %24 = vector.broadcast %cst_23 : f32 to vector<1x1x128xf32>
      %c0_24 = arith.constant 0 : index
      %c0_25 = arith.constant 0 : index
      %c0_26 = arith.constant 0 : index
      %25 = vector.load %arg5[%c0_24, %c0_25, %c0_26] : memref<1x1x128xf32, #tpu.memory_space<vmem>>, vector<1x1x128xf32>
      tpu.vector_store %arg5[%c0_24, %c0_25, %c0_26], %24 {strides = array<i32>} : memref<1x1x128xf32, #tpu.memory_space<vmem>>, vector<1x1x128xf32>,
      %cst_27 = arith.constant 0.000000e+00 : f32
      %26 = vector.broadcast %cst_27 : f32 to vector<1x1x128xf32>
      %c0_28 = arith.constant 0 : index
      %c0_29 = arith.constant 0 : index
      %c0_30 = arith.constant 0 : index
      %27 = vector.load %arg6[%c0_28, %c0_29, %c0_30] : memref<1x1x128xf32, #tpu.memory_space<vmem>>, vector<1x1x128xf32>
      tpu.vector_store %arg6[%c0_28, %c0_29, %c0_30], %26 {strides = array<i32>} : memref<1x1x128xf32, #tpu.memory_space<vmem>>, vector<1x1x128xf32>,
    } else {
    }
    %c0_9 = arith.constant 0 : index
    %c0_10 = arith.constant 0 : index
    %c0_11 = arith.constant 0 : index
    %11 = vector.load %arg5[%c0_9, %c0_10, %c0_11] : memref<1x1x128xf32, #tpu.memory_space<vmem>>, vector<1x1x128xf32>
    %cst_12 = arith.constant dense<0.000000e+00> : vector<128xf32>
    %12 = vector.multi_reduction <add>, %4, %cst_12 [0] : vector<512x128xf32> to vector<128xf32>
    %13 = vector.shape_cast %12 : vector<128xf32> to vector<1x128xf32>
    %14 = vector.shape_cast %13 : vector<1x128xf32> to vector<1x1x128xf32>
    %15 = arith.addf %11, %14 : vector<1x1x128xf32>
    %c0_13 = arith.constant 0 : index
    %c0_14 = arith.constant 0 : index
    %c0_15 = arith.constant 0 : index
    %16 = vector.load %arg5[%c0_13, %c0_14, %c0_15] : memref<1x1x128xf32, #tpu.memory_space<vmem>>, vector<1x1x128xf32>
    tpu.vector_store %arg5[%c0_13, %c0_14, %c0_15], %15 {strides = array<i32>} : memref<1x1x128xf32, #tpu.memory_space<vmem>>, vector<1x1x128xf32>,
    %c0_16 = arith.constant 0 : index
    %c0_17 = arith.constant 0 : index
    %c0_18 = arith.constant 0 : index
    %17 = vector.load %arg6[%c0_16, %c0_17, %c0_18] : memref<1x1x128xf32, #tpu.memory_space<vmem>>, vector<1x1x128xf32>
    %18 = arith.mulf %4, %4 : vector<512x128xf32>
    %cst_19 = arith.constant dense<0.000000e+00> : vector<128xf32>
    %19 = vector.multi_reduction <add>, %18, %cst_19 [0] : vector<512x128xf32> to vector<128xf32>
    %20 = vector.shape_cast %19 : vector<128xf32> to vector<1x128xf32>
    %21 = vector.shape_cast %20 : vector<1x128xf32> to vector<1x1x128xf32>
    %22 = arith.addf %17, %21 : vector<1x1x128xf32>
    %c0_20 = arith.constant 0 : index
    %c0_21 = arith.constant 0 : index
    %c0_22 = arith.constant 0 : index
    %23 = vector.load %arg6[%c0_20, %c0_21, %c0_22] : memref<1x1x128xf32, #tpu.memory_space<vmem>>, vector<1x1x128xf32>
    tpu.vector_store %arg6[%c0_20, %c0_21, %c0_22], %22 {strides = array<i32>} : memref<1x1x128xf32, #tpu.memory_space<vmem>>, vector<1x1x128xf32>,
    return
  }
  func.func @transform_0(%arg0: i32, %arg1: i32) -> (i32, i32, i32) {
    %c0_i32 = arith.constant 0 : i32
    %c0_i32_0 = arith.constant 0 : i32
    return %arg0, %arg1, %c0_i32 : i32, i32, i32
  }
  func.func @transform_1(%arg0: i32, %arg1: i32) -> (i32, i32, i32) {
    %c0_i32 = arith.constant 0 : i32
    %c0_i32_0 = arith.constant 0 : i32
    %c0_i32_1 = arith.constant 0 : i32
    return %arg0, %c0_i32, %c0_i32_0 : i32, i32, i32
  }
  func.func @transform_2(%arg0: i32, %arg1: i32) -> (i32, i32, i32) {
    %c0_i32 = arith.constant 0 : i32
    %c0_i32_0 = arith.constant 0 : i32
    return %arg0, %arg1, %c0_i32 : i32, i32, i32
  }
  func.func @transform_3(%arg0: i32, %arg1: i32) -> (i32, i32, i32) {
    %c0_i32 = arith.constant 0 : i32
    %c0_i32_0 = arith.constant 0 : i32
    %c0_i32_1 = arith.constant 0 : i32
    return %arg0, %c0_i32, %c0_i32_0 : i32, i32, i32
  }
  func.func @transform_4(%arg0: i32, %arg1: i32) -> (i32, i32, i32) {
    %c0_i32 = arith.constant 0 : i32
    %c0_i32_0 = arith.constant 0 : i32
    %c0_i32_1 = arith.constant 0 : i32
    return %arg0, %c0_i32, %c0_i32_0 : i32, i32, i32
  }
}

module attributes {stable_mosaic.version = 11 : i64} {
  func.func @_bn_relu_kernel(%arg0: i32, %arg1: memref<512x128xbf16, #tpu.memory_space<vmem>>, %arg2: memref<1x128xf32, #tpu.memory_space<vmem>>, %arg3: memref<1x128xf32, #tpu.memory_space<vmem>>, %arg4: memref<512x128xbf16, #tpu.memory_space<vmem>>) attributes {dimension_semantics = [#tpu.dimension_semantics<parallel>], iteration_bounds = array<i64: 4>, scalar_prefetch = 0 : i64, scratch_operands = 0 : i64, tpu.core_type = #tpu.core_type<tc>, window_params = [{transform_indices = @transform_0, window_bounds = array<i64: 512, 128>}, {pipeline_mode = #tpu.pipeline_mode<synchronous>, transform_indices = @transform_1, window_bounds = array<i64: 1, 128>}, {pipeline_mode = #tpu.pipeline_mode<synchronous>, transform_indices = @transform_2, window_bounds = array<i64: 1, 128>}, {transform_indices = @transform_3, window_bounds = array<i64: 512, 128>}]} {
    %c0 = arith.constant 0 : index
    %c0_0 = arith.constant 0 : index
    %0 = vector.load %arg1[%c0, %c0_0] : memref<512x128xbf16, #tpu.memory_space<vmem>>, vector<512x128xbf16>
    %1 = arith.extf %0 : vector<512x128xbf16> to vector<512x128xf32>
    %c0_1 = arith.constant 0 : index
    %c0_2 = arith.constant 0 : index
    %2 = vector.load %arg2[%c0_1, %c0_2] : memref<1x128xf32, #tpu.memory_space<vmem>>, vector<1x128xf32>
    %3 = vector.broadcast %2 : vector<1x128xf32> to vector<512x128xf32>
    %4 = arith.mulf %1, %3 : vector<512x128xf32>
    %c0_3 = arith.constant 0 : index
    %c0_4 = arith.constant 0 : index
    %5 = vector.load %arg3[%c0_3, %c0_4] : memref<1x128xf32, #tpu.memory_space<vmem>>, vector<1x128xf32>
    %6 = vector.broadcast %5 : vector<1x128xf32> to vector<512x128xf32>
    %7 = arith.addf %4, %6 : vector<512x128xf32>
    %cst = arith.constant 0.000000e+00 : f32
    %8 = vector.broadcast %cst : f32 to vector<512x128xf32>
    %9 = arith.maximumf %7, %8 : vector<512x128xf32>
    %10 = arith.truncf %9 : vector<512x128xf32> to vector<512x128xbf16>
    %c0_5 = arith.constant 0 : index
    %c0_6 = arith.constant 0 : index
    %11 = vector.load %arg4[%c0_5, %c0_6] : memref<512x128xbf16, #tpu.memory_space<vmem>>, vector<512x128xbf16>
    tpu.vector_store %arg4[%c0_5, %c0_6], %10 {strides = array<i32>} : memref<512x128xbf16, #tpu.memory_space<vmem>>, vector<512x128xbf16>,
    return
  }
  func.func @transform_0(%arg0: i32) -> (i32, i32) {
    %c0_i32 = arith.constant 0 : i32
    %c0_i32_0 = arith.constant 0 : i32
    return %arg0, %c0_i32 : i32, i32
  }
  func.func @transform_1(%arg0: i32) -> (i32, i32) {
    %c0_i32 = arith.constant 0 : i32
    %c0_i32_0 = arith.constant 0 : i32
    %c0_i32_1 = arith.constant 0 : i32
    return %c0_i32, %c0_i32_0 : i32, i32
  }
  func.func @transform_2(%arg0: i32) -> (i32, i32) {
    %c0_i32 = arith.constant 0 : i32
    %c0_i32_0 = arith.constant 0 : i32
    %c0_i32_1 = arith.constant 0 : i32
    return %c0_i32, %c0_i32_0 : i32, i32
  }
  func.func @transform_3(%arg0: i32) -> (i32, i32) {
    %c0_i32 = arith.constant 0 : i32
    %c0_i32_0 = arith.constant 0 : i32
    return %arg0, %c0_i32 : i32, i32
  }
}

module attributes {stable_mosaic.version = 11 : i64} {
  func.func @_gmm_tanh_kernel(%arg0: i32, %arg1: i32, %arg2: memref<1x512x128xbf16, #tpu.memory_space<vmem>>, %arg3: memref<1x128x128xbf16, #tpu.memory_space<vmem>>, %arg4: memref<1x512x128xf32, #tpu.memory_space<vmem>>) attributes {dimension_semantics = [#tpu.dimension_semantics<parallel>, #tpu.dimension_semantics<parallel>], iteration_bounds = array<i64: 4, 4>, scalar_prefetch = 0 : i64, scratch_operands = 0 : i64, tpu.core_type = #tpu.core_type<tc>, window_params = [{transform_indices = @transform_0, window_bounds = array<i64: 1, 512, 128>}, {transform_indices = @transform_1, window_bounds = array<i64: 1, 128, 128>}, {transform_indices = @transform_2, window_bounds = array<i64: 1, 512, 128>}]} {
    %c0 = arith.constant 0 : index
    %c0_0 = arith.constant 0 : index
    %c0_1 = arith.constant 0 : index
    %0 = vector.load %arg2[%c0, %c0_0, %c0_1] : memref<1x512x128xbf16, #tpu.memory_space<vmem>>, vector<1x512x128xbf16>
    %1 = vector.shape_cast %0 : vector<1x512x128xbf16> to vector<512x128xbf16>
    %c0_2 = arith.constant 0 : index
    %c0_3 = arith.constant 0 : index
    %c0_4 = arith.constant 0 : index
    %2 = vector.load %arg3[%c0_2, %c0_3, %c0_4] : memref<1x128x128xbf16, #tpu.memory_space<vmem>>, vector<1x128x128xbf16>
    %3 = vector.shape_cast %2 : vector<1x128x128xbf16> to vector<128x128xbf16>
    %cst = arith.constant dense<0.000000e+00> : vector<512x128xf32>
    %4 = tpu.matmul %1, %3, %cst {dimension_numbers = #tpu.dot_dimension_numbers<[1], [0], [0], [1], [0, 0, 1, 1], [], []>} : vector<512x128xbf16>, vector<128x128xbf16>, vector<512x128xf32> -> vector<512x128xf32>
    %5 = math.tanh %4 : vector<512x128xf32>
    %6 = vector.shape_cast %5 : vector<512x128xf32> to vector<1x512x128xf32>
    %c0_5 = arith.constant 0 : index
    %c0_6 = arith.constant 0 : index
    %c0_7 = arith.constant 0 : index
    %7 = vector.load %arg4[%c0_5, %c0_6, %c0_7] : memref<1x512x128xf32, #tpu.memory_space<vmem>>, vector<1x512x128xf32>
    tpu.vector_store %arg4[%c0_5, %c0_6, %c0_7], %6 {strides = array<i32>} : memref<1x512x128xf32, #tpu.memory_space<vmem>>, vector<1x512x128xf32>,
    return
  }
  func.func @transform_0(%arg0: i32, %arg1: i32) -> (i32, i32, i32) {
    %c0_i32 = arith.constant 0 : i32
    %c0_i32_0 = arith.constant 0 : i32
    return %arg0, %arg1, %c0_i32 : i32, i32, i32
  }
  func.func @transform_1(%arg0: i32, %arg1: i32) -> (i32, i32, i32) {
    %c0_i32 = arith.constant 0 : i32
    %c0_i32_0 = arith.constant 0 : i32
    %c0_i32_1 = arith.constant 0 : i32
    return %arg0, %c0_i32, %c0_i32_0 : i32, i32, i32
  }
  func.func @transform_2(%arg0: i32, %arg1: i32) -> (i32, i32, i32) {
    %c0_i32 = arith.constant 0 : i32
    %c0_i32_0 = arith.constant 0 : i32
    return %arg0, %arg1, %c0_i32 : i32, i32, i32
  }
}

</mosaic_0001>

<bundles_post_ra>
// kernel: generator_forward.9
= control target key start
LH: loop header
LB: loop body
LE: loop exit
PB: predicated region body
PF: predicated region fallthrough
CT: control target
= control target key end

     0   :  { %10 = vsyncpa [#allocation3], 0  ;;  %s772_s15 = smov [#allocation2]   ;;  %s921_s0 = inlined_call_operand.vmem [shape: bf16[1,128,256], index: 0, kind: input, shape index: {}]   ;;  %s922_s1 = inlined_call_operand.hbm [shape: bf16[1,256,128], index: 1, kind: input, shape index: {}]   ;;  %s923_s2 = inlined_call_operand.vmem [shape: bf16[1,128,128], index: 2, kind: output, shape index: {0}]   ;;  %s924_s3 = inlined_call_operand.vmem [shape: f32[1,1,128], index: 3, kind: output, shape index: {1}]   ;;  %s925_s4 = inlined_call_operand.vmem [shape: f32[1,1,128], index: 4, kind: output, shape index: {2}]  }
   0x1   :  { %s18_s16 = sshll.u32 %s772_s15, 4  ;;  %s748_s19 = scalar_lea.hbm %s922_s1, 2048  ;;  %s19_s16 = int_to_ptr.vmem [resolvable:$true] %s18_s16 }
   0x2   :  { %p749_p0 = scmp.ne.s32.totalorder %s922_s1, %s748_s19  ;;  %p752_p1 = scmp.lt.u32.totalorder %s748_s19, %s922_s1 }
   0x4   :  { %p754_p2 = pnand %p752_p1, %p749_p0 }
   0x6   :  { %757 = shalt.err (!%p754_p2)
}
   0x7   :  { %s758_s24 = scalar_lea.vmem %s19_s16, 2048  ;;  %p763_p4 = scmp.lt.s32.totalorder %s19_s16, %s19_s16 }
   0x8   :  { %p759_p3 = scmp.ne.s32.totalorder %s19_s16, %s758_s24  ;;  %p764_p5 = scmp.lt.s32.totalorder %s758_s24, %s758_s24 }
   0xa   :  { %p765_p6 = por %p764_p5, %p763_p4 }
   0xc   :  { %p766_p7 = pnand %p765_p6, %p759_p3 }
   0xe   :  { %769 = shalt.err (!%p766_p7)
}
   0xf   :  { %s773_s25 = smov 64   ;;  %s774_s26 = smov 4  }
  0x10   :  { %24 = dma.hbm_to_vmem [thread:$0]  %s922_s1, 2048, %s19_s16, [#allocation3], %s773_s25, %s773_s25, %s774_s26  }
  0x11   :  { %770 = dma.done.wait [#allocation3], 2048  }
  0x12   :  { %771 = vsyncadd [#allocation3], 4294965248  ;;  %v708_v0 = vld [vmem:[#allocation2 + $0x40] sm:$0xff]   ;;  %v710_v2 = vld [vmem:[#allocation2 + $0x48] sm:$0xff]   ;;  %v775_v32 = vmov 0.0  }
  0x13   :  { %v709_v1 = vld [vmem:[#allocation2] sm:$0xff]   ;;  %624 = vmatprep.subr.bf16.mxu0 %v708_v0  ;;  %688 = vmatprep.subr.bf16.mxu1 %v708_v0  ;;  %v711_v3 = vld [vmem:[#allocation2 + $0x8] sm:$0xff]   ;;  %v712_v4 = vld [vmem:[#allocation2 + $0x50] sm:$0xff]   ;;  %434 = vst [vmem:[%s924_s3] sm:$0x1] %v775_v32 }
  0x14   :  { %625 = vmatpush3.bf16.msra.mxu0 %v709_v1  ;;  %696 = vmatpush3.bf16.msra.mxu1 %v709_v1  ;;  %v713_v5 = vld [vmem:[#allocation2 + $0x10] sm:$0xff]   ;;  %v714_v6 = vld [vmem:[#allocation2 + $0x58] sm:$0xff]   ;;  %v716_v8 = vld [vmem:[#allocation2 + $0x60] sm:$0xff]   ;;  %435 = vst [vmem:[%s925_s4] sm:$0x1] %v775_v32 }
  0x15   :  { %626 = vmatprep.subr.bf16.mxu0 %v710_v2  ;;  %689 = vmatprep.subr.bf16.mxu1 %v710_v2  ;;  %v715_v7 = vld [vmem:[#allocation2 + $0x18] sm:$0xff]   ;;  %v717_v9 = vld [vmem:[#allocation2 + $0x20] sm:$0xff]   ;;  %v718_v10 = vld [vmem:[#allocation2 + $0x68] sm:$0xff]  }
  0x16   :  { %v726_v11 = vld [vmem:[%s921_s0 + $0x4] ss:$8 sps:$4 sm:$0xff]   ;;  %v720_v14 = vld [vmem:[#allocation2 + $0x70] sm:$0xff]   ;;  %v722_v16 = vld [vmem:[#allocation2 + $0x78] sm:$0xff]  }
  0x17   :  { %v719_v12 = vld [vmem:[#allocation2 + $0x28] sm:$0xff]   ;;  %285 = vmatprep.mubr.bf16.mxu0 %v726_v11  ;;  %v721_v15 = vld [vmem:[#allocation2 + $0x30] sm:$0xff]   ;;  %v723_v17 = vld [vmem:[#allocation2 + $0x38] sm:$0xff]  }
  0x18   :  { %627 = vmatpush3.bf16.msra.mxu0 %v711_v3  ;;  %697 = vmatpush3.bf16.msra.mxu1 %v711_v3  ;;  %v732_v13 = vld [vmem:[%s921_s0 + $0x44] ss:$8 sps:$4 sm:$0xff]   ;;  %v724_v18 = vld [vmem:[%s921_s0] ss:$8 sps:$4 sm:$0xff]   ;;  %v727_v20 = vld [vmem:[%s921_s0 + $0x14] ss:$8 sps:$4 sm:$0xff]  }
  0x19   :  { %628 = vmatprep.subr.bf16.mxu0 %v712_v4  ;;  %690 = vmatprep.subr.bf16.mxu1 %v712_v4  ;;  %v730_v19 = vld [vmem:[%s921_s0 + $0x40] ss:$8 sps:$4 sm:$0xff]   ;;  %v736_v21 = vld [vmem:[%s921_s0 + $0x54] ss:$8 sps:$4 sm:$0xff]   ;;  %v729_v22 = vld [vmem:[%s921_s0 + $0x10] ss:$8 sps:$4 sm:$0xff]  }
  0x1a   :  { %317 = vmatprep.mubr.bf16.mxu1 %v732_v13  ;;  %v738_v23 = vld [vmem:[%s921_s0 + $0x50] ss:$8 sps:$4 sm:$0xff]   ;;  %v733_v24 = vld [vmem:[%s921_s0 + $0x24] ss:$8 sps:$4 sm:$0xff]   ;;  %v735_v26 = vld [vmem:[%s921_s0 + $0x20] ss:$8 sps:$4 sm:$0xff]  }
  0x1b   :  { %v742_v25 = vld [vmem:[%s921_s0 + $0x64] ss:$8 sps:$4 sm:$0xff]   ;;  %v744_v27 = vld [vmem:[%s921_s0 + $0x60] ss:$8 sps:$4 sm:$0xff]   ;;  %v739_v28 = vld [vmem:[%s921_s0 + $0x34] ss:$8 sps:$4 sm:$0xff]  }
  0x1c   :  { %629 = vmatpush3.bf16.msra.mxu0 %v713_v5  ;;  %698 = vmatpush3.bf16.msra.mxu1 %v713_v5  ;;  %v745_v29 = vld [vmem:[%s921_s0 + $0x74] ss:$8 sps:$4 sm:$0xff]   ;;  %v741_v30 = vld [vmem:[%s921_s0 + $0x30] ss:$8 sps:$4 sm:$0xff]  }
  0x1d   :  { %630 = vmatprep.subr.bf16.mxu0 %v714_v6  ;;  %691 = vmatprep.subr.bf16.mxu1 %v714_v6  ;;  %v747_v31 = vld [vmem:[%s921_s0 + $0x70] ss:$8 sps:$4 sm:$0xff]  }
  0x20   :  { %631 = vmatpush3.bf16.msra.mxu0 %v715_v7  ;;  %699 = vmatpush3.bf16.msra.mxu1 %v715_v7 }
  0x21   :  { %632 = vmatprep.subr.bf16.mxu0 %v716_v8  ;;  %692 = vmatprep.subr.bf16.mxu1 %v716_v8 }
  0x24   :  { %633 = vmatpush3.bf16.msra.mxu0 %v717_v9  ;;  %700 = vmatpush3.bf16.msra.mxu1 %v717_v9 }
  0x25   :  { %634 = vmatprep.subr.bf16.mxu0 %v718_v10  ;;  %693 = vmatprep.subr.bf16.mxu1 %v718_v10 }
  0x28   :  { %635 = vmatpush3.bf16.msra.mxu0 %v719_v12  ;;  %701 = vmatpush3.bf16.msra.mxu1 %v719_v12 }
  0x29   :  { %636 = vmatprep.subr.bf16.mxu0 %v720_v14  ;;  %694 = vmatprep.subr.bf16.mxu1 %v720_v14 }
  0x2c   :  { %637 = vmatpush3.bf16.msra.mxu0 %v721_v15  ;;  %702 = vmatpush3.bf16.msra.mxu1 %v721_v15 }
  0x2d   :  { %638 = vmatprep.subr.bf16.mxu0 %v722_v16  ;;  %695 = vmatprep.subr.bf16.mxu1 %v722_v16 }
  0x30   :  { %639 = vmatpush3.bf16.msra.mxu0 %v723_v17  ;;  %703 = vmatpush3.bf16.msra.mxu1 %v723_v17 }
  0x33   :  { %286 = vmatmul.mubr.bf16.vlgmr.msra.gmra.mrb[0].mxu0 %v724_v18  ;;  %318 = vmatmul.mubr.bf16.vlgmr.msra.gmra.mrb[0].mxu1 %v730_v19 }
  0x34   :  { %293 = vmatprep.mubr.bf16.mxu0 %v727_v20  ;;  %325 = vmatprep.mubr.bf16.mxu1 %v736_v21 }
  0x3b   :  { %294 = vmatmul.mubr.bf16.gmra.mrb[4].mxu0 %v729_v22  ;;  %326 = vmatmul.mubr.bf16.gmra.mrb[4].mxu1 %v738_v23 }
  0x3c   :  { %301 = vmatprep.mubr.bf16.mxu0 %v733_v24  ;;  %333 = vmatprep.mubr.bf16.mxu1 %v742_v25 }
  0x43   :  { %302 = vmatmul.mubr.bf16.gmra.mrb[8].mxu0 %v735_v26  ;;  %334 = vmatmul.mubr.bf16.gmra.mrb[8].mxu1 %v744_v27 }
  0x44   :  { %309 = vmatprep.mubr.bf16.mxu0 %v739_v28  ;;  %341 = vmatprep.mubr.bf16.mxu1 %v745_v29 }
  0x4b   :  { %310 = vmatmul.mubr.bf16.gmra.mrb[12].mxu0 %v741_v30  ;;  %342 = vmatmul.mubr.bf16.gmra.mrb[12].mxu1 %v747_v31 }
 0x106   :  { %v640_v33 = vpop.f32.mrb[0].mxu0  ;;  %v664_v34 = vpop.f32.mrb[0].mxu1 }
 0x107   :  { %v641_v35 = vpop.f32.mrb[1].mxu0  ;;  %v665_v36 = vpop.f32.mrb[1].mxu1 }
 0x108   :  { %v642_v37 = vadd.f32 %v641_v35, %v640_v33  ;;  %v643_v38 = vpop.f32.mrb[2].mxu0  ;;  %v867_v39 = vadd.f32 %v665_v36, %v664_v34  ;;  %v667_v40 = vpop.f32.mrb[2].mxu1 }
 0x109   :  { %v644_v41 = vpop.f32.mrb[3].mxu0  ;;  %v668_v42 = vpop.f32.mrb[3].mxu1 }
 0x10a   :  { %v645_v43 = vadd.f32 %v644_v41, %v643_v38  ;;  %v869_v44 = vadd.f32 %v668_v42, %v667_v40  ;;  %v461_v45 = vmul.f32 %v642_v37, %v642_v37 }
 0x10c   :  { %v580_v46 = vpack.c.bf16 %v645_v43, %v642_v37  ;;  %v437_v47 = vadd.f32 %v645_v43, %v642_v37  ;;  %v462_v48 = vmul.f32 %v645_v43, %v645_v43  ;;  %v600_v49 = vpack.c.bf16 %v869_v44, %v867_v39 }
 0x10e   :  { %581 = vst [vmem:[%s923_s2] sm:$0xff] %v580_v46   ;;  %v477_v50 = vadd.f32 %v462_v48, %v461_v45  ;;  %v646_v51 = vpop.f32.mrb[4].mxu0  ;;  %620 = vst [vmem:[%s923_s2 + $0x20] sm:$0xff] %v600_v49   ;;  %v670_v52 = vpop.f32.mrb[4].mxu1  ;;  %v469_v48 = vmul.f32 %v867_v39, %v867_v39 }
 0x10f   :  { %v647_v53 = vpop.f32.mrb[5].mxu0  ;;  %v671_v54 = vpop.f32.mrb[5].mxu1 }
 0x110   :  { %v648_v55 = vadd.f32 %v647_v53, %v646_v51  ;;  %v649_v56 = vpop.f32.mrb[6].mxu0  ;;  %v879_v57 = vadd.f32 %v671_v54, %v670_v52  ;;  %v673_v58 = vpop.f32.mrb[6].mxu1  ;;  %v470_v51 = vmul.f32 %v869_v44, %v869_v44 }
 0x111   :  { %v650_v59 = vpop.f32.mrb[7].mxu0  ;;  %v674_v60 = vpop.f32.mrb[7].mxu1 }
 0x112   :  { %v438_v61 = vadd.f32 %v648_v55, %v437_v47  ;;  %v463_v62 = vmul.f32 %v648_v55, %v648_v55  ;;  %v651_v63 = vadd.f32 %v650_v59, %v649_v56  ;;  %v675_v0 = vadd.f32 %v674_v60, %v673_v58 }
 0x113   :  { %v471_v54 = vmul.f32 %v879_v57, %v879_v57 }
 0x114   :  { %v478_v1 = vadd.f32 %v477_v50, %v463_v62  ;;  %v585_v2 = vpack.c.bf16 %v651_v63, %v648_v55  ;;  %v439_v3 = vadd.f32 %v651_v63, %v438_v61  ;;  %v464_v4 = vmul.f32 %v651_v63, %v651_v63 }
 0x115   :  { %v605_v5 = vpack.c.bf16 %v675_v0, %v879_v57  ;;  %v472_v58 = vmul.f32 %v675_v0, %v675_v0 }
 0x116   :  { %617 = vst [vmem:[%s923_s2 + $0x8] sm:$0xff] %v585_v2   ;;  %v479_v6 = vadd.f32 %v478_v1, %v464_v4  ;;  %v652_v7 = vpop.f32.mrb[8].mxu0  ;;  %v676_v8 = vpop.f32.mrb[8].mxu1 }
 0x117   :  { %v653_v9 = vpop.f32.mrb[9].mxu0  ;;  %621 = vst [vmem:[%s923_s2 + $0x28] sm:$0xff] %v605_v5   ;;  %v677_v10 = vpop.f32.mrb[9].mxu1 }
 0x118   :  { %v654_v11 = vadd.f32 %v653_v9, %v652_v7  ;;  %v655_v12 = vpop.f32.mrb[10].mxu0  ;;  %v678_v13 = vadd.f32 %v677_v10, %v676_v8  ;;  %v679_v14 = vpop.f32.mrb[10].mxu1 }
 0x119   :  { %v656_v15 = vpop.f32.mrb[11].mxu0  ;;  %v680_v16 = vpop.f32.mrb[11].mxu1 }
 0x11a   :  { %v440_v17 = vadd.f32 %v654_v11, %v439_v3  ;;  %v465_v18 = vmul.f32 %v654_v11, %v654_v11  ;;  %v657_v19 = vadd.f32 %v656_v15, %v655_v12  ;;  %v681_v20 = vadd.f32 %v680_v16, %v679_v14  ;;  %v436_v16 = vld [vmem:[%s924_s3] sm:$0x1] }
 0x11b   :  { %v473_v61 = vmul.f32 %v678_v13, %v678_v13 }
 0x11c   :  { %v480_v21 = vadd.f32 %v479_v6, %v465_v18  ;;  %v590_v22 = vpack.c.bf16 %v657_v19, %v654_v11  ;;  %v441_v23 = vadd.f32 %v657_v19, %v440_v17  ;;  %v466_v24 = vmul.f32 %v657_v19, %v657_v19  ;;  %v460_v19 = vld [vmem:[%s925_s4] sm:$0x1] }
 0x11d   :  { %v610_v25 = vpack.c.bf16 %v681_v20, %v678_v13  ;;  %v474_v2 = vmul.f32 %v681_v20, %v681_v20 }
 0x11e   :  { %618 = vst [vmem:[%s923_s2 + $0x10] sm:$0xff] %v590_v22   ;;  %v481_v26 = vadd.f32 %v480_v21, %v466_v24  ;;  %v658_v27 = vpop.f32.mrb[12].mxu0  ;;  %v682_v28 = vpop.f32.mrb[12].mxu1 }
 0x11f   :  { %v659_v29 = vpop.f32.mrb[13].mxu0  ;;  %622 = vst [vmem:[%s923_s2 + $0x30] sm:$0xff] %v610_v25   ;;  %v683_v30 = vpop.f32.mrb[13].mxu1 }
 0x120   :  { %v660_v31 = vadd.f32 %v659_v29, %v658_v27  ;;  %v661_v32 = vpop.f32.mrb[14].mxu0  ;;  %v684_v33 = vadd.f32 %v683_v30, %v682_v28  ;;  %v685_v34 = vpop.f32.mrb[14].mxu1 }
 0x121   :  { %v662_v35 = vpop.f32.mrb[15].mxu0  ;;  %v686_v36 = vpop.f32.mrb[15].mxu1 }
 0x122   :  { %v442_v37 = vadd.f32 %v660_v31, %v441_v23  ;;  %v467_v38 = vmul.f32 %v660_v31, %v660_v31  ;;  %v663_v40 = vadd.f32 %v662_v35, %v661_v32  ;;  %v687_v41 = vadd.f32 %v686_v36, %v685_v34 }
 0x123   :  { %v475_v3 = vmul.f32 %v684_v33, %v684_v33 }
 0x124   :  { %v482_v42 = vadd.f32 %v481_v26, %v467_v38  ;;  %v595_v43 = vpack.c.bf16 %v663_v40, %v660_v31  ;;  %v443_v45 = vadd.f32 %v663_v40, %v442_v37  ;;  %v468_v46 = vmul.f32 %v663_v40, %v663_v40 }
 0x125   :  { %v615_v47 = vpack.c.bf16 %v687_v41, %v684_v33  ;;  %v476_v7 = vmul.f32 %v687_v41, %v687_v41 }
 0x126   :  { %619 = vst [vmem:[%s923_s2 + $0x18] sm:$0xff] %v595_v43   ;;  %v444_v49 = vadd.f32 %v867_v39, %v443_v45  ;;  %v483_v50 = vadd.f32 %v482_v42, %v468_v46 }
 0x127   :  { %623 = vst [vmem:[%s923_s2 + $0x38] sm:$0xff] %v615_v47  }
 0x128   :  { %v445_v52 = vadd.f32 %v869_v44, %v444_v49  ;;  %v484_v53 = vadd.f32 %v483_v50, %v469_v48 }
 0x12a   :  { %v485_v55 = vadd.f32 %v484_v53, %v470_v51  ;;  %v446_v56 = vadd.f32 %v879_v57, %v445_v52 }
 0x12c   :  { %v447_v59 = vadd.f32 %v675_v0, %v446_v56  ;;  %v486_v39 = vadd.f32 %v485_v55, %v471_v54 }
 0x12e   :  { %v448_v60 = vadd.f32 %v678_v13, %v447_v59  ;;  %v487_v62 = vadd.f32 %v486_v39, %v472_v58 }
 0x130   :  { %v488_v63 = vadd.f32 %v487_v62, %v473_v61  ;;  %v449_v1 = vadd.f32 %v681_v20, %v448_v60 }
 0x132   :  { %v489_v4 = vadd.f32 %v488_v63, %v474_v2  ;;  %v450_v5 = vadd.f32 %v684_v33, %v449_v1 }
 0x134   :  { %v490_v44 = vadd.f32 %v489_v4, %v475_v3  ;;  %v451_v6 = vadd.f32 %v687_v41, %v450_v5 }
 0x136   :  { %v452_v8 = vrot.slane %v451_v6, 4  ;;  %v491_v9 = vadd.f32 %v490_v44, %v476_v7 }
 0x138   :  { %v453_v10 = vadd.f32 %v452_v8, %v451_v6  ;;  %v492_v11 = vrot.slane %v491_v9, 4 }
 0x13a   :  { %v454_v57 = vrot.slane %v453_v10, 2  ;;  %v493_v12 = vadd.f32 %v492_v11, %v491_v9 }
 0x13c   :  { %v455_v0 = vadd.f32 %v454_v57, %v453_v10  ;;  %v494_v14 = vrot.slane %v493_v12, 2 }
 0x13e   :  { %v456_v15 = vrot.slane %v455_v0, 1  ;;  %v495_v13 = vadd.f32 %v494_v14, %v493_v12 }
 0x140   :  { %v457_v17 = vadd.f32 %v456_v15, %v455_v0  ;;  %v496_v18 = vrot.slane %v495_v13, 1 }
 0x142   :  { %v458_v20 = vadd.f32 %v457_v17, %v436_v16  ;;  %v497_v21 = vadd.f32 %v496_v18, %v495_v13 }
 0x144   :  { %459 = vst [vmem:[%s924_s3] sm:$0x1] %v458_v20  ;;  %v498_v22 = vadd.f32 %v497_v21, %v460_v19 }
 0x146   :  { %499 = vst [vmem:[%s925_s4] sm:$0x1] %v498_v22 }
 0x147   :  { %512 = vsyncpa [#allocation3], 1 }

// kernel: generator_forward.10
= control target key start
LH: loop header
LB: loop body
LE: loop exit
PB: predicated region body
PF: predicated region fallthrough
CT: control target
= control target key end

     0   :  { %s422_s0 = inlined_call_operand.vmem [shape: bf16[128,128], index: 0, kind: input, shape index: {}]   ;;  %s423_s1 = inlined_call_operand.vmem [shape: f32[1,128], index: 1, kind: input, shape index: {}]   ;;  %s424_s2 = inlined_call_operand.vmem [shape: f32[1,128], index: 2, kind: input, shape index: {}]   ;;  %s425_s3 = inlined_call_operand.vmem [shape: bf16[128,128], index: 3, kind: output, shape index: {}]  }
   0x1   :  { %v227_v0 = vld [vmem:[%s422_s0] sm:$0xff]   ;;  %v298_v4 = vld [vmem:[%s422_s0 + $0x8] sm:$0xff]   ;;  %v299_v5 = vld [vmem:[%s422_s0 + $0x10] sm:$0xff]  }
   0x2   :  { %v338_v1 = vld [vmem:[%s423_s1] ss:$0 sm:$0xff]  ;;  %v228_v2 = vunpack.c.l.bf16 %v227_v0  ;;  %v229_v3 = vunpack.c.h.bf16 %v227_v0  ;;  %v300_v6 = vld [vmem:[%s422_s0 + $0x18] sm:$0xff]   ;;  %v232_v8 = vunpack.c.l.bf16 %v298_v4  ;;  %v233_v9 = vunpack.c.h.bf16 %v298_v4  ;;  %v302_v33 = vld [vmem:[%s422_s0 + $0x28] sm:$0xff]  }
   0x3   :  { %v352_v7 = vld [vmem:[%s424_s2] ss:$0 sm:$0xff]  ;;  %v236_v10 = vunpack.c.l.bf16 %v299_v5  ;;  %v237_v11 = vunpack.c.h.bf16 %v299_v5  ;;  %v240_v14 = vunpack.c.l.bf16 %v300_v6  ;;  %v241_v15 = vunpack.c.h.bf16 %v300_v6  ;;  %v303_v38 = vld [vmem:[%s422_s0 + $0x30] sm:$0xff]   ;;  %v304_v43 = vld [vmem:[%s422_s0 + $0x38] sm:$0xff]  }
   0x4   :  { %v53_v12 = vmul.f32 %v228_v2, %v338_v1  ;;  %v54_v13 = vmul.f32 %v229_v3, %v338_v1  ;;  %v55_v16 = vmul.f32 %v232_v8, %v338_v1  ;;  %v56_v17 = vmul.f32 %v233_v9, %v338_v1  ;;  %v301_v28 = vld [vmem:[%s422_s0 + $0x20] sm:$0xff]  }
   0x5   :  { %v57_v18 = vmul.f32 %v236_v10, %v338_v1  ;;  %v58_v19 = vmul.f32 %v237_v11, %v338_v1  ;;  %v59_v22 = vmul.f32 %v240_v14, %v338_v1  ;;  %v60_v23 = vmul.f32 %v241_v15, %v338_v1 }
   0x6   :  { %v76_v20 = vadd.f32 %v352_v7, %v53_v12  ;;  %v77_v21 = vadd.f32 %v352_v7, %v54_v13  ;;  %v78_v24 = vadd.f32 %v352_v7, %v55_v16  ;;  %v79_v25 = vadd.f32 %v352_v7, %v56_v17 }
   0x7   :  { %v80_v26 = vadd.f32 %v352_v7, %v57_v18  ;;  %v81_v27 = vadd.f32 %v352_v7, %v58_v19  ;;  %v82_v31 = vadd.f32 %v352_v7, %v59_v22  ;;  %v83_v32 = vadd.f32 %v352_v7, %v60_v23 }
   0x8   :  { %v92_v29 = vmax.f32 %v76_v20, 0.0  ;;  %v93_v30 = vmax.f32 %v77_v21, 0.0  ;;  %v94_v34 = vmax.f32 %v78_v24, 0.0  ;;  %v95_v35 = vmax.f32 %v79_v25, 0.0 }
   0x9   :  { %v96_v36 = vmax.f32 %v80_v26, 0.0  ;;  %v97_v37 = vmax.f32 %v81_v27, 0.0  ;;  %v98_v40 = vmax.f32 %v82_v31, 0.0  ;;  %v99_v41 = vmax.f32 %v83_v32, 0.0 }
   0xa   :  { %v261_v39 = vpack.c.bf16 %v93_v30, %v92_v29  ;;  %v244_v42 = vunpack.c.l.bf16 %v301_v28  ;;  %v266_v44 = vpack.c.bf16 %v95_v35, %v94_v34  ;;  %v245_v46 = vunpack.c.h.bf16 %v301_v28 }
   0xb   :  { %v271_v45 = vpack.c.bf16 %v97_v37, %v96_v36  ;;  %v248_v47 = vunpack.c.l.bf16 %v302_v33  ;;  %v276_v48 = vpack.c.bf16 %v99_v41, %v98_v40  ;;  %v249_v50 = vunpack.c.h.bf16 %v302_v33 }
   0xc   :  { %262 = vst [vmem:[%s425_s3] sm:$0xff] %v261_v39   ;;  %v61_v49 = vmul.f32 %v244_v42, %v338_v1  ;;  %v252_v51 = vunpack.c.l.bf16 %v303_v38  ;;  %305 = vst [vmem:[%s425_s3 + $0x8] sm:$0xff] %v266_v44   ;;  %v62_v52 = vmul.f32 %v245_v46, %v338_v1  ;;  %v253_v54 = vunpack.c.h.bf16 %v303_v38 }
   0xd   :  { %306 = vst [vmem:[%s425_s3 + $0x10] sm:$0xff] %v271_v45   ;;  %v63_v53 = vmul.f32 %v248_v47, %v338_v1  ;;  %v256_v55 = vunpack.c.l.bf16 %v304_v43  ;;  %307 = vst [vmem:[%s425_s3 + $0x18] sm:$0xff] %v276_v48   ;;  %v64_v57 = vmul.f32 %v249_v50, %v338_v1  ;;  %v257_v59 = vunpack.c.h.bf16 %v304_v43 }
   0xe   :  { %v84_v56 = vadd.f32 %v352_v7, %v61_v49  ;;  %v65_v58 = vmul.f32 %v252_v51, %v338_v1  ;;  %v85_v60 = vadd.f32 %v352_v7, %v62_v52  ;;  %v66_v62 = vmul.f32 %v253_v54, %v338_v1 }
   0xf   :  { %v86_v61 = vadd.f32 %v352_v7, %v63_v53  ;;  %v67_v63 = vmul.f32 %v256_v55, %v338_v1  ;;  %v87_v2 = vadd.f32 %v352_v7, %v64_v57  ;;  %v68_v4 = vmul.f32 %v257_v59, %v338_v1 }
  0x10   :  { %v100_v0 = vmax.f32 %v84_v56, 0.0  ;;  %v88_v3 = vadd.f32 %v352_v7, %v65_v58  ;;  %v101_v5 = vmax.f32 %v85_v60, 0.0  ;;  %v89_v8 = vadd.f32 %v352_v7, %v66_v62 }
  0x11   :  { %v102_v6 = vmax.f32 %v86_v61, 0.0  ;;  %v90_v9 = vadd.f32 %v352_v7, %v67_v63  ;;  %v103_v10 = vmax.f32 %v87_v2, 0.0  ;;  %v91_v12 = vadd.f32 %v352_v7, %v68_v4 }
  0x12   :  { %v104_v11 = vmax.f32 %v88_v3, 0.0  ;;  %v281_v13 = vpack.c.bf16 %v101_v5, %v100_v0  ;;  %v105_v14 = vmax.f32 %v89_v8, 0.0 }
  0x13   :  { %v106_v15 = vmax.f32 %v90_v9, 0.0  ;;  %v286_v16 = vpack.c.bf16 %v103_v10, %v102_v6  ;;  %v107_v17 = vmax.f32 %v91_v12, 0.0 }
  0x14   :  { %308 = vst [vmem:[%s425_s3 + $0x20] sm:$0xff] %v281_v13   ;;  %v291_v1 = vpack.c.bf16 %v105_v14, %v104_v11 }
  0x15   :  { %309 = vst [vmem:[%s425_s3 + $0x28] sm:$0xff] %v286_v16   ;;  %v296_v18 = vpack.c.bf16 %v107_v17, %v106_v15 }
  0x16   :  { %310 = vst [vmem:[%s425_s3 + $0x30] sm:$0xff] %v291_v1  }
  0x17   :  { %311 = vst [vmem:[%s425_s3 + $0x38] sm:$0xff] %v296_v18  }

// kernel: generator_forward.11
= control target key start
LH: loop header
LB: loop body
LE: loop exit
PB: predicated region body
PF: predicated region fallthrough
CT: control target
= control target key end

     0   :  { %s1223_s15 = smov 0   ;;  %s1225_s16 = smov 0   ;;  %s1345_s0 = inlined_call_operand.vmem [shape: bf16[4,128,256], index: 0, kind: input, shape index: {}]   ;;  %s1346_s1 = inlined_call_operand.vmem [shape: bf16[4,256,128], index: 1, kind: input, shape index: {}]   ;;  %s1347_s2 = inlined_call_operand.vmem [shape: bf16[4,128,128], index: 2, kind: output, shape index: {0}]   ;;  %s1348_s3 = inlined_call_operand.vmem [shape: f32[4,1,128], index: 3, kind: output, shape index: {1}]   ;;  %s1349_s4 = inlined_call_operand.vmem [shape: f32[4,1,128], index: 4, kind: output, shape index: {2}]  }
   0x1   :  { %s1227_s17 = smov 0  }
   0x2 LB: > { %s27_s18 = sadd.s32 1, %s1191_s16  ;;  %p905_p0 = scmp.ge.s32.totalorder %s1195_s17, 1  ;;  %s1195_s17 = sphi %s1227_s17, %s15_s17   ;;  %s1191_s16 = sphi %s1225_s16, %s1351_s16   ;;  %s1187_s15 = sphi %s1223_s15, %s1350_s15  }
   0x3   : > { %p29_p1 = scmp.ge.s32.totalorder %s27_s18, 4  ;;  %p199_p2 = scmp.lt.s32.totalorder %s1195_s17, 5 }
   0x5   : > { %s1353_s18 = smov (%p29_p1, %s27_s18), 0  ;;  %p200_p3 = pnand %p905_p0, %p199_p2 }
   0x6   : > { %p246_p4 = scmp.lt.s32.totalorder (!%p200_p3), %s1187_s15, 3  ;;  %v1197_v32 = vmov (!%p200_p3), 0.0  }
   0x7   : > { %203 = sbr.rel (%p200_p3) target bundleno = 326 (0x146), region = 28 }
   0xe   : > { %s1355_s15 = smov (!%p246_p4, %s1187_s15), 3 }
   0xf   : > { %s962_s19 = sshll.u32 %s1355_s15, 7  ;;  %s1290_s28 = scalar_lea.vmem %s1348_s3, %s1355_s15 }
  0x10   : > { %s1247_s22 = scalar_lea.vmem %s1346_s1, %s962_s19  ;;  %s1261_s25 = scalar_lea.vmem %s1345_s0, %s962_s19  ;;  %683 = vst [vmem:[%s1290_s28] sm:$0x1] %v1197_v32 }
  0x11   : > { %v1133_v0 = vld [vmem:[%s1247_s22 + $0x40] sm:$0xff]   ;;  %v1135_v2 = vld [vmem:[%s1247_s22 + $0x48] sm:$0xff]   ;;  %v1137_v4 = vld [vmem:[%s1247_s22 + $0x50] sm:$0xff]   ;;  %s1296_s5 = scalar_lea.vmem %s1349_s4, %s1355_s15  ;;  %s964_s6 = sshll.u32 %s1355_s15, 6 }
  0x12   : > { %v1134_v1 = vld [vmem:[%s1247_s22] sm:$0xff]   ;;  %1028 = vmatprep.subr.bf16.mxu0 %v1133_v0  ;;  %1092 = vmatprep.subr.bf16.mxu1 %v1133_v0  ;;  %v1136_v3 = vld [vmem:[%s1247_s22 + $0x8] sm:$0xff]   ;;  %v1138_v5 = vld [vmem:[%s1247_s22 + $0x10] sm:$0xff]   ;;  %684 = vst [vmem:[%s1296_s5] sm:$0x1] %v1197_v32  ;;  %s1308_s9 = scalar_lea.vmem %s1347_s2, %s964_s6 }
  0x13   : > { %1029 = vmatpush3.bf16.msra.mxu0 %v1134_v1  ;;  %1100 = vmatpush3.bf16.msra.mxu1 %v1134_v1  ;;  %v1139_v6 = vld [vmem:[%s1247_s22 + $0x58] sm:$0xff]   ;;  %v1141_v8 = vld [vmem:[%s1247_s22 + $0x60] sm:$0xff]   ;;  %v1143_v10 = vld [vmem:[%s1247_s22 + $0x68] sm:$0xff]  }
  0x14   : > { %1030 = vmatprep.subr.bf16.mxu0 %v1135_v2  ;;  %1093 = vmatprep.subr.bf16.mxu1 %v1135_v2  ;;  %v1140_v7 = vld [vmem:[%s1247_s22 + $0x18] sm:$0xff]   ;;  %v1142_v9 = vld [vmem:[%s1247_s22 + $0x20] sm:$0xff]   ;;  %v1144_v12 = vld [vmem:[%s1247_s22 + $0x28] sm:$0xff]  }
  0x15   : > { %v1151_v11 = vld [vmem:[%s1261_s25 + $0x4] ss:$8 sps:$4 sm:$0xff]   ;;  %v1145_v14 = vld [vmem:[%s1247_s22 + $0x70] sm:$0xff]   ;;  %v1147_v16 = vld [vmem:[%s1247_s22 + $0x78] sm:$0xff]  }
  0x16   : > { %v1157_v13 = vld [vmem:[%s1261_s25 + $0x44] ss:$8 sps:$4 sm:$0xff]   ;;  %534 = vmatprep.mubr.bf16.mxu0 %v1151_v11  ;;  %v1146_v15 = vld [vmem:[%s1247_s22 + $0x30] sm:$0xff]   ;;  %v1148_v17 = vld [vmem:[%s1247_s22 + $0x38] sm:$0xff]  }
  0x17   : > { %1031 = vmatpush3.bf16.msra.mxu0 %v1136_v3  ;;  %1101 = vmatpush3.bf16.msra.mxu1 %v1136_v3  ;;  %v1149_v18 = vld [vmem:[%s1261_s25] ss:$8 sps:$4 sm:$0xff]   ;;  %v1152_v20 = vld [vmem:[%s1261_s25 + $0x14] ss:$8 sps:$4 sm:$0xff]   ;;  %v1154_v22 = vld [vmem:[%s1261_s25 + $0x10] ss:$8 sps:$4 sm:$0xff]  }
  0x18   : > { %1032 = vmatprep.subr.bf16.mxu0 %v1137_v4  ;;  %1094 = vmatprep.subr.bf16.mxu1 %v1137_v4  ;;  %v1155_v19 = vld [vmem:[%s1261_s25 + $0x40] ss:$8 sps:$4 sm:$0xff]   ;;  %v1161_v21 = vld [vmem:[%s1261_s25 + $0x54] ss:$8 sps:$4 sm:$0xff]   ;;  %v1163_v23 = vld [vmem:[%s1261_s25 + $0x50] ss:$8 sps:$4 sm:$0xff]  }
  0x19   : > { %566 = vmatprep.mubr.bf16.mxu1 %v1157_v13  ;;  %v1158_v24 = vld [vmem:[%s1261_s25 + $0x24] ss:$8 sps:$4 sm:$0xff]   ;;  %v1160_v26 = vld [vmem:[%s1261_s25 + $0x20] ss:$8 sps:$4 sm:$0xff]   ;;  %v1164_v28 = vld [vmem:[%s1261_s25 + $0x34] ss:$8 sps:$4 sm:$0xff]  }
  0x1a   : > { %v1167_v25 = vld [vmem:[%s1261_s25 + $0x64] ss:$8 sps:$4 sm:$0xff]   ;;  %v1169_v27 = vld [vmem:[%s1261_s25 + $0x60] ss:$8 sps:$4 sm:$0xff]   ;;  %v1170_v29 = vld [vmem:[%s1261_s25 + $0x74] ss:$8 sps:$4 sm:$0xff]  }
  0x1b   : > { %1033 = vmatpush3.bf16.msra.mxu0 %v1138_v5  ;;  %1102 = vmatpush3.bf16.msra.mxu1 %v1138_v5  ;;  %v1166_v30 = vld [vmem:[%s1261_s25 + $0x30] ss:$8 sps:$4 sm:$0xff]  }
  0x1c   : > { %1034 = vmatprep.subr.bf16.mxu0 %v1139_v6  ;;  %1095 = vmatprep.subr.bf16.mxu1 %v1139_v6  ;;  %v1172_v31 = vld [vmem:[%s1261_s25 + $0x70] ss:$8 sps:$4 sm:$0xff]  }
  0x1f   : > { %1035 = vmatpush3.bf16.msra.mxu0 %v1140_v7  ;;  %1103 = vmatpush3.bf16.msra.mxu1 %v1140_v7 }
  0x20   : > { %1036 = vmatprep.subr.bf16.mxu0 %v1141_v8  ;;  %1096 = vmatprep.subr.bf16.mxu1 %v1141_v8 }
  0x23   : > { %1037 = vmatpush3.bf16.msra.mxu0 %v1142_v9  ;;  %1104 = vmatpush3.bf16.msra.mxu1 %v1142_v9 }
  0x24   : > { %1038 = vmatprep.subr.bf16.mxu0 %v1143_v10  ;;  %1097 = vmatprep.subr.bf16.mxu1 %v1143_v10 }
  0x27   : > { %1039 = vmatpush3.bf16.msra.mxu0 %v1144_v12  ;;  %1105 = vmatpush3.bf16.msra.mxu1 %v1144_v12 }
  0x28   : > { %1040 = vmatprep.subr.bf16.mxu0 %v1145_v14  ;;  %1098 = vmatprep.subr.bf16.mxu1 %v1145_v14 }
  0x2b   : > { %1041 = vmatpush3.bf16.msra.mxu0 %v1146_v15  ;;  %1106 = vmatpush3.bf16.msra.mxu1 %v1146_v15 }
  0x2c   : > { %1042 = vmatprep.subr.bf16.mxu0 %v1147_v16  ;;  %1099 = vmatprep.subr.bf16.mxu1 %v1147_v16 }
  0x2f   : > { %1043 = vmatpush3.bf16.msra.mxu0 %v1148_v17  ;;  %1107 = vmatpush3.bf16.msra.mxu1 %v1148_v17 }
  0x32   : > { %535 = vmatmul.mubr.bf16.vlgmr.msra.gmra.mrb[0].mxu0 %v1149_v18  ;;  %567 = vmatmul.mubr.bf16.vlgmr.msra.gmra.mrb[0].mxu1 %v1155_v19 }
  0x33   : > { %542 = vmatprep.mubr.bf16.mxu0 %v1152_v20  ;;  %574 = vmatprep.mubr.bf16.mxu1 %v1161_v21 }
  0x3a   : > { %543 = vmatmul.mubr.bf16.gmra.mrb[4].mxu0 %v1154_v22  ;;  %575 = vmatmul.mubr.bf16.gmra.mrb[4].mxu1 %v1163_v23 }
  0x3b   : > { %550 = vmatprep.mubr.bf16.mxu0 %v1158_v24  ;;  %582 = vmatprep.mubr.bf16.mxu1 %v1167_v25 }
  0x42   : > { %551 = vmatmul.mubr.bf16.gmra.mrb[8].mxu0 %v1160_v26  ;;  %583 = vmatmul.mubr.bf16.gmra.mrb[8].mxu1 %v1169_v27 }
  0x43   : > { %558 = vmatprep.mubr.bf16.mxu0 %v1164_v28  ;;  %590 = vmatprep.mubr.bf16.mxu1 %v1170_v29 }
  0x4a   : > { %559 = vmatmul.mubr.bf16.gmra.mrb[12].mxu0 %v1166_v30  ;;  %591 = vmatmul.mubr.bf16.gmra.mrb[12].mxu1 %v1172_v31 }
 0x105   : > { %v1044_v33 = vpop.f32.mrb[0].mxu0  ;;  %v1068_v34 = vpop.f32.mrb[0].mxu1 }
 0x106   : > { %v1045_v35 = vpop.f32.mrb[1].mxu0  ;;  %v1069_v36 = vpop.f32.mrb[1].mxu1 }
 0x107   : > { %v1046_v37 = vadd.f32 %v1045_v35, %v1044_v33  ;;  %v1047_v38 = vpop.f32.mrb[2].mxu0  ;;  %v1301_v39 = vadd.f32 %v1069_v36, %v1068_v34  ;;  %v1071_v40 = vpop.f32.mrb[2].mxu1 }
 0x108   : > { %v1048_v41 = vpop.f32.mrb[3].mxu0  ;;  %v1072_v42 = vpop.f32.mrb[3].mxu1 }
 0x109   : > { %v1049_v43 = vadd.f32 %v1048_v41, %v1047_v38  ;;  %v1303_v44 = vadd.f32 %v1072_v42, %v1071_v40  ;;  %v710_v45 = vmul.f32 %v1046_v37, %v1046_v37 }
 0x10b   : > { %v984_v46 = vpack.c.bf16 %v1049_v43, %v1046_v37  ;;  %v686_v47 = vadd.f32 %v1049_v43, %v1046_v37  ;;  %v711_v48 = vmul.f32 %v1049_v43, %v1049_v43  ;;  %v1004_v49 = vpack.c.bf16 %v1303_v44, %v1301_v39 }
 0x10d   : > { %985 = vst [vmem:[%s1308_s9] sm:$0xff] %v984_v46   ;;  %v726_v50 = vadd.f32 %v711_v48, %v710_v45  ;;  %v1050_v51 = vpop.f32.mrb[4].mxu0  ;;  %1024 = vst [vmem:[%s1308_s9 + $0x20] sm:$0xff] %v1004_v49   ;;  %v1074_v52 = vpop.f32.mrb[4].mxu1  ;;  %v718_v48 = vmul.f32 %v1301_v39, %v1301_v39 }
 0x10e   : > { %v1051_v53 = vpop.f32.mrb[5].mxu0  ;;  %v1075_v54 = vpop.f32.mrb[5].mxu1 }
 0x10f   : > { %v1052_v55 = vadd.f32 %v1051_v53, %v1050_v51  ;;  %v1053_v56 = vpop.f32.mrb[6].mxu0  ;;  %v1314_v57 = vadd.f32 %v1075_v54, %v1074_v52  ;;  %v1077_v58 = vpop.f32.mrb[6].mxu1  ;;  %v719_v51 = vmul.f32 %v1303_v44, %v1303_v44 }
 0x110   : > { %v1054_v59 = vpop.f32.mrb[7].mxu0  ;;  %v1078_v60 = vpop.f32.mrb[7].mxu1 }
 0x111   : > { %v687_v61 = vadd.f32 %v1052_v55, %v686_v47  ;;  %v712_v62 = vmul.f32 %v1052_v55, %v1052_v55  ;;  %v1055_v63 = vadd.f32 %v1054_v59, %v1053_v56  ;;  %v1079_v0 = vadd.f32 %v1078_v60, %v1077_v58 }
 0x112   : > { %v720_v54 = vmul.f32 %v1314_v57, %v1314_v57 }
 0x113   : > { %v727_v1 = vadd.f32 %v726_v50, %v712_v62  ;;  %v989_v2 = vpack.c.bf16 %v1055_v63, %v1052_v55  ;;  %v688_v3 = vadd.f32 %v1055_v63, %v687_v61  ;;  %v713_v4 = vmul.f32 %v1055_v63, %v1055_v63 }
 0x114   : > { %v1009_v5 = vpack.c.bf16 %v1079_v0, %v1314_v57  ;;  %v721_v58 = vmul.f32 %v1079_v0, %v1079_v0 }
 0x115   : > { %1021 = vst [vmem:[%s1308_s9 + $0x8] sm:$0xff] %v989_v2   ;;  %v728_v6 = vadd.f32 %v727_v1, %v713_v4  ;;  %v1056_v7 = vpop.f32.mrb[8].mxu0  ;;  %v1080_v8 = vpop.f32.mrb[8].mxu1 }
 0x116   : > { %v1057_v9 = vpop.f32.mrb[9].mxu0  ;;  %1025 = vst [vmem:[%s1308_s9 + $0x28] sm:$0xff] %v1009_v5   ;;  %v1081_v10 = vpop.f32.mrb[9].mxu1 }
 0x117   : > { %v1058_v11 = vadd.f32 %v1057_v9, %v1056_v7  ;;  %v1059_v12 = vpop.f32.mrb[10].mxu0  ;;  %v1082_v13 = vadd.f32 %v1081_v10, %v1080_v8  ;;  %v1083_v14 = vpop.f32.mrb[10].mxu1 }
 0x118   : > { %v1060_v15 = vpop.f32.mrb[11].mxu0  ;;  %v1084_v16 = vpop.f32.mrb[11].mxu1 }
 0x119   : > { %v689_v17 = vadd.f32 %v1058_v11, %v688_v3  ;;  %v714_v18 = vmul.f32 %v1058_v11, %v1058_v11  ;;  %v1061_v19 = vadd.f32 %v1060_v15, %v1059_v12  ;;  %v1085_v20 = vadd.f32 %v1084_v16, %v1083_v14  ;;  %v685_v16 = vld [vmem:[%s1290_s28] sm:$0x1] }
 0x11a   : > { %v722_v62 = vmul.f32 %v1082_v13, %v1082_v13 }
 0x11b   : > { %v729_v21 = vadd.f32 %v728_v6, %v714_v18  ;;  %v994_v22 = vpack.c.bf16 %v1061_v19, %v1058_v11  ;;  %v690_v23 = vadd.f32 %v1061_v19, %v689_v17  ;;  %v715_v24 = vmul.f32 %v1061_v19, %v1061_v19  ;;  %v709_v19 = vld [vmem:[%s1296_s5] sm:$0x1] }
 0x11c   : > { %v1014_v25 = vpack.c.bf16 %v1085_v20, %v1082_v13  ;;  %v723_v2 = vmul.f32 %v1085_v20, %v1085_v20 }
 0x11d   : > { %1022 = vst [vmem:[%s1308_s9 + $0x10] sm:$0xff] %v994_v22   ;;  %v730_v26 = vadd.f32 %v729_v21, %v715_v24  ;;  %v1062_v27 = vpop.f32.mrb[12].mxu0  ;;  %v1086_v28 = vpop.f32.mrb[12].mxu1 }
 0x11e   : > { %v1063_v29 = vpop.f32.mrb[13].mxu0  ;;  %1026 = vst [vmem:[%s1308_s9 + $0x30] sm:$0xff] %v1014_v25   ;;  %v1087_v30 = vpop.f32.mrb[13].mxu1 }
 0x11f   : > { %v1064_v31 = vadd.f32 %v1063_v29, %v1062_v27  ;;  %v1065_v32 = vpop.f32.mrb[14].mxu0  ;;  %v1088_v33 = vadd.f32 %v1087_v30, %v1086_v28  ;;  %v1089_v34 = vpop.f32.mrb[14].mxu1 }
 0x120   : > { %v1066_v35 = vpop.f32.mrb[15].mxu0  ;;  %v1090_v36 = vpop.f32.mrb[15].mxu1 }
 0x121   : > { %v691_v37 = vadd.f32 %v1064_v31, %v690_v23  ;;  %v716_v38 = vmul.f32 %v1064_v31, %v1064_v31  ;;  %v1067_v40 = vadd.f32 %v1066_v35, %v1065_v32  ;;  %v1091_v41 = vadd.f32 %v1090_v36, %v1089_v34 }
 0x122   : > { %v724_v3 = vmul.f32 %v1088_v33, %v1088_v33 }
 0x123   : > { %v731_v42 = vadd.f32 %v730_v26, %v716_v38  ;;  %v999_v43 = vpack.c.bf16 %v1067_v40, %v1064_v31  ;;  %v692_v45 = vadd.f32 %v1067_v40, %v691_v37  ;;  %v717_v46 = vmul.f32 %v1067_v40, %v1067_v40 }
 0x124   : > { %v1019_v47 = vpack.c.bf16 %v1091_v41, %v1088_v33  ;;  %v725_v7 = vmul.f32 %v1091_v41, %v1091_v41 }
 0x125   : > { %1023 = vst [vmem:[%s1308_s9 + $0x18] sm:$0xff] %v999_v43   ;;  %v693_v49 = vadd.f32 %v1301_v39, %v692_v45  ;;  %v732_v50 = vadd.f32 %v731_v42, %v717_v46 }
 0x126   : > { %1027 = vst [vmem:[%s1308_s9 + $0x38] sm:$0xff] %v1019_v47  }
 0x127   : > { %v694_v52 = vadd.f32 %v1303_v44, %v693_v49  ;;  %v733_v53 = vadd.f32 %v732_v50, %v718_v48 }
 0x129   : > { %v734_v55 = vadd.f32 %v733_v53, %v719_v51  ;;  %v695_v56 = vadd.f32 %v1314_v57, %v694_v52 }
 0x12b   : > { %v696_v59 = vadd.f32 %v1079_v0, %v695_v56  ;;  %v735_v60 = vadd.f32 %v734_v55, %v720_v54 }
 0x12d   : > { %v697_v61 = vadd.f32 %v1082_v13, %v696_v59  ;;  %v736_v39 = vadd.f32 %v735_v60, %v721_v58 }
 0x12f   : > { %v737_v63 = vadd.f32 %v736_v39, %v722_v62  ;;  %v698_v1 = vadd.f32 %v1085_v20, %v697_v61 }
 0x131   : > { %v738_v4 = vadd.f32 %v737_v63, %v723_v2  ;;  %v699_v44 = vadd.f32 %v1088_v33, %v698_v1 }
 0x133   : > { %v739_v5 = vadd.f32 %v738_v4, %v724_v3  ;;  %v700_v6 = vadd.f32 %v1091_v41, %v699_v44 }
 0x135   : > { %v701_v8 = vrot.slane %v700_v6, 4  ;;  %v740_v57 = vadd.f32 %v739_v5, %v725_v7 }
 0x137   : > { %v702_v9 = vadd.f32 %v701_v8, %v700_v6  ;;  %v741_v0 = vrot.slane %v740_v57, 4 }
 0x139   : > { %v703_v10 = vrot.slane %v702_v9, 2  ;;  %v742_v11 = vadd.f32 %v741_v0, %v740_v57 }
 0x13b   : > { %v704_v12 = vadd.f32 %v703_v10, %v702_v9  ;;  %v743_v13 = vrot.slane %v742_v11, 2 }
 0x13d   : > { %v705_v14 = vrot.slane %v704_v12, 1  ;;  %v744_v15 = vadd.f32 %v743_v13, %v742_v11 }
 0x13f   : > { %v706_v17 = vadd.f32 %v705_v14, %v704_v12  ;;  %v745_v18 = vrot.slane %v744_v15, 1 }
 0x141   : > { %v707_v20 = vadd.f32 %v706_v17, %v685_v16  ;;  %v746_v21 = vadd.f32 %v745_v18, %v744_v15 }
 0x143   : > { %708 = vst [vmem:[%s1290_s28] sm:$0x1] %v707_v20  ;;  %v747_v22 = vadd.f32 %v746_v21, %v709_v19 }
 0x145   : > { %748 = vst [vmem:[%s1296_s5] sm:$0x1] %v747_v22 }
 0x146 PF: > { %s15_s17 = sadd.s32 1, %s1195_s17   ;;  %s1350_s15 = smov %s1191_s16 }
 0x147   : > { %p12_p5 = scmp.ge.s32.totalorder %s15_s17, 6   ;;  %s1351_s16 = smov %s1353_s18 }
 0x149   :  { %14 = sbr.rel (!%p12_p5) target bundleno = 2 (0x2), region = 89 }

// kernel: generator_forward.12
= control target key start
LH: loop header
LB: loop body
LE: loop exit
PB: predicated region body
PF: predicated region fallthrough
CT: control target
= control target key end

     0   :  { %s1502_s0 = inlined_call_operand.vmem [shape: bf16[512,128], index: 0, kind: input, shape index: {}]   ;;  %s1503_s1 = inlined_call_operand.vmem [shape: f32[1,128], index: 1, kind: input, shape index: {}]   ;;  %s1504_s2 = inlined_call_operand.vmem [shape: f32[1,128], index: 2, kind: input, shape index: {}]   ;;  %s1505_s3 = inlined_call_operand.vmem [shape: bf16[512,128], index: 3, kind: output, shape index: {}]  }
   0x1   :  { %v803_v0 = vld [vmem:[%s1502_s0] sm:$0xff]   ;;  %v1090_v4 = vld [vmem:[%s1502_s0 + $0x8] sm:$0xff]   ;;  %v1091_v5 = vld [vmem:[%s1502_s0 + $0x10] sm:$0xff]  }
   0x2   :  { %v1178_v1 = vld [vmem:[%s1503_s1] ss:$0 sm:$0xff]  ;;  %v804_v2 = vunpack.c.l.bf16 %v803_v0  ;;  %v805_v3 = vunpack.c.h.bf16 %v803_v0  ;;  %v1092_v6 = vld [vmem:[%s1502_s0 + $0x18] sm:$0xff]   ;;  %v808_v8 = vunpack.c.l.bf16 %v1090_v4  ;;  %v809_v9 = vunpack.c.h.bf16 %v1090_v4  ;;  %v1094_v33 = vld [vmem:[%s1502_s0 + $0x28] sm:$0xff]  }
   0x3   :  { %v1192_v7 = vld [vmem:[%s1504_s2] ss:$0 sm:$0xff]  ;;  %v812_v10 = vunpack.c.l.bf16 %v1091_v5  ;;  %v813_v11 = vunpack.c.h.bf16 %v1091_v5  ;;  %v816_v14 = vunpack.c.l.bf16 %v1092_v6  ;;  %v817_v15 = vunpack.c.h.bf16 %v1092_v6  ;;  %v1095_v38 = vld [vmem:[%s1502_s0 + $0x30] sm:$0xff]   ;;  %v1096_v43 = vld [vmem:[%s1502_s0 + $0x38] sm:$0xff]  }
   0x4   :  { %v149_v12 = vmul.f32 %v804_v2, %v1178_v1  ;;  %v150_v13 = vmul.f32 %v805_v3, %v1178_v1  ;;  %v151_v16 = vmul.f32 %v808_v8, %v1178_v1  ;;  %v152_v17 = vmul.f32 %v809_v9, %v1178_v1  ;;  %v1093_v28 = vld [vmem:[%s1502_s0 + $0x20] sm:$0xff]  }
   0x5   :  { %v153_v18 = vmul.f32 %v812_v10, %v1178_v1  ;;  %v154_v19 = vmul.f32 %v813_v11, %v1178_v1  ;;  %v155_v22 = vmul.f32 %v816_v14, %v1178_v1  ;;  %v156_v23 = vmul.f32 %v817_v15, %v1178_v1  ;;  %v1097_v0 = vld [vmem:[%s1502_s0 + $0x40] sm:$0xff]   ;;  %v1098_v11 = vld [vmem:[%s1502_s0 + $0x48] sm:$0xff]  }
   0x6   :  { %v220_v20 = vadd.f32 %v1192_v7, %v149_v12  ;;  %v221_v21 = vadd.f32 %v1192_v7, %v150_v13  ;;  %v222_v24 = vadd.f32 %v1192_v7, %v151_v16  ;;  %v223_v25 = vadd.f32 %v1192_v7, %v152_v17  ;;  %v1099_v16 = vld [vmem:[%s1502_s0 + $0x50] sm:$0xff]  }
   0x7   :  { %v224_v26 = vadd.f32 %v1192_v7, %v153_v18  ;;  %v225_v27 = vadd.f32 %v1192_v7, %v154_v19  ;;  %v226_v31 = vadd.f32 %v1192_v7, %v155_v22  ;;  %v227_v32 = vadd.f32 %v1192_v7, %v156_v23 }
   0x8   :  { %v284_v29 = vmax.f32 %v220_v20, 0.0  ;;  %v285_v30 = vmax.f32 %v221_v21, 0.0  ;;  %v286_v34 = vmax.f32 %v222_v24, 0.0  ;;  %v287_v35 = vmax.f32 %v223_v25, 0.0  ;;  %v1100_v25 = vld [vmem:[%s1502_s0 + $0x58] sm:$0xff]  }
   0x9   :  { %v288_v36 = vmax.f32 %v224_v26, 0.0  ;;  %v289_v37 = vmax.f32 %v225_v27, 0.0  ;;  %v290_v40 = vmax.f32 %v226_v31, 0.0  ;;  %v291_v41 = vmax.f32 %v227_v32, 0.0 }
   0xa   :  { %v933_v39 = vpack.c.bf16 %v285_v30, %v284_v29  ;;  %v820_v42 = vunpack.c.l.bf16 %v1093_v28  ;;  %v938_v44 = vpack.c.bf16 %v287_v35, %v286_v34  ;;  %v821_v46 = vunpack.c.h.bf16 %v1093_v28 }
   0xb   :  { %v943_v45 = vpack.c.bf16 %v289_v37, %v288_v36  ;;  %v824_v47 = vunpack.c.l.bf16 %v1094_v33  ;;  %v948_v48 = vpack.c.bf16 %v291_v41, %v290_v40  ;;  %v825_v50 = vunpack.c.h.bf16 %v1094_v33 }
   0xc   :  { %934 = vst [vmem:[%s1505_s3] sm:$0xff] %v933_v39   ;;  %v157_v49 = vmul.f32 %v820_v42, %v1178_v1  ;;  %v828_v51 = vunpack.c.l.bf16 %v1095_v38  ;;  %1121 = vst [vmem:[%s1505_s3 + $0x8] sm:$0xff] %v938_v44   ;;  %v158_v52 = vmul.f32 %v821_v46, %v1178_v1  ;;  %v829_v54 = vunpack.c.h.bf16 %v1095_v38  ;;  %v1101_v38 = vld [vmem:[%s1502_s0 + $0x60] sm:$0xff]  }
   0xd   :  { %1122 = vst [vmem:[%s1505_s3 + $0x10] sm:$0xff] %v943_v45   ;;  %v159_v53 = vmul.f32 %v824_v47, %v1178_v1  ;;  %v832_v55 = vunpack.c.l.bf16 %v1096_v43  ;;  %1123 = vst [vmem:[%s1505_s3 + $0x18] sm:$0xff] %v948_v48   ;;  %v160_v57 = vmul.f32 %v825_v50, %v1178_v1  ;;  %v833_v59 = vunpack.c.h.bf16 %v1096_v43 }
   0xe   :  { %v228_v56 = vadd.f32 %v1192_v7, %v157_v49  ;;  %v161_v58 = vmul.f32 %v828_v51, %v1178_v1  ;;  %v229_v60 = vadd.f32 %v1192_v7, %v158_v52  ;;  %v162_v62 = vmul.f32 %v829_v54, %v1178_v1  ;;  %v1102_v51 = vld [vmem:[%s1502_s0 + $0x68] sm:$0xff]  }
   0xf   :  { %v230_v61 = vadd.f32 %v1192_v7, %v159_v53  ;;  %v163_v63 = vmul.f32 %v832_v55, %v1178_v1  ;;  %v231_v3 = vadd.f32 %v1192_v7, %v160_v57  ;;  %v164_v5 = vmul.f32 %v833_v59, %v1178_v1 }
  0x10   :  { %v292_v2 = vmax.f32 %v228_v56, 0.0  ;;  %v232_v4 = vadd.f32 %v1192_v7, %v161_v58  ;;  %v293_v6 = vmax.f32 %v229_v60, 0.0  ;;  %v233_v9 = vadd.f32 %v1192_v7, %v162_v62  ;;  %v1103_v60 = vld [vmem:[%s1502_s0 + $0x70] sm:$0xff]  }
  0x11   :  { %v294_v8 = vmax.f32 %v230_v61, 0.0  ;;  %v234_v10 = vadd.f32 %v1192_v7, %v163_v63  ;;  %v295_v12 = vmax.f32 %v231_v3, 0.0  ;;  %v235_v14 = vadd.f32 %v1192_v7, %v164_v5 }
  0x12   :  { %v296_v13 = vmax.f32 %v232_v4, 0.0  ;;  %v836_v15 = vunpack.c.l.bf16 %v1097_v0  ;;  %v953_v17 = vpack.c.bf16 %v293_v6, %v292_v2  ;;  %v297_v18 = vmax.f32 %v233_v9, 0.0  ;;  %v1104_v2 = vld [vmem:[%s1502_s0 + $0x78] sm:$0xff]  }
  0x13   :  { %v298_v19 = vmax.f32 %v234_v10, 0.0  ;;  %v837_v20 = vunpack.c.h.bf16 %v1097_v0  ;;  %v958_v21 = vpack.c.bf16 %v295_v12, %v294_v8  ;;  %v299_v22 = vmax.f32 %v235_v14, 0.0  ;;  %v1105_v12 = vld [vmem:[%s1502_s0 + $0x80] sm:$0xff]  }
  0x14   :  { %v165_v23 = vmul.f32 %v836_v15, %v1178_v1  ;;  %v840_v24 = vunpack.c.l.bf16 %v1098_v11  ;;  %1124 = vst [vmem:[%s1505_s3 + $0x20] sm:$0xff] %v953_v17   ;;  %v963_v26 = vpack.c.bf16 %v297_v18, %v296_v13  ;;  %v841_v28 = vunpack.c.h.bf16 %v1098_v11 }
  0x15   :  { %v166_v27 = vmul.f32 %v837_v20, %v1178_v1  ;;  %v844_v29 = vunpack.c.l.bf16 %v1099_v16  ;;  %1125 = vst [vmem:[%s1505_s3 + $0x28] sm:$0xff] %v958_v21   ;;  %v968_v30 = vpack.c.bf16 %v299_v22, %v298_v19  ;;  %v845_v33 = vunpack.c.h.bf16 %v1099_v16 }
  0x16   :  { %v236_v31 = vadd.f32 %v1192_v7, %v165_v23  ;;  %v167_v32 = vmul.f32 %v840_v24, %v1178_v1  ;;  %1126 = vst [vmem:[%s1505_s3 + $0x30] sm:$0xff] %v963_v26   ;;  %v168_v35 = vmul.f32 %v841_v28, %v1178_v1  ;;  %v848_v37 = vunpack.c.l.bf16 %v1100_v25 }
  0x17   :  { %v237_v34 = vadd.f32 %v1192_v7, %v166_v27  ;;  %v169_v36 = vmul.f32 %v844_v29, %v1178_v1  ;;  %1127 = vst [vmem:[%s1505_s3 + $0x38] sm:$0xff] %v968_v30   ;;  %v170_v41 = vmul.f32 %v845_v33, %v1178_v1  ;;  %v849_v42 = vunpack.c.h.bf16 %v1100_v25  ;;  %v1106_v29 = vld [vmem:[%s1502_s0 + $0x88] sm:$0xff]  }
  0x18   :  { %v300_v39 = vmax.f32 %v236_v31, 0.0  ;;  %v238_v40 = vadd.f32 %v1192_v7, %v167_v32  ;;  %v239_v44 = vadd.f32 %v1192_v7, %v168_v35  ;;  %v171_v46 = vmul.f32 %v848_v37, %v1178_v1 }
  0x19   :  { %v301_v43 = vmax.f32 %v237_v34, 0.0  ;;  %v240_v45 = vadd.f32 %v1192_v7, %v169_v36  ;;  %v241_v48 = vadd.f32 %v1192_v7, %v170_v41  ;;  %v172_v49 = vmul.f32 %v849_v42, %v1178_v1  ;;  %v1107_v34 = vld [vmem:[%s1502_s0 + $0x90] sm:$0xff]  }
  0x1a   :  { %v302_v47 = vmax.f32 %v238_v40, 0.0  ;;  %v852_v50 = vunpack.c.l.bf16 %v1101_v38  ;;  %v303_v53 = vmax.f32 %v239_v44, 0.0  ;;  %v242_v55 = vadd.f32 %v1192_v7, %v171_v46 }
  0x1b   :  { %v973_v52 = vpack.c.bf16 %v301_v43, %v300_v39  ;;  %v304_v54 = vmax.f32 %v240_v45, 0.0  ;;  %v305_v56 = vmax.f32 %v241_v48, 0.0  ;;  %v243_v57 = vadd.f32 %v1192_v7, %v172_v49  ;;  %v1108_v43 = vld [vmem:[%s1502_s0 + $0x98] sm:$0xff]  }
  0x1c   :  { %v853_v58 = vunpack.c.h.bf16 %v1101_v38  ;;  %v173_v59 = vmul.f32 %v852_v50, %v1178_v1  ;;  %v978_v61 = vpack.c.bf16 %v303_v53, %v302_v47  ;;  %v306_v62 = vmax.f32 %v242_v55, 0.0 }
  0x1d   :  { %1128 = vst [vmem:[%s1505_s3 + $0x40] sm:$0xff] %v973_v52   ;;  %v856_v63 = vunpack.c.l.bf16 %v1102_v51  ;;  %v857_v0 = vunpack.c.h.bf16 %v1102_v51  ;;  %v983_v3 = vpack.c.bf16 %v305_v56, %v304_v54  ;;  %v307_v4 = vmax.f32 %v243_v57, 0.0  ;;  %v1109_v56 = vld [vmem:[%s1502_s0 + $0xa0] sm:$0xff]  }
  0x1e   :  { %v174_v5 = vmul.f32 %v853_v58, %v1178_v1  ;;  %v244_v6 = vadd.f32 %v1192_v7, %v173_v59  ;;  %1129 = vst [vmem:[%s1505_s3 + $0x48] sm:$0xff] %v978_v61   ;;  %v860_v10 = vunpack.c.l.bf16 %v1103_v60  ;;  %v861_v11 = vunpack.c.h.bf16 %v1103_v60 }
  0x1f   :  { %v175_v8 = vmul.f32 %v856_v63, %v1178_v1  ;;  %v176_v9 = vmul.f32 %v857_v0, %v1178_v1  ;;  %1130 = vst [vmem:[%s1505_s3 + $0x50] sm:$0xff] %v983_v3   ;;  %v988_v13 = vpack.c.bf16 %v307_v4, %v306_v62  ;;  %v864_v16 = vunpack.c.l.bf16 %v1104_v2 }
  0x20   :  { %v245_v14 = vadd.f32 %v1192_v7, %v174_v5  ;;  %v308_v15 = vmax.f32 %v244_v6, 0.0  ;;  %v177_v19 = vmul.f32 %v860_v10, %v1178_v1  ;;  %v178_v20 = vmul.f32 %v861_v11, %v1178_v1 }
  0x21   :  { %v246_v17 = vadd.f32 %v1192_v7, %v175_v8  ;;  %v247_v18 = vadd.f32 %v1192_v7, %v176_v9  ;;  %1131 = vst [vmem:[%s1505_s3 + $0x58] sm:$0xff] %v988_v13   ;;  %v865_v22 = vunpack.c.h.bf16 %v1104_v2  ;;  %v179_v23 = vmul.f32 %v864_v16, %v1178_v1  ;;  %v1110_v2 = vld [vmem:[%s1502_s0 + $0xa8] sm:$0xff]   ;;  %v1111_v16 = vld [vmem:[%s1502_s0 + $0xb0] sm:$0xff]  }
  0x22   :  { %v309_v21 = vmax.f32 %v245_v14, 0.0  ;;  %v868_v24 = vunpack.c.l.bf16 %v1105_v12  ;;  %v248_v27 = vadd.f32 %v1192_v7, %v177_v19  ;;  %v249_v28 = vadd.f32 %v1192_v7, %v178_v20 }
  0x23   :  { %v310_v25 = vmax.f32 %v246_v17, 0.0  ;;  %v311_v26 = vmax.f32 %v247_v18, 0.0  ;;  %v180_v31 = vmul.f32 %v865_v22, %v1178_v1  ;;  %v250_v32 = vadd.f32 %v1192_v7, %v179_v23 }
  0x24   :  { %v993_v30 = vpack.c.bf16 %v309_v21, %v308_v15  ;;  %v869_v33 = vunpack.c.h.bf16 %v1105_v12  ;;  %v312_v36 = vmax.f32 %v248_v27, 0.0  ;;  %v313_v37 = vmax.f32 %v249_v28, 0.0  ;;  %v1112_v21 = vld [vmem:[%s1502_s0 + $0xb8] sm:$0xff]  }
  0x25   :  { %v998_v35 = vpack.c.bf16 %v311_v26, %v310_v25  ;;  %v181_v38 = vmul.f32 %v868_v24, %v1178_v1  ;;  %v251_v39 = vadd.f32 %v1192_v7, %v180_v31  ;;  %v314_v40 = vmax.f32 %v250_v32, 0.0 }
  0x26   :  { %1132 = vst [vmem:[%s1505_s3 + $0x60] sm:$0xff] %v993_v30   ;;  %v182_v41 = vmul.f32 %v869_v33, %v1178_v1  ;;  %v872_v42 = vunpack.c.l.bf16 %v1106_v29  ;;  %v1003_v44 = vpack.c.bf16 %v313_v37, %v312_v36  ;;  %v873_v46 = vunpack.c.h.bf16 %v1106_v29 }
  0x27   :  { %1133 = vst [vmem:[%s1505_s3 + $0x68] sm:$0xff] %v998_v35   ;;  %v252_v45 = vadd.f32 %v1192_v7, %v181_v38  ;;  %v876_v47 = vunpack.c.l.bf16 %v1107_v34  ;;  %v315_v48 = vmax.f32 %v251_v39, 0.0  ;;  %v877_v51 = vunpack.c.h.bf16 %v1107_v34  ;;  %v1113_v34 = vld [vmem:[%s1502_s0 + $0xc0] sm:$0xff]  }
  0x28   :  { %v253_v49 = vadd.f32 %v1192_v7, %v182_v41  ;;  %v183_v50 = vmul.f32 %v872_v42, %v1178_v1  ;;  %1134 = vst [vmem:[%s1505_s3 + $0x70] sm:$0xff] %v1003_v44   ;;  %v184_v53 = vmul.f32 %v873_v46, %v1178_v1  ;;  %v880_v55 = vunpack.c.l.bf16 %v1108_v43 }
  0x29   :  { %v316_v52 = vmax.f32 %v252_v45, 0.0  ;;  %v185_v54 = vmul.f32 %v876_v47, %v1178_v1  ;;  %v1008_v57 = vpack.c.bf16 %v315_v48, %v314_v40  ;;  %v186_v60 = vmul.f32 %v877_v51, %v1178_v1  ;;  %v1114_v47 = vld [vmem:[%s1502_s0 + $0xc8] sm:$0xff]  }
  0x2a   :  { %v317_v58 = vmax.f32 %v253_v49, 0.0  ;;  %v254_v59 = vadd.f32 %v1192_v7, %v183_v50  ;;  %v255_v61 = vadd.f32 %v1192_v7, %v184_v53  ;;  %v881_v63 = vunpack.c.h.bf16 %v1108_v43 }
  0x2b   :  { %v256_v62 = vadd.f32 %v1192_v7, %v185_v54  ;;  %v187_v0 = vmul.f32 %v880_v55, %v1178_v1  ;;  %1135 = vst [vmem:[%s1505_s3 + $0x78] sm:$0xff] %v1008_v57   ;;  %v257_v5 = vadd.f32 %v1192_v7, %v186_v60  ;;  %v884_v6 = vunpack.c.l.bf16 %v1109_v56 }
  0x2c   :  { %v1013_v3 = vpack.c.bf16 %v317_v58, %v316_v52  ;;  %v318_v4 = vmax.f32 %v254_v59, 0.0  ;;  %v319_v8 = vmax.f32 %v255_v61, 0.0  ;;  %v188_v10 = vmul.f32 %v881_v63, %v1178_v1  ;;  %v1115_v52 = vld [vmem:[%s1502_s0 + $0xd0] sm:$0xff]   ;;  %v1116_v61 = vld [vmem:[%s1502_s0 + $0xd8] sm:$0xff]  }
  0x2d   :  { %v320_v9 = vmax.f32 %v256_v62, 0.0  ;;  %v258_v11 = vadd.f32 %v1192_v7, %v187_v0  ;;  %v321_v12 = vmax.f32 %v257_v5, 0.0  ;;  %v885_v13 = vunpack.c.h.bf16 %v1109_v56 }
  0x2e   :  { %1136 = vst [vmem:[%s1505_s3 + $0x80] sm:$0xff] %v1013_v3   ;;  %v189_v14 = vmul.f32 %v884_v6, %v1178_v1  ;;  %v888_v15 = vunpack.c.l.bf16 %v1110_v2  ;;  %v1018_v17 = vpack.c.bf16 %v319_v8, %v318_v4  ;;  %v259_v18 = vadd.f32 %v1192_v7, %v188_v10 }
  0x2f   :  { %v322_v19 = vmax.f32 %v258_v11, 0.0  ;;  %v889_v20 = vunpack.c.h.bf16 %v1110_v2  ;;  %v1023_v22 = vpack.c.bf16 %v321_v12, %v320_v9  ;;  %v190_v23 = vmul.f32 %v885_v13, %v1178_v1  ;;  %v1117_v12 = vld [vmem:[%s1502_s0 + $0xe0] sm:$0xff]  }
  0x30   :  { %v260_v24 = vadd.f32 %v1192_v7, %v189_v14  ;;  %v191_v25 = vmul.f32 %v888_v15, %v1178_v1  ;;  %1137 = vst [vmem:[%s1505_s3 + $0x88] sm:$0xff] %v1018_v17   ;;  %v323_v26 = vmax.f32 %v259_v18, 0.0  ;;  %v892_v28 = vunpack.c.l.bf16 %v1111_v16 }
  0x31   :  { %v192_v27 = vmul.f32 %v889_v20, %v1178_v1  ;;  %v893_v29 = vunpack.c.h.bf16 %v1111_v16  ;;  %1138 = vst [vmem:[%s1505_s3 + $0x90] sm:$0xff] %v1023_v22   ;;  %v261_v30 = vadd.f32 %v1192_v7, %v190_v23  ;;  %v896_v33 = vunpack.c.l.bf16 %v1112_v21 }
  0x32   :  { %v324_v31 = vmax.f32 %v260_v24, 0.0  ;;  %v262_v32 = vadd.f32 %v1192_v7, %v191_v25  ;;  %v1028_v35 = vpack.c.bf16 %v323_v26, %v322_v19  ;;  %v193_v37 = vmul.f32 %v892_v28, %v1178_v1 }
  0x33   :  { %v263_v36 = vadd.f32 %v1192_v7, %v192_v27  ;;  %v194_v38 = vmul.f32 %v893_v29, %v1178_v1  ;;  %v325_v39 = vmax.f32 %v261_v30, 0.0  ;;  %v897_v41 = vunpack.c.h.bf16 %v1112_v21  ;;  %v1118_v21 = vld [vmem:[%s1502_s0 + $0xe8] sm:$0xff]  }
  0x34   :  { %v326_v40 = vmax.f32 %v262_v32, 0.0  ;;  %v195_v42 = vmul.f32 %v896_v33, %v1178_v1  ;;  %1139 = vst [vmem:[%s1505_s3 + $0x98] sm:$0xff] %v1028_v35   ;;  %v264_v44 = vadd.f32 %v1192_v7, %v193_v37  ;;  %v900_v46 = vunpack.c.l.bf16 %v1113_v34 }
  0x35   :  { %v327_v43 = vmax.f32 %v263_v36, 0.0  ;;  %v265_v45 = vadd.f32 %v1192_v7, %v194_v38  ;;  %v1033_v48 = vpack.c.bf16 %v325_v39, %v324_v31  ;;  %v196_v49 = vmul.f32 %v897_v41, %v1178_v1  ;;  %v1120_v39 = vld [vmem:[%s1502_s0 + $0xf8] sm:$0xff]  }
  0x36   :  { %v266_v50 = vadd.f32 %v1192_v7, %v195_v42  ;;  %v901_v51 = vunpack.c.h.bf16 %v1113_v34  ;;  %v328_v54 = vmax.f32 %v264_v44, 0.0  ;;  %v197_v56 = vmul.f32 %v900_v46, %v1178_v1  ;;  %v1119_v34 = vld [vmem:[%s1502_s0 + $0xf0] sm:$0xff]  }
  0x37   :  { %v1038_v53 = vpack.c.bf16 %v327_v43, %v326_v40  ;;  %v329_v55 = vmax.f32 %v265_v45, 0.0  ;;  %1140 = vst [vmem:[%s1505_s3 + $0xa0] sm:$0xff] %v1033_v48   ;;  %v267_v57 = vadd.f32 %v1192_v7, %v196_v49  ;;  %v904_v60 = vunpack.c.l.bf16 %v1114_v47 }
  0x38   :  { %v330_v58 = vmax.f32 %v266_v50, 0.0  ;;  %v198_v59 = vmul.f32 %v901_v51, %v1178_v1  ;;  %v268_v63 = vadd.f32 %v1192_v7, %v197_v56  ;;  %v905_v0 = vunpack.c.h.bf16 %v1114_v47 }
  0x39   :  { %1141 = vst [vmem:[%s1505_s3 + $0xa8] sm:$0xff] %v1038_v53   ;;  %v1043_v62 = vpack.c.bf16 %v329_v55, %v328_v54  ;;  %v908_v2 = vunpack.c.l.bf16 %v1115_v52  ;;  %v331_v3 = vmax.f32 %v267_v57, 0.0  ;;  %v199_v5 = vmul.f32 %v904_v60, %v1178_v1 }
  0x3a   :  { %v269_v4 = vadd.f32 %v1192_v7, %v198_v59  ;;  %v909_v6 = vunpack.c.h.bf16 %v1115_v52  ;;  %v332_v8 = vmax.f32 %v268_v63, 0.0  ;;  %v200_v9 = vmul.f32 %v905_v0, %v1178_v1 }
  0x3b   :  { %1142 = vst [vmem:[%s1505_s3 + $0xb0] sm:$0xff] %v1043_v62   ;;  %v201_v10 = vmul.f32 %v908_v2, %v1178_v1  ;;  %v912_v11 = vunpack.c.l.bf16 %v1116_v61  ;;  %v1048_v13 = vpack.c.bf16 %v331_v3, %v330_v58  ;;  %v270_v15 = vadd.f32 %v1192_v7, %v199_v5 }
  0x3c   :  { %v333_v14 = vmax.f32 %v269_v4, 0.0  ;;  %v202_v16 = vmul.f32 %v909_v6, %v1178_v1  ;;  %v271_v17 = vadd.f32 %v1192_v7, %v200_v9  ;;  %v913_v19 = vunpack.c.h.bf16 %v1116_v61 }
  0x3d   :  { %v272_v18 = vadd.f32 %v1192_v7, %v201_v10  ;;  %v203_v20 = vmul.f32 %v912_v11, %v1178_v1  ;;  %1143 = vst [vmem:[%s1505_s3 + $0xb8] sm:$0xff] %v1048_v13   ;;  %v334_v23 = vmax.f32 %v270_v15, 0.0  ;;  %v916_v25 = vunpack.c.l.bf16 %v1117_v12 }
  0x3e   :  { %v1053_v22 = vpack.c.bf16 %v333_v14, %v332_v8  ;;  %v273_v24 = vadd.f32 %v1192_v7, %v202_v16  ;;  %v335_v26 = vmax.f32 %v271_v17, 0.0  ;;  %v204_v28 = vmul.f32 %v913_v19, %v1178_v1 }
  0x3f   :  { %v336_v27 = vmax.f32 %v272_v18, 0.0  ;;  %v274_v29 = vadd.f32 %v1192_v7, %v203_v20  ;;  %v917_v31 = vunpack.c.h.bf16 %v1117_v12  ;;  %v205_v32 = vmul.f32 %v916_v25, %v1178_v1 }
  0x40   :  { %1144 = vst [vmem:[%s1505_s3 + $0xc0] sm:$0xff] %v1053_v22   ;;  %v337_v30 = vmax.f32 %v273_v24, 0.0  ;;  %v920_v33 = vunpack.c.l.bf16 %v1118_v21  ;;  %v1058_v35 = vpack.c.bf16 %v335_v26, %v334_v23  ;;  %v275_v36 = vadd.f32 %v1192_v7, %v204_v28 }
  0x41   :  { %v338_v37 = vmax.f32 %v274_v29, 0.0  ;;  %v921_v38 = vunpack.c.h.bf16 %v1118_v21  ;;  %v206_v41 = vmul.f32 %v917_v31, %v1178_v1  ;;  %v276_v42 = vadd.f32 %v1192_v7, %v205_v32 }
  0x42   :  { %v1063_v40 = vpack.c.bf16 %v337_v30, %v336_v27  ;;  %v207_v43 = vmul.f32 %v920_v33, %v1178_v1  ;;  %1145 = vst [vmem:[%s1505_s3 + $0xc8] sm:$0xff] %v1058_v35   ;;  %v339_v44 = vmax.f32 %v275_v36, 0.0  ;;  %v924_v46 = vunpack.c.l.bf16 %v1119_v34 }
  0x43   :  { %v208_v45 = vmul.f32 %v921_v38, %v1178_v1  ;;  %v925_v47 = vunpack.c.h.bf16 %v1119_v34  ;;  %v277_v48 = vadd.f32 %v1192_v7, %v206_v41  ;;  %v340_v49 = vmax.f32 %v276_v42, 0.0 }
  0x44   :  { %1146 = vst [vmem:[%s1505_s3 + $0xd0] sm:$0xff] %v1063_v40   ;;  %v278_v50 = vadd.f32 %v1192_v7, %v207_v43  ;;  %v928_v51 = vunpack.c.l.bf16 %v1120_v39  ;;  %v1068_v52 = vpack.c.bf16 %v339_v44, %v338_v37  ;;  %v209_v54 = vmul.f32 %v924_v46, %v1178_v1 }
  0x45   :  { %v279_v53 = vadd.f32 %v1192_v7, %v208_v45  ;;  %v210_v55 = vmul.f32 %v925_v47, %v1178_v1  ;;  %v341_v56 = vmax.f32 %v277_v48, 0.0  ;;  %v929_v58 = vunpack.c.h.bf16 %v1120_v39 }
  0x46   :  { %v342_v57 = vmax.f32 %v278_v50, 0.0  ;;  %v211_v59 = vmul.f32 %v928_v51, %v1178_v1  ;;  %1147 = vst [vmem:[%s1505_s3 + $0xd8] sm:$0xff] %v1068_v52   ;;  %v280_v61 = vadd.f32 %v1192_v7, %v209_v54 }
  0x47   :  { %v343_v60 = vmax.f32 %v279_v53, 0.0  ;;  %v281_v62 = vadd.f32 %v1192_v7, %v210_v55  ;;  %v1073_v63 = vpack.c.bf16 %v341_v56, %v340_v49  ;;  %v212_v0 = vmul.f32 %v929_v58, %v1178_v1 }
  0x48   :  { %v282_v2 = vadd.f32 %v1192_v7, %v211_v59  ;;  %v344_v4 = vmax.f32 %v280_v61, 0.0 }
  0x49   :  { %v1078_v3 = vpack.c.bf16 %v343_v60, %v342_v57  ;;  %v345_v5 = vmax.f32 %v281_v62, 0.0  ;;  %1148 = vst [vmem:[%s1505_s3 + $0xe0] sm:$0xff] %v1073_v63   ;;  %v283_v6 = vadd.f32 %v1192_v7, %v212_v0 }
  0x4a   :  { %v346_v8 = vmax.f32 %v282_v2, 0.0 }
  0x4b   :  { %1149 = vst [vmem:[%s1505_s3 + $0xe8] sm:$0xff] %v1078_v3   ;;  %v1083_v9 = vpack.c.bf16 %v345_v5, %v344_v4  ;;  %v347_v10 = vmax.f32 %v283_v6, 0.0 }
  0x4d   :  { %1150 = vst [vmem:[%s1505_s3 + $0xf0] sm:$0xff] %v1083_v9   ;;  %v1088_v1 = vpack.c.bf16 %v347_v10, %v346_v8 }
  0x4f   :  { %1151 = vst [vmem:[%s1505_s3 + $0xf8] sm:$0xff] %v1088_v1  }

// kernel: generator_forward.13
= control target key start
LH: loop header
LB: loop body
LE: loop exit
PB: predicated region body
PF: predicated region fallthrough
CT: control target
= control target key end

     0   :  { %s1065_s15 = smov 0   ;;  %s1067_s16 = smov 0   ;;  %s1157_s0 = inlined_call_operand.vmem [shape: bf16[4,128,128], index: 0, kind: input, shape index: {}]   ;;  %s1158_s1 = inlined_call_operand.vmem [shape: bf16[4,128,128], index: 1, kind: input, shape index: {}]   ;;  %s1159_s2 = inlined_call_operand.vmem [shape: bf16[4,128,128], index: 2, kind: output, shape index: {0}]   ;;  %s1160_s3 = inlined_call_operand.vmem [shape: f32[4,1,128], index: 3, kind: output, shape index: {1}]   ;;  %s1161_s4 = inlined_call_operand.vmem [shape: f32[4,1,128], index: 4, kind: output, shape index: {2}]  }
   0x1   :  { %s1069_s17 = smov 0  }
   0x2 LB: > { %s27_s18 = sadd.s32 1, %s1033_s16  ;;  %p803_p0 = scmp.ge.s32.totalorder %s1037_s17, 1  ;;  %s1037_s17 = sphi %s1069_s17, %s15_s17   ;;  %s1033_s16 = sphi %s1067_s16, %s1163_s16   ;;  %s1029_s15 = sphi %s1065_s15, %s1162_s15  }
   0x3   : > { %p29_p1 = scmp.ge.s32.totalorder %s27_s18, 4  ;;  %p198_p2 = scmp.lt.s32.totalorder %s1037_s17, 5 }
   0x5   : > { %s1165_s18 = smov (%p29_p1, %s27_s18), 0  ;;  %p199_p3 = pnand %p803_p0, %p198_p2 }
   0x6   : > { %p244_p4 = scmp.lt.s32.totalorder (!%p199_p3), %s1029_s15, 3  ;;  %v1039_v16 = vmov (!%p199_p3), 0.0  }
   0x7   : > { %202 = sbr.rel (%p199_p3) target bundleno = 312 (0x138), region = 28 }
   0xe   : > { %s1167_s15 = smov (!%p244_p4, %s1029_s15), 3 }
   0xf   : > { %s1086_s19 = sshll.u32 %s1167_s15, 6  ;;  %s1120_s28 = scalar_lea.vmem %s1160_s3, %s1167_s15 }
  0x10   : > { %s1092_s22 = scalar_lea.vmem %s1158_s1, %s1086_s19  ;;  %s1101_s25 = scalar_lea.vmem %s1157_s0, %s1086_s19  ;;  %584 = vst [vmem:[%s1120_s28] sm:$0x1] %v1039_v16 }
  0x11   : > { %v999_v0 = vld [vmem:[%s1092_s22] sm:$0xff]   ;;  %v1000_v1 = vld [vmem:[%s1092_s22 + $0x8] sm:$0xff]   ;;  %v1001_v2 = vld [vmem:[%s1092_s22 + $0x10] sm:$0xff]   ;;  %s1126_s5 = scalar_lea.vmem %s1161_s4, %s1167_s15  ;;  %s1134_s8 = scalar_lea.vmem %s1159_s2, %s1086_s19 }
  0x12   : > { %926 = vmatprep.subr.bf16.mxu0 %v999_v0  ;;  %958 = vmatprep.subr.bf16.mxu1 %v999_v0  ;;  %v1002_v3 = vld [vmem:[%s1092_s22 + $0x18] sm:$0xff]   ;;  %v1007_v4 = vld [vmem:[%s1101_s25] sm:$0xff]   ;;  %v1004_v7 = vld [vmem:[%s1092_s22 + $0x28] sm:$0xff]   ;;  %585 = vst [vmem:[%s1126_s5] sm:$0x1] %v1039_v16 }
  0x13   : > { %927 = vmatpush3.bf16.msra.mxu0 %v999_v0  ;;  %966 = vmatpush3.bf16.msra.mxu1 %v999_v0  ;;  %v1003_v5 = vld [vmem:[%s1092_s22 + $0x20] sm:$0xff]   ;;  %v1005_v8 = vld [vmem:[%s1092_s22 + $0x30] sm:$0xff]   ;;  %v1006_v9 = vld [vmem:[%s1092_s22 + $0x38] sm:$0xff]  }
  0x14   : > { %928 = vmatprep.subr.bf16.mxu0 %v1000_v1  ;;  %959 = vmatprep.subr.bf16.mxu1 %v1000_v1  ;;  %v1011_v6 = vld [vmem:[%s1101_s25 + $0x20] sm:$0xff]   ;;  %v1008_v10 = vld [vmem:[%s1101_s25 + $0x8] sm:$0xff]   ;;  %v1009_v12 = vld [vmem:[%s1101_s25 + $0x10] sm:$0xff]  }
  0x15   : > { %942 = vmatprep.mubr.bf16.mxu0 %v1007_v4  ;;  %950 = vmatprep.mubr.bf16.mxu1 %v1011_v6  ;;  %v1012_v11 = vld [vmem:[%s1101_s25 + $0x28] sm:$0xff]   ;;  %v1013_v13 = vld [vmem:[%s1101_s25 + $0x30] sm:$0xff]   ;;  %v1010_v14 = vld [vmem:[%s1101_s25 + $0x18] sm:$0xff]  }
  0x16   : > { %v1014_v15 = vld [vmem:[%s1101_s25 + $0x38] sm:$0xff]  }
  0x17   : > { %929 = vmatpush3.bf16.msra.mxu0 %v1000_v1  ;;  %967 = vmatpush3.bf16.msra.mxu1 %v1000_v1 }
  0x18   : > { %930 = vmatprep.subr.bf16.mxu0 %v1001_v2  ;;  %960 = vmatprep.subr.bf16.mxu1 %v1001_v2 }
  0x1b   : > { %931 = vmatpush3.bf16.msra.mxu0 %v1001_v2  ;;  %968 = vmatpush3.bf16.msra.mxu1 %v1001_v2 }
  0x1c   : > { %932 = vmatprep.subr.bf16.mxu0 %v1002_v3  ;;  %961 = vmatprep.subr.bf16.mxu1 %v1002_v3 }
  0x1f   : > { %933 = vmatpush3.bf16.msra.mxu0 %v1002_v3  ;;  %969 = vmatpush3.bf16.msra.mxu1 %v1002_v3 }
  0x20   : > { %934 = vmatprep.subr.bf16.mxu0 %v1003_v5  ;;  %962 = vmatprep.subr.bf16.mxu1 %v1003_v5 }
  0x23   : > { %935 = vmatpush3.bf16.msra.mxu0 %v1003_v5  ;;  %970 = vmatpush3.bf16.msra.mxu1 %v1003_v5 }
  0x24   : > { %936 = vmatprep.subr.bf16.mxu0 %v1004_v7  ;;  %963 = vmatprep.subr.bf16.mxu1 %v1004_v7 }
  0x27   : > { %937 = vmatpush3.bf16.msra.mxu0 %v1004_v7  ;;  %971 = vmatpush3.bf16.msra.mxu1 %v1004_v7 }
  0x28   : > { %938 = vmatprep.subr.bf16.mxu0 %v1005_v8  ;;  %964 = vmatprep.subr.bf16.mxu1 %v1005_v8 }
  0x2b   : > { %939 = vmatpush3.bf16.msra.mxu0 %v1005_v8  ;;  %972 = vmatpush3.bf16.msra.mxu1 %v1005_v8 }
  0x2c   : > { %940 = vmatprep.subr.bf16.mxu0 %v1006_v9  ;;  %965 = vmatprep.subr.bf16.mxu1 %v1006_v9 }
  0x2f   : > { %941 = vmatpush3.bf16.msra.mxu0 %v1006_v9  ;;  %973 = vmatpush3.bf16.msra.mxu1 %v1006_v9 }
  0x32   : > { %943 = vmatmul.mubr.bf16.vlgmr.msra.gmra.mrb[0].mxu0 %v1008_v10  ;;  %951 = vmatmul.mubr.bf16.vlgmr.msra.gmra.mrb[0].mxu1 %v1012_v11 }
  0x33   : > { %946 = vmatprep.mubr.bf16.mxu0 %v1009_v12  ;;  %954 = vmatprep.mubr.bf16.mxu1 %v1013_v13 }
  0x3a   : > { %947 = vmatmul.mubr.bf16.gmra.mrb[4].mxu0 %v1010_v14  ;;  %955 = vmatmul.mubr.bf16.gmra.mrb[4].mxu1 %v1014_v15 }
 0x105   : > { %v944_v17 = vpop.f32.mrb[0].mxu0  ;;  %v952_v18 = vpop.f32.mrb[0].mxu1 }
 0x106   : > { %v437_v19 = vpop.f32.mrb[1].mxu0  ;;  %v469_v20 = vpop.f32.mrb[1].mxu1  ;;  %v613_v32 = vmul.f32 %v944_v17, %v944_v17  ;;  %v621_v4 = vmul.f32 %v952_v18, %v952_v18 }
 0x107   : > { %v945_v21 = vpop.f32.mrb[2].mxu0  ;;  %v953_v22 = vpop.f32.mrb[2].mxu1  ;;  %v611_v23 = vmul.f32 %v437_v19, %v437_v19  ;;  %v619_v62 = vmul.f32 %v469_v20, %v469_v20 }
 0x108   : > { %v871_v24 = vpack.c.bf16 %v945_v21, %v944_v17  ;;  %v440_v25 = vpop.f32.mrb[3].mxu0  ;;  %v891_v26 = vpack.c.bf16 %v953_v22, %v952_v18  ;;  %v472_v27 = vpop.f32.mrb[3].mxu1  ;;  %v614_v35 = vmul.f32 %v945_v21, %v945_v21  ;;  %v622_v7 = vmul.f32 %v953_v22, %v953_v22 }
 0x109   : > { %v866_v28 = vpack.c.bf16 %v440_v25, %v437_v19  ;;  %v587_v29 = vadd.f32 %v440_v25, %v437_v19  ;;  %v612_v30 = vmul.f32 %v440_v25, %v440_v25  ;;  %v886_v31 = vpack.c.bf16 %v472_v27, %v469_v20 }
 0x10a   : > { %903 = vst [vmem:[%s1134_s8 + $0x8] sm:$0xff] %v871_v24   ;;  %907 = vst [vmem:[%s1134_s8 + $0x28] sm:$0xff] %v891_v26   ;;  %v620_v3 = vmul.f32 %v472_v27, %v472_v27 }
 0x10b   : > { %867 = vst [vmem:[%s1134_s8] sm:$0xff] %v866_v28   ;;  %v588_v33 = vadd.f32 %v944_v17, %v587_v29  ;;  %v627_v34 = vadd.f32 %v612_v30, %v611_v23  ;;  %906 = vst [vmem:[%s1134_s8 + $0x20] sm:$0xff] %v886_v31  }
 0x10d   : > { %v628_v36 = vadd.f32 %v627_v34, %v613_v32  ;;  %v948_v37 = vpop.f32.mrb[4].mxu0  ;;  %v589_v38 = vadd.f32 %v945_v21, %v588_v33  ;;  %v956_v39 = vpop.f32.mrb[4].mxu1  ;;  %v586_v32 = vld [vmem:[%s1120_s28] sm:$0x1] }
 0x10e   : > { %v453_v40 = vpop.f32.mrb[5].mxu0  ;;  %v485_v41 = vpop.f32.mrb[5].mxu1  ;;  %v617_v56 = vmul.f32 %v948_v37, %v948_v37  ;;  %v625_v16 = vmul.f32 %v956_v39, %v956_v39 }
 0x10f   : > { %v590_v42 = vadd.f32 %v589_v38, %v453_v40  ;;  %v615_v43 = vmul.f32 %v453_v40, %v453_v40  ;;  %v629_v44 = vadd.f32 %v628_v36, %v614_v35  ;;  %v949_v45 = vpop.f32.mrb[6].mxu0  ;;  %v957_v46 = vpop.f32.mrb[6].mxu1  ;;  %v623_v10 = vmul.f32 %v485_v41, %v485_v41  ;;  %v610_v35 = vld [vmem:[%s1126_s5] sm:$0x1] }
 0x110   : > { %v881_v47 = vpack.c.bf16 %v949_v45, %v948_v37  ;;  %v456_v48 = vpop.f32.mrb[7].mxu0  ;;  %v901_v49 = vpack.c.bf16 %v957_v46, %v956_v39  ;;  %v488_v50 = vpop.f32.mrb[7].mxu1  ;;  %v618_v59 = vmul.f32 %v949_v45, %v949_v45 }
 0x111   : > { %v630_v51 = vadd.f32 %v629_v44, %v615_v43  ;;  %v876_v52 = vpack.c.bf16 %v456_v48, %v453_v40  ;;  %v591_v53 = vadd.f32 %v590_v42, %v456_v48  ;;  %v616_v54 = vmul.f32 %v456_v48, %v456_v48 }
 0x112   : > { %905 = vst [vmem:[%s1134_s8 + $0x18] sm:$0xff] %v881_v47   ;;  %909 = vst [vmem:[%s1134_s8 + $0x38] sm:$0xff] %v901_v49   ;;  %v896_v55 = vpack.c.bf16 %v488_v50, %v485_v41  ;;  %v624_v15 = vmul.f32 %v488_v50, %v488_v50 }
 0x113   : > { %904 = vst [vmem:[%s1134_s8 + $0x10] sm:$0xff] %v876_v52   ;;  %v592_v57 = vadd.f32 %v948_v37, %v591_v53  ;;  %v631_v58 = vadd.f32 %v630_v51, %v616_v54 }
 0x114   : > { %908 = vst [vmem:[%s1134_s8 + $0x30] sm:$0xff] %v896_v55  }
 0x115   : > { %v632_v60 = vadd.f32 %v631_v58, %v617_v56  ;;  %v593_v61 = vadd.f32 %v949_v45, %v592_v57 }
 0x117   : > { %v594_v63 = vadd.f32 %v593_v61, %v469_v20  ;;  %v633_v0 = vadd.f32 %v632_v60, %v618_v59  ;;  %v626_v20 = vmul.f32 %v957_v46, %v957_v46 }
 0x119   : > { %v634_v1 = vadd.f32 %v633_v0, %v619_v62  ;;  %v595_v2 = vadd.f32 %v594_v63, %v472_v27 }
 0x11b   : > { %v596_v5 = vadd.f32 %v952_v18, %v595_v2  ;;  %v635_v6 = vadd.f32 %v634_v1, %v620_v3 }
 0x11d   : > { %v636_v8 = vadd.f32 %v635_v6, %v621_v4  ;;  %v597_v9 = vadd.f32 %v953_v22, %v596_v5 }
 0x11f   : > { %v598_v11 = vadd.f32 %v597_v9, %v485_v41  ;;  %v637_v12 = vadd.f32 %v636_v8, %v622_v7 }
 0x121   : > { %v638_v13 = vadd.f32 %v637_v12, %v623_v10  ;;  %v599_v14 = vadd.f32 %v598_v11, %v488_v50 }
 0x123   : > { %v600_v17 = vadd.f32 %v956_v39, %v599_v14  ;;  %v639_v19 = vadd.f32 %v638_v13, %v624_v15 }
 0x125   : > { %v601_v21 = vadd.f32 %v957_v46, %v600_v17  ;;  %v640_v23 = vadd.f32 %v639_v19, %v625_v16 }
 0x127   : > { %v602_v24 = vrot.slane %v601_v21, 4  ;;  %v641_v18 = vadd.f32 %v640_v23, %v626_v20 }
 0x129   : > { %v603_v25 = vadd.f32 %v602_v24, %v601_v21  ;;  %v642_v22 = vrot.slane %v641_v18, 4 }
 0x12b   : > { %v604_v26 = vrot.slane %v603_v25, 2  ;;  %v643_v27 = vadd.f32 %v642_v22, %v641_v18 }
 0x12d   : > { %v605_v28 = vadd.f32 %v604_v26, %v603_v25  ;;  %v644_v29 = vrot.slane %v643_v27, 2 }
 0x12f   : > { %v606_v30 = vrot.slane %v605_v28, 1  ;;  %v645_v31 = vadd.f32 %v644_v29, %v643_v27 }
 0x131   : > { %v607_v33 = vadd.f32 %v606_v30, %v605_v28  ;;  %v646_v34 = vrot.slane %v645_v31, 1 }
 0x133   : > { %v608_v36 = vadd.f32 %v607_v33, %v586_v32  ;;  %v647_v37 = vadd.f32 %v646_v34, %v645_v31 }
 0x135   : > { %609 = vst [vmem:[%s1120_s28] sm:$0x1] %v608_v36  ;;  %v648_v38 = vadd.f32 %v647_v37, %v610_v35 }
 0x137   : > { %649 = vst [vmem:[%s1126_s5] sm:$0x1] %v648_v38 }
 0x138 PF: > { %s15_s17 = sadd.s32 1, %s1037_s17   ;;  %s1162_s15 = smov %s1033_s16 }
 0x139   : > { %p12_p5 = scmp.ge.s32.totalorder %s15_s17, 6   ;;  %s1163_s16 = smov %s1165_s18 }
 0x13b   :  { %14 = sbr.rel (!%p12_p5) target bundleno = 2 (0x2), region = 89 }

// kernel: generator_forward.15
= control target key start
LH: loop header
LB: loop body
LE: loop exit
PB: predicated region body
PF: predicated region fallthrough
CT: control target
= control target key end

     0   :  { %s2193_s15 = smov 0   ;;  %s2195_s16 = smov 0   ;;  %s2525_s0 = inlined_call_operand.vmem [shape: bf16[4,512,128], index: 0, kind: input, shape index: {}]   ;;  %s2526_s1 = inlined_call_operand.vmem [shape: bf16[4,128,128], index: 1, kind: input, shape index: {}]   ;;  %s2527_s2 = inlined_call_operand.vmem [shape: bf16[4,512,128], index: 2, kind: output, shape index: {0}]   ;;  %s2528_s3 = inlined_call_operand.vmem [shape: f32[4,1,128], index: 3, kind: output, shape index: {1}]   ;;  %s2529_s4 = inlined_call_operand.vmem [shape: f32[4,1,128], index: 4, kind: output, shape index: {2}]  }
   0x1   :  { %s2197_s17 = smov 0  }
   0x2 LB: > { %s27_s18 = sadd.s32 1, %s2161_s16  ;;  %p1571_p0 = scmp.ge.s32.totalorder %s2165_s17, 1  ;;  %s2165_s17 = sphi %s2197_s17, %s15_s17   ;;  %s2161_s16 = sphi %s2195_s16, %s2531_s16   ;;  %s2157_s15 = sphi %s2193_s15, %s2530_s15  }
   0x3   : > { %p29_p1 = scmp.ge.s32.totalorder %s27_s18, 4  ;;  %p198_p2 = scmp.lt.s32.totalorder %s2165_s17, 5 }
   0x5   : > { %s2533_s18 = smov (%p29_p1, %s27_s18), 0  ;;  %p199_p3 = pnand %p1571_p0, %p198_p2 }
   0x6   : > { %p244_p4 = scmp.lt.s32.totalorder (!%p199_p3), %s2157_s15, 3  ;;  %v2167_v40 = vmov (!%p199_p3), 0.0  }
   0x7   : > { %202 = sbr.rel (%p199_p3) target bundleno = 408 (0x198), region = 28 }
   0xe   : > { %s2535_s15 = smov (!%p244_p4, %s2157_s15), 3 }
   0xf   : > { %s1685_s19 = sshll.u32 %s2535_s15, 6  ;;  %s1684_s23 = sshll.u32 %s2535_s15, 8 }
  0x10   : > { %s2217_s22 = scalar_lea.vmem %s2526_s1, %s1685_s19  ;;  %s2228_s26 = scalar_lea.vmem %s2525_s0, %s1684_s23 }
  0x11   : > { %v2103_v0 = vld [vmem:[%s2217_s22] sm:$0xff]   ;;  %v2104_v1 = vld [vmem:[%s2217_s22 + $0x8] sm:$0xff]   ;;  %v2105_v2 = vld [vmem:[%s2217_s22 + $0x10] sm:$0xff]   ;;  %s2271_s29 = scalar_lea.vmem %s2528_s3, %s2535_s15  ;;  %s2277_s6 = scalar_lea.vmem %s2529_s4, %s2535_s15 }
  0x12   : > { %1982 = vmatprep.subr.bf16.mxu0 %v2103_v0  ;;  %2062 = vmatprep.subr.bf16.mxu1 %v2103_v0  ;;  %v2106_v3 = vld [vmem:[%s2217_s22 + $0x18] sm:$0xff]   ;;  %v2111_v4 = vld [vmem:[%s2228_s26] sm:$0xff]   ;;  %v2108_v6 = vld [vmem:[%s2217_s22 + $0x28] sm:$0xff]   ;;  %1208 = vst [vmem:[%s2271_s29] sm:$0x1] %v2167_v40  ;;  %s2290_s9 = scalar_lea.vmem %s2527_s2, %s1684_s23 }
  0x13   : > { %1983 = vmatpush3.bf16.msra.mxu0 %v2103_v0  ;;  %2070 = vmatpush3.bf16.msra.mxu1 %v2103_v0  ;;  %v2107_v5 = vld [vmem:[%s2217_s22 + $0x20] sm:$0xff]   ;;  %v2109_v7 = vld [vmem:[%s2217_s22 + $0x30] sm:$0xff]   ;;  %v2110_v8 = vld [vmem:[%s2217_s22 + $0x38] sm:$0xff]   ;;  %1209 = vst [vmem:[%s2277_s6] sm:$0x1] %v2167_v40 }
  0x14   : > { %1984 = vmatprep.subr.bf16.mxu0 %v2104_v1  ;;  %2063 = vmatprep.subr.bf16.mxu1 %v2104_v1  ;;  %v2127_v9 = vld [vmem:[%s2228_s26 + $0x80] sm:$0xff]   ;;  %v2112_v10 = vld [vmem:[%s2228_s26 + $0x8] sm:$0xff]   ;;  %v2113_v11 = vld [vmem:[%s2228_s26 + $0x10] sm:$0xff]  }
  0x15   : > { %1998 = vmatprep.mubr.bf16.mxu0 %v2111_v4  ;;  %2030 = vmatprep.mubr.bf16.mxu1 %v2127_v9  ;;  %v2128_v12 = vld [vmem:[%s2228_s26 + $0x88] sm:$0xff]   ;;  %v2129_v13 = vld [vmem:[%s2228_s26 + $0x90] sm:$0xff]   ;;  %v2114_v14 = vld [vmem:[%s2228_s26 + $0x18] sm:$0xff]  }
  0x16   : > { %v2115_v15 = vld [vmem:[%s2228_s26 + $0x20] sm:$0xff]   ;;  %v2130_v16 = vld [vmem:[%s2228_s26 + $0x98] sm:$0xff]   ;;  %v2116_v18 = vld [vmem:[%s2228_s26 + $0x28] sm:$0xff]  }
  0x17   : > { %1985 = vmatpush3.bf16.msra.mxu0 %v2104_v1  ;;  %2071 = vmatpush3.bf16.msra.mxu1 %v2104_v1  ;;  %v2131_v17 = vld [vmem:[%s2228_s26 + $0xa0] sm:$0xff]   ;;  %v2132_v19 = vld [vmem:[%s2228_s26 + $0xa8] sm:$0xff]   ;;  %v2117_v20 = vld [vmem:[%s2228_s26 + $0x30] sm:$0xff]  }
  0x18   : > { %1986 = vmatprep.subr.bf16.mxu0 %v2105_v2  ;;  %2064 = vmatprep.subr.bf16.mxu1 %v2105_v2  ;;  %v2133_v21 = vld [vmem:[%s2228_s26 + $0xb0] sm:$0xff]   ;;  %v2118_v22 = vld [vmem:[%s2228_s26 + $0x38] sm:$0xff]   ;;  %v2119_v24 = vld [vmem:[%s2228_s26 + $0x40] sm:$0xff]  }
  0x19   : > { %v2134_v23 = vld [vmem:[%s2228_s26 + $0xb8] sm:$0xff]   ;;  %v2135_v25 = vld [vmem:[%s2228_s26 + $0xc0] sm:$0xff]   ;;  %v2120_v26 = vld [vmem:[%s2228_s26 + $0x48] sm:$0xff]  }
  0x1a   : > { %v2136_v27 = vld [vmem:[%s2228_s26 + $0xc8] sm:$0xff]   ;;  %v2121_v28 = vld [vmem:[%s2228_s26 + $0x50] sm:$0xff]   ;;  %v2122_v30 = vld [vmem:[%s2228_s26 + $0x58] sm:$0xff]  }
  0x1b   : > { %1987 = vmatpush3.bf16.msra.mxu0 %v2105_v2  ;;  %2072 = vmatpush3.bf16.msra.mxu1 %v2105_v2  ;;  %v2137_v29 = vld [vmem:[%s2228_s26 + $0xd0] sm:$0xff]   ;;  %v2138_v31 = vld [vmem:[%s2228_s26 + $0xd8] sm:$0xff]   ;;  %v2123_v32 = vld [vmem:[%s2228_s26 + $0x60] sm:$0xff]  }
  0x1c   : > { %1988 = vmatprep.subr.bf16.mxu0 %v2106_v3  ;;  %2065 = vmatprep.subr.bf16.mxu1 %v2106_v3  ;;  %v2139_v33 = vld [vmem:[%s2228_s26 + $0xe0] sm:$0xff]   ;;  %v2124_v34 = vld [vmem:[%s2228_s26 + $0x68] sm:$0xff]   ;;  %v2125_v36 = vld [vmem:[%s2228_s26 + $0x70] sm:$0xff]  }
  0x1d   : > { %v2140_v35 = vld [vmem:[%s2228_s26 + $0xe8] sm:$0xff]   ;;  %v2141_v37 = vld [vmem:[%s2228_s26 + $0xf0] sm:$0xff]   ;;  %v2126_v38 = vld [vmem:[%s2228_s26 + $0x78] sm:$0xff]  }
  0x1e   : > { %v2142_v39 = vld [vmem:[%s2228_s26 + $0xf8] sm:$0xff]  }
  0x1f   : > { %1989 = vmatpush3.bf16.msra.mxu0 %v2106_v3  ;;  %2073 = vmatpush3.bf16.msra.mxu1 %v2106_v3 }
  0x20   : > { %1990 = vmatprep.subr.bf16.mxu0 %v2107_v5  ;;  %2066 = vmatprep.subr.bf16.mxu1 %v2107_v5 }
  0x23   : > { %1991 = vmatpush3.bf16.msra.mxu0 %v2107_v5  ;;  %2074 = vmatpush3.bf16.msra.mxu1 %v2107_v5 }
  0x24   : > { %1992 = vmatprep.subr.bf16.mxu0 %v2108_v6  ;;  %2067 = vmatprep.subr.bf16.mxu1 %v2108_v6 }
  0x27   : > { %1993 = vmatpush3.bf16.msra.mxu0 %v2108_v6  ;;  %2075 = vmatpush3.bf16.msra.mxu1 %v2108_v6 }
  0x28   : > { %1994 = vmatprep.subr.bf16.mxu0 %v2109_v7  ;;  %2068 = vmatprep.subr.bf16.mxu1 %v2109_v7 }
  0x2b   : > { %1995 = vmatpush3.bf16.msra.mxu0 %v2109_v7  ;;  %2076 = vmatpush3.bf16.msra.mxu1 %v2109_v7 }
  0x2c   : > { %1996 = vmatprep.subr.bf16.mxu0 %v2110_v8  ;;  %2069 = vmatprep.subr.bf16.mxu1 %v2110_v8 }
  0x2f   : > { %1997 = vmatpush3.bf16.msra.mxu0 %v2110_v8  ;;  %2077 = vmatpush3.bf16.msra.mxu1 %v2110_v8 }
  0x32   : > { %1999 = vmatmul.mubr.bf16.vlgmr.msra.gmra.mrb[0].mxu0 %v2112_v10  ;;  %2031 = vmatmul.mubr.bf16.vlgmr.msra.gmra.mrb[0].mxu1 %v2128_v12 }
  0x33   : > { %2002 = vmatprep.mubr.bf16.mxu0 %v2113_v11  ;;  %2034 = vmatprep.mubr.bf16.mxu1 %v2129_v13 }
  0x3a   : > { %2003 = vmatmul.mubr.bf16.gmra.mrb[4].mxu0 %v2114_v14  ;;  %2035 = vmatmul.mubr.bf16.gmra.mrb[4].mxu1 %v2130_v16 }
  0x3b   : > { %2006 = vmatprep.mubr.bf16.mxu0 %v2115_v15  ;;  %2038 = vmatprep.mubr.bf16.mxu1 %v2131_v17 }
  0x42   : > { %2007 = vmatmul.mubr.bf16.gmra.mrb[8].mxu0 %v2116_v18  ;;  %2039 = vmatmul.mubr.bf16.gmra.mrb[8].mxu1 %v2132_v19 }
  0x43   : > { %2010 = vmatprep.mubr.bf16.mxu0 %v2117_v20  ;;  %2042 = vmatprep.mubr.bf16.mxu1 %v2133_v21 }
  0x4a   : > { %2011 = vmatmul.mubr.bf16.gmra.mrb[12].mxu0 %v2118_v22  ;;  %2043 = vmatmul.mubr.bf16.gmra.mrb[12].mxu1 %v2134_v23 }
  0x4b   : > { %2014 = vmatprep.mubr.bf16.mxu0 %v2119_v24  ;;  %2046 = vmatprep.mubr.bf16.mxu1 %v2135_v25 }
  0x52   : > { %2015 = vmatmul.mubr.bf16.gmra.mrb[16].mxu0 %v2120_v26  ;;  %2047 = vmatmul.mubr.bf16.gmra.mrb[16].mxu1 %v2136_v27 }
  0x53   : > { %2018 = vmatprep.mubr.bf16.mxu0 %v2121_v28  ;;  %2050 = vmatprep.mubr.bf16.mxu1 %v2137_v29 }
  0x5a   : > { %2019 = vmatmul.mubr.bf16.gmra.mrb[20].mxu0 %v2122_v30  ;;  %2051 = vmatmul.mubr.bf16.gmra.mrb[20].mxu1 %v2138_v31 }
  0x5b   : > { %2022 = vmatprep.mubr.bf16.mxu0 %v2123_v32  ;;  %2054 = vmatprep.mubr.bf16.mxu1 %v2139_v33 }
  0x62   : > { %2023 = vmatmul.mubr.bf16.gmra.mrb[24].mxu0 %v2124_v34  ;;  %2055 = vmatmul.mubr.bf16.gmra.mrb[24].mxu1 %v2140_v35 }
  0x63   : > { %2026 = vmatprep.mubr.bf16.mxu0 %v2125_v36  ;;  %2058 = vmatprep.mubr.bf16.mxu1 %v2141_v37 }
  0x6a   : > { %2027 = vmatmul.mubr.bf16.gmra.mrb[28].mxu0 %v2126_v38  ;;  %2059 = vmatmul.mubr.bf16.gmra.mrb[28].mxu1 %v2142_v39 }
 0x105   : > { %v2000_v41 = vpop.f32.mrb[0].mxu0  ;;  %v2281_v42 = vpop.f32.mrb[0].mxu1 }
 0x106   : > { %v629_v43 = vpop.f32.mrb[1].mxu0  ;;  %v2283_v44 = vpop.f32.mrb[1].mxu1  ;;  %v1285_v56 = vmul.f32 %v2000_v41, %v2000_v41 }
 0x107   : > { %v2001_v45 = vpop.f32.mrb[2].mxu0  ;;  %v2292_v46 = vpop.f32.mrb[2].mxu1  ;;  %v1283_v47 = vmul.f32 %v629_v43, %v629_v43 }
 0x108   : > { %v1759_v48 = vpack.c.bf16 %v2001_v45, %v2000_v41  ;;  %v632_v49 = vpop.f32.mrb[3].mxu0  ;;  %v1839_v50 = vpack.c.bf16 %v2292_v46, %v2281_v42  ;;  %v2296_v51 = vpop.f32.mrb[3].mxu1  ;;  %v1286_v59 = vmul.f32 %v2001_v45, %v2001_v45 }
 0x109   : > { %v1754_v52 = vpack.c.bf16 %v632_v49, %v629_v43  ;;  %v1211_v53 = vadd.f32 %v632_v49, %v629_v43  ;;  %v1284_v54 = vmul.f32 %v632_v49, %v632_v49  ;;  %v1834_v55 = vpack.c.bf16 %v2296_v51, %v2283_v44 }
 0x10a   : > { %1911 = vst [vmem:[%s2290_s9 + $0x8] sm:$0xff] %v1759_v48   ;;  %1927 = vst [vmem:[%s2290_s9 + $0x88] sm:$0xff] %v1839_v50  }
 0x10b   : > { %1755 = vst [vmem:[%s2290_s9] sm:$0xff] %v1754_v52   ;;  %v1212_v57 = vadd.f32 %v2000_v41, %v1211_v53  ;;  %v1347_v58 = vadd.f32 %v1284_v54, %v1283_v47  ;;  %1926 = vst [vmem:[%s2290_s9 + $0x80] sm:$0xff] %v1834_v55  }
 0x10d   : > { %v1348_v60 = vadd.f32 %v1347_v58, %v1285_v56  ;;  %v2004_v61 = vpop.f32.mrb[4].mxu0  ;;  %v1213_v62 = vadd.f32 %v2001_v45, %v1212_v57  ;;  %v2304_v63 = vpop.f32.mrb[4].mxu1 }
 0x10e   : > { %v645_v0 = vpop.f32.mrb[5].mxu0  ;;  %v2306_v1 = vpop.f32.mrb[5].mxu1  ;;  %v1289_v16 = vmul.f32 %v2004_v61, %v2004_v61 }
 0x10f   : > { %v1214_v2 = vadd.f32 %v1213_v62, %v645_v0  ;;  %v1287_v3 = vmul.f32 %v645_v0, %v645_v0  ;;  %v1349_v4 = vadd.f32 %v1348_v60, %v1286_v59  ;;  %v2005_v5 = vpop.f32.mrb[6].mxu0  ;;  %v2308_v6 = vpop.f32.mrb[6].mxu1 }
 0x110   : > { %v1769_v7 = vpack.c.bf16 %v2005_v5, %v2004_v61  ;;  %v648_v8 = vpop.f32.mrb[7].mxu0  ;;  %v1849_v9 = vpack.c.bf16 %v2308_v6, %v2304_v63  ;;  %v2312_v10 = vpop.f32.mrb[7].mxu1  ;;  %v1290_v19 = vmul.f32 %v2005_v5, %v2005_v5 }
 0x111   : > { %v1350_v11 = vadd.f32 %v1349_v4, %v1287_v3  ;;  %v1764_v12 = vpack.c.bf16 %v648_v8, %v645_v0  ;;  %v1215_v13 = vadd.f32 %v1214_v2, %v648_v8  ;;  %v1288_v14 = vmul.f32 %v648_v8, %v648_v8 }
 0x112   : > { %1913 = vst [vmem:[%s2290_s9 + $0x18] sm:$0xff] %v1769_v7   ;;  %1929 = vst [vmem:[%s2290_s9 + $0x98] sm:$0xff] %v1849_v9   ;;  %v1844_v15 = vpack.c.bf16 %v2312_v10, %v2306_v1 }
 0x113   : > { %1912 = vst [vmem:[%s2290_s9 + $0x10] sm:$0xff] %v1764_v12   ;;  %v1216_v17 = vadd.f32 %v2004_v61, %v1215_v13  ;;  %v1351_v18 = vadd.f32 %v1350_v11, %v1288_v14 }
 0x114   : > { %1928 = vst [vmem:[%s2290_s9 + $0x90] sm:$0xff] %v1844_v15  }
 0x115   : > { %v1352_v20 = vadd.f32 %v1351_v18, %v1289_v16  ;;  %v2008_v21 = vpop.f32.mrb[8].mxu0  ;;  %v1217_v22 = vadd.f32 %v2005_v5, %v1216_v17  ;;  %v2320_v23 = vpop.f32.mrb[8].mxu1 }
 0x116   : > { %v661_v24 = vpop.f32.mrb[9].mxu0  ;;  %v2322_v25 = vpop.f32.mrb[9].mxu1  ;;  %v1293_v40 = vmul.f32 %v2008_v21, %v2008_v21 }
 0x117   : > { %v1218_v26 = vadd.f32 %v1217_v22, %v661_v24  ;;  %v1291_v27 = vmul.f32 %v661_v24, %v661_v24  ;;  %v1353_v28 = vadd.f32 %v1352_v20, %v1290_v19  ;;  %v2009_v29 = vpop.f32.mrb[10].mxu0  ;;  %v2324_v30 = vpop.f32.mrb[10].mxu1 }
 0x118   : > { %v1779_v31 = vpack.c.bf16 %v2009_v29, %v2008_v21  ;;  %v664_v32 = vpop.f32.mrb[11].mxu0  ;;  %v1859_v33 = vpack.c.bf16 %v2324_v30, %v2320_v23  ;;  %v2328_v34 = vpop.f32.mrb[11].mxu1  ;;  %v1294_v45 = vmul.f32 %v2009_v29, %v2009_v29 }
 0x119   : > { %v1354_v35 = vadd.f32 %v1353_v28, %v1291_v27  ;;  %v1774_v36 = vpack.c.bf16 %v664_v32, %v661_v24  ;;  %v1219_v37 = vadd.f32 %v1218_v26, %v664_v32  ;;  %v1292_v38 = vmul.f32 %v664_v32, %v664_v32 }
 0x11a   : > { %1915 = vst [vmem:[%s2290_s9 + $0x28] sm:$0xff] %v1779_v31   ;;  %1931 = vst [vmem:[%s2290_s9 + $0xa8] sm:$0xff] %v1859_v33   ;;  %v1854_v39 = vpack.c.bf16 %v2328_v34, %v2322_v25 }
 0x11b   : > { %1914 = vst [vmem:[%s2290_s9 + $0x20] sm:$0xff] %v1774_v36   ;;  %v1220_v41 = vadd.f32 %v2008_v21, %v1219_v37  ;;  %v1355_v43 = vadd.f32 %v1354_v35, %v1292_v38 }
 0x11c   : > { %1930 = vst [vmem:[%s2290_s9 + $0xa0] sm:$0xff] %v1854_v39  }
 0x11d   : > { %v1356_v47 = vadd.f32 %v1355_v43, %v1293_v40  ;;  %v2012_v48 = vpop.f32.mrb[12].mxu0  ;;  %v1221_v49 = vadd.f32 %v2009_v29, %v1220_v41  ;;  %v2336_v50 = vpop.f32.mrb[12].mxu1 }
 0x11e   : > { %v677_v52 = vpop.f32.mrb[13].mxu0  ;;  %v2338_v53 = vpop.f32.mrb[13].mxu1  ;;  %v1297_v7 = vmul.f32 %v2012_v48, %v2012_v48 }
 0x11f   : > { %v1222_v54 = vadd.f32 %v1221_v49, %v677_v52  ;;  %v1295_v55 = vmul.f32 %v677_v52, %v677_v52  ;;  %v1357_v56 = vadd.f32 %v1356_v47, %v1294_v45  ;;  %v2013_v57 = vpop.f32.mrb[14].mxu0  ;;  %v2340_v58 = vpop.f32.mrb[14].mxu1 }
 0x120   : > { %v1789_v59 = vpack.c.bf16 %v2013_v57, %v2012_v48  ;;  %v680_v60 = vpop.f32.mrb[15].mxu0  ;;  %v1869_v61 = vpack.c.bf16 %v2340_v58, %v2336_v50  ;;  %v2344_v62 = vpop.f32.mrb[15].mxu1  ;;  %v1298_v11 = vmul.f32 %v2013_v57, %v2013_v57 }
 0x121   : > { %v1358_v0 = vadd.f32 %v1357_v56, %v1295_v55  ;;  %v1784_v2 = vpack.c.bf16 %v680_v60, %v677_v52  ;;  %v1223_v3 = vadd.f32 %v1222_v54, %v680_v60  ;;  %v1296_v4 = vmul.f32 %v680_v60, %v680_v60 }
 0x122   : > { %1917 = vst [vmem:[%s2290_s9 + $0x38] sm:$0xff] %v1789_v59   ;;  %1933 = vst [vmem:[%s2290_s9 + $0xb8] sm:$0xff] %v1869_v61   ;;  %v1864_v5 = vpack.c.bf16 %v2344_v62, %v2338_v53 }
 0x123   : > { %1916 = vst [vmem:[%s2290_s9 + $0x30] sm:$0xff] %v1784_v2   ;;  %v1224_v8 = vadd.f32 %v2012_v48, %v1223_v3  ;;  %v1359_v9 = vadd.f32 %v1358_v0, %v1296_v4 }
 0x124   : > { %1932 = vst [vmem:[%s2290_s9 + $0xb0] sm:$0xff] %v1864_v5  }
 0x125   : > { %v1360_v12 = vadd.f32 %v1359_v9, %v1297_v7  ;;  %v2016_v13 = vpop.f32.mrb[16].mxu0  ;;  %v1225_v14 = vadd.f32 %v2013_v57, %v1224_v8  ;;  %v2352_v15 = vpop.f32.mrb[16].mxu1 }
 0x126   : > { %v693_v16 = vpop.f32.mrb[17].mxu0  ;;  %v2354_v17 = vpop.f32.mrb[17].mxu1  ;;  %v1301_v36 = vmul.f32 %v2016_v13, %v2016_v13 }
 0x127   : > { %v1226_v18 = vadd.f32 %v1225_v14, %v693_v16  ;;  %v1299_v19 = vmul.f32 %v693_v16, %v693_v16  ;;  %v1361_v20 = vadd.f32 %v1360_v12, %v1298_v11  ;;  %v2017_v21 = vpop.f32.mrb[18].mxu0  ;;  %v2356_v22 = vpop.f32.mrb[18].mxu1 }
 0x128   : > { %v1799_v24 = vpack.c.bf16 %v2017_v21, %v2016_v13  ;;  %v696_v26 = vpop.f32.mrb[19].mxu0  ;;  %v1879_v27 = vpack.c.bf16 %v2356_v22, %v2352_v15  ;;  %v2360_v28 = vpop.f32.mrb[19].mxu1  ;;  %v1302_v39 = vmul.f32 %v2017_v21, %v2017_v21 }
 0x129   : > { %v1362_v29 = vadd.f32 %v1361_v20, %v1299_v19  ;;  %v1794_v31 = vpack.c.bf16 %v696_v26, %v693_v16  ;;  %v1227_v32 = vadd.f32 %v1226_v18, %v696_v26  ;;  %v1300_v33 = vmul.f32 %v696_v26, %v696_v26 }
 0x12a   : > { %1919 = vst [vmem:[%s2290_s9 + $0x48] sm:$0xff] %v1799_v24   ;;  %1935 = vst [vmem:[%s2290_s9 + $0xc8] sm:$0xff] %v1879_v27   ;;  %v1874_v35 = vpack.c.bf16 %v2360_v28, %v2354_v17 }
 0x12b   : > { %1918 = vst [vmem:[%s2290_s9 + $0x40] sm:$0xff] %v1794_v31   ;;  %v1228_v37 = vadd.f32 %v2016_v13, %v1227_v32  ;;  %v1363_v38 = vadd.f32 %v1362_v29, %v1300_v33 }
 0x12c   : > { %1934 = vst [vmem:[%s2290_s9 + $0xc0] sm:$0xff] %v1874_v35  }
 0x12d   : > { %v1364_v40 = vadd.f32 %v1363_v38, %v1301_v36  ;;  %v2020_v41 = vpop.f32.mrb[20].mxu0  ;;  %v1229_v43 = vadd.f32 %v2017_v21, %v1228_v37  ;;  %v2368_v45 = vpop.f32.mrb[20].mxu1 }
 0x12e   : > { %v709_v47 = vpop.f32.mrb[21].mxu0  ;;  %v2370_v48 = vpop.f32.mrb[21].mxu1  ;;  %v1305_v7 = vmul.f32 %v2020_v41, %v2020_v41 }
 0x12f   : > { %v1230_v49 = vadd.f32 %v1229_v43, %v709_v47  ;;  %v1303_v52 = vmul.f32 %v709_v47, %v709_v47  ;;  %v1365_v54 = vadd.f32 %v1364_v40, %v1302_v39  ;;  %v2021_v55 = vpop.f32.mrb[22].mxu0  ;;  %v2372_v56 = vpop.f32.mrb[22].mxu1 }
 0x130   : > { %v1809_v57 = vpack.c.bf16 %v2021_v55, %v2020_v41  ;;  %v712_v59 = vpop.f32.mrb[23].mxu0  ;;  %v1889_v60 = vpack.c.bf16 %v2372_v56, %v2368_v45  ;;  %v2376_v61 = vpop.f32.mrb[23].mxu1  ;;  %v1306_v11 = vmul.f32 %v2021_v55, %v2021_v55 }
 0x131   : > { %v1366_v0 = vadd.f32 %v1365_v54, %v1303_v52  ;;  %v1804_v2 = vpack.c.bf16 %v712_v59, %v709_v47  ;;  %v1231_v3 = vadd.f32 %v1230_v49, %v712_v59  ;;  %v1304_v4 = vmul.f32 %v712_v59, %v712_v59 }
 0x132   : > { %1921 = vst [vmem:[%s2290_s9 + $0x58] sm:$0xff] %v1809_v57   ;;  %1937 = vst [vmem:[%s2290_s9 + $0xd8] sm:$0xff] %v1889_v60   ;;  %v1884_v5 = vpack.c.bf16 %v2376_v61, %v2370_v48 }
 0x133   : > { %1920 = vst [vmem:[%s2290_s9 + $0x50] sm:$0xff] %v1804_v2   ;;  %v1232_v8 = vadd.f32 %v2020_v41, %v1231_v3  ;;  %v1367_v9 = vadd.f32 %v1366_v0, %v1304_v4 }
 0x134   : > { %1936 = vst [vmem:[%s2290_s9 + $0xd0] sm:$0xff] %v1884_v5  }
 0x135   : > { %v1368_v12 = vadd.f32 %v1367_v9, %v1305_v7  ;;  %v2024_v13 = vpop.f32.mrb[24].mxu0  ;;  %v1233_v14 = vadd.f32 %v2021_v55, %v1232_v8  ;;  %v2384_v16 = vpop.f32.mrb[24].mxu1 }
 0x136   : > { %v725_v18 = vpop.f32.mrb[25].mxu0  ;;  %v2386_v19 = vpop.f32.mrb[25].mxu1  ;;  %v1309_v40 = vmul.f32 %v2024_v13, %v2024_v13 }
 0x137   : > { %v1234_v20 = vadd.f32 %v1233_v14, %v725_v18  ;;  %v1307_v21 = vmul.f32 %v725_v18, %v725_v18  ;;  %v1369_v24 = vadd.f32 %v1368_v12, %v1306_v11  ;;  %v2025_v26 = vpop.f32.mrb[26].mxu0  ;;  %v2388_v27 = vpop.f32.mrb[26].mxu1 }
 0x138   : > { %v1819_v29 = vpack.c.bf16 %v2025_v26, %v2024_v13  ;;  %v728_v31 = vpop.f32.mrb[27].mxu0  ;;  %v1899_v32 = vpack.c.bf16 %v2388_v27, %v2384_v16  ;;  %v2392_v33 = vpop.f32.mrb[27].mxu1  ;;  %v1310_v47 = vmul.f32 %v2025_v26, %v2025_v26 }
 0x139   : > { %v1370_v35 = vadd.f32 %v1369_v24, %v1307_v21  ;;  %v1814_v36 = vpack.c.bf16 %v728_v31, %v725_v18  ;;  %v1235_v37 = vadd.f32 %v1234_v20, %v728_v31  ;;  %v1308_v38 = vmul.f32 %v728_v31, %v728_v31 }
 0x13a   : > { %1923 = vst [vmem:[%s2290_s9 + $0x68] sm:$0xff] %v1819_v29   ;;  %1939 = vst [vmem:[%s2290_s9 + $0xe8] sm:$0xff] %v1899_v32   ;;  %v1894_v39 = vpack.c.bf16 %v2392_v33, %v2386_v19  ;;  %v1315_v32 = vmul.f32 %v2283_v44, %v2283_v44 }
 0x13b   : > { %1922 = vst [vmem:[%s2290_s9 + $0x60] sm:$0xff] %v1814_v36   ;;  %v1236_v41 = vadd.f32 %v2024_v13, %v1235_v37  ;;  %v1371_v43 = vadd.f32 %v1370_v35, %v1308_v38 }
 0x13c   : > { %1938 = vst [vmem:[%s2290_s9 + $0xe0] sm:$0xff] %v1894_v39   ;;  %v1316_v39 = vmul.f32 %v2296_v51, %v2296_v51 }
 0x13d   : > { %v1372_v49 = vadd.f32 %v1371_v43, %v1309_v40  ;;  %v2028_v52 = vpop.f32.mrb[28].mxu0  ;;  %v1237_v54 = vadd.f32 %v2025_v26, %v1236_v41  ;;  %v2400_v55 = vpop.f32.mrb[28].mxu1  ;;  %v1317_v40 = vmul.f32 %v2281_v42, %v2281_v42 }
 0x13e   : > { %v741_v57 = vpop.f32.mrb[29].mxu0  ;;  %v2402_v59 = vpop.f32.mrb[29].mxu1  ;;  %v1313_v20 = vmul.f32 %v2028_v52, %v2028_v52 }
 0x13f   : > { %v1238_v60 = vadd.f32 %v1237_v54, %v741_v57  ;;  %v1311_v0 = vmul.f32 %v741_v57, %v741_v57  ;;  %v1373_v2 = vadd.f32 %v1372_v49, %v1310_v47  ;;  %v2029_v3 = vpop.f32.mrb[30].mxu0  ;;  %v2404_v4 = vpop.f32.mrb[30].mxu1  ;;  %v1318_v47 = vmul.f32 %v2292_v46, %v2292_v46 }
 0x140   : > { %v1829_v5 = vpack.c.bf16 %v2029_v3, %v2028_v52  ;;  %v744_v7 = vpop.f32.mrb[31].mxu0  ;;  %v1909_v8 = vpack.c.bf16 %v2404_v4, %v2400_v55  ;;  %v2408_v9 = vpop.f32.mrb[31].mxu1  ;;  %v1314_v26 = vmul.f32 %v2029_v3, %v2029_v3 }
 0x141   : > { %v1374_v11 = vadd.f32 %v1373_v2, %v1311_v0  ;;  %v1824_v12 = vpack.c.bf16 %v744_v7, %v741_v57  ;;  %v1239_v13 = vadd.f32 %v1238_v60, %v744_v7  ;;  %v1312_v14 = vmul.f32 %v744_v7, %v744_v7 }
 0x142   : > { %1925 = vst [vmem:[%s2290_s9 + $0x78] sm:$0xff] %v1829_v5   ;;  %1941 = vst [vmem:[%s2290_s9 + $0xf8] sm:$0xff] %v1909_v8   ;;  %v1904_v18 = vpack.c.bf16 %v2408_v9, %v2402_v59  ;;  %v1320_v0 = vmul.f32 %v2312_v10, %v2312_v10 }
 0x143   : > { %1924 = vst [vmem:[%s2290_s9 + $0x70] sm:$0xff] %v1824_v12   ;;  %v1240_v21 = vadd.f32 %v2028_v52, %v1239_v13  ;;  %v1375_v24 = vadd.f32 %v1374_v11, %v1312_v14  ;;  %v1324_v13 = vmul.f32 %v2328_v34, %v2328_v34 }
 0x144   : > { %1940 = vst [vmem:[%s2290_s9 + $0xf0] sm:$0xff] %v1904_v18  }
 0x145   : > { %v1376_v29 = vadd.f32 %v1375_v24, %v1313_v20  ;;  %v1241_v31 = vadd.f32 %v2029_v3, %v1240_v21 }
 0x147   : > { %v1242_v35 = vadd.f32 %v1241_v31, %v2283_v44  ;;  %v1377_v36 = vadd.f32 %v1376_v29, %v1314_v26  ;;  %v1319_v44 = vmul.f32 %v2306_v1, %v2306_v1  ;;  %v1328_v31 = vmul.f32 %v2344_v62, %v2344_v62 }
 0x149   : > { %v1378_v37 = vadd.f32 %v1377_v36, %v1315_v32  ;;  %v1243_v38 = vadd.f32 %v1242_v35, %v2296_v51 }
 0x14b   : > { %v1244_v41 = vadd.f32 %v2281_v42, %v1243_v38  ;;  %v1379_v43 = vadd.f32 %v1378_v37, %v1316_v39  ;;  %v1321_v42 = vmul.f32 %v2304_v63, %v2304_v63 }
 0x14d   : > { %v1380_v49 = vadd.f32 %v1379_v43, %v1317_v40  ;;  %v1245_v52 = vadd.f32 %v2292_v46, %v1244_v41  ;;  %v1322_v46 = vmul.f32 %v2308_v6, %v2308_v6  ;;  %v1332_v41 = vmul.f32 %v2360_v28, %v2360_v28 }
 0x14f   : > { %v1246_v54 = vadd.f32 %v1245_v52, %v2306_v1  ;;  %v1381_v57 = vadd.f32 %v1380_v49, %v1318_v47  ;;  %v1323_v1 = vmul.f32 %v2322_v25, %v2322_v25 }
 0x151   : > { %v1382_v60 = vadd.f32 %v1381_v57, %v1319_v44  ;;  %v1247_v51 = vadd.f32 %v1246_v54, %v2312_v10 }
 0x153   : > { %v1248_v2 = vadd.f32 %v2304_v63, %v1247_v51  ;;  %v1383_v3 = vadd.f32 %v1382_v60, %v1320_v0  ;;  %v1325_v63 = vmul.f32 %v2320_v23, %v2320_v23  ;;  %v1336_v60 = vmul.f32 %v2376_v61, %v2376_v61 }
 0x155   : > { %v1384_v5 = vadd.f32 %v1383_v3, %v1321_v42  ;;  %v1249_v7 = vadd.f32 %v2308_v6, %v1248_v2  ;;  %v1326_v6 = vmul.f32 %v2324_v30, %v2324_v30 }
 0x157   : > { %v1250_v8 = vadd.f32 %v1249_v7, %v2322_v25  ;;  %v1385_v11 = vadd.f32 %v1384_v5, %v1322_v46  ;;  %v1327_v25 = vmul.f32 %v2338_v53, %v2338_v53  ;;  %v1340_v7 = vmul.f32 %v2392_v33, %v2392_v33 }
 0x159   : > { %v1386_v12 = vadd.f32 %v1385_v11, %v1323_v1  ;;  %v1251_v10 = vadd.f32 %v1250_v8, %v2328_v34 }
 0x15b   : > { %v1252_v14 = vadd.f32 %v2320_v23, %v1251_v10  ;;  %v1387_v18 = vadd.f32 %v1386_v12, %v1324_v13  ;;  %v1329_v23 = vmul.f32 %v2336_v50, %v2336_v50 }
 0x15d   : > { %v1388_v20 = vadd.f32 %v1387_v18, %v1325_v63  ;;  %v1253_v21 = vadd.f32 %v2324_v30, %v1252_v14  ;;  %v1330_v30 = vmul.f32 %v2340_v58, %v2340_v58  ;;  %v1344_v14 = vmul.f32 %v2408_v9, %v2408_v9 }
 0x15f   : > { %v1254_v24 = vadd.f32 %v1253_v21, %v2338_v53  ;;  %v1389_v26 = vadd.f32 %v1388_v20, %v1326_v6  ;;  %v1331_v53 = vmul.f32 %v2354_v17, %v2354_v17 }
 0x161   : > { %v1390_v29 = vadd.f32 %v1389_v26, %v1327_v25  ;;  %v1255_v34 = vadd.f32 %v1254_v24, %v2344_v62 }
 0x163   : > { %v1256_v32 = vadd.f32 %v2336_v50, %v1255_v34  ;;  %v1391_v35 = vadd.f32 %v1390_v29, %v1328_v31  ;;  %v1333_v50 = vmul.f32 %v2352_v15, %v2352_v15 }
 0x165   : > { %v1392_v36 = vadd.f32 %v1391_v35, %v1329_v23  ;;  %v1257_v37 = vadd.f32 %v2340_v58, %v1256_v32  ;;  %v1334_v58 = vmul.f32 %v2356_v22, %v2356_v22  ;;  %v1210_v32 = vld [vmem:[%s2271_s29] sm:$0x1] }
 0x167   : > { %v1258_v38 = vadd.f32 %v1257_v37, %v2354_v17  ;;  %v1393_v39 = vadd.f32 %v1392_v36, %v1330_v30  ;;  %v1335_v17 = vmul.f32 %v2370_v48, %v2370_v48  ;;  %v1282_v36 = vld [vmem:[%s2277_s6] sm:$0x1] }
 0x169   : > { %v1394_v40 = vadd.f32 %v1393_v39, %v1331_v53  ;;  %v1259_v62 = vadd.f32 %v1258_v38, %v2360_v28 }
 0x16b   : > { %v1260_v43 = vadd.f32 %v2352_v15, %v1259_v62  ;;  %v1395_v47 = vadd.f32 %v1394_v40, %v1332_v41  ;;  %v1337_v15 = vmul.f32 %v2368_v45, %v2368_v45 }
 0x16d   : > { %v1396_v49 = vadd.f32 %v1395_v47, %v1333_v50  ;;  %v1261_v52 = vadd.f32 %v2356_v22, %v1260_v43  ;;  %v1338_v22 = vmul.f32 %v2372_v56, %v2372_v56 }
 0x16f   : > { %v1262_v44 = vadd.f32 %v1261_v52, %v2370_v48  ;;  %v1397_v54 = vadd.f32 %v1396_v49, %v1334_v58  ;;  %v1339_v48 = vmul.f32 %v2386_v19, %v2386_v19 }
 0x171   : > { %v1398_v57 = vadd.f32 %v1397_v54, %v1335_v17  ;;  %v1263_v28 = vadd.f32 %v1262_v44, %v2376_v61 }
 0x173   : > { %v1264_v51 = vadd.f32 %v2368_v45, %v1263_v28  ;;  %v1399_v0 = vadd.f32 %v1398_v57, %v1336_v60  ;;  %v1341_v45 = vmul.f32 %v2384_v16, %v2384_v16 }
 0x175   : > { %v1400_v42 = vadd.f32 %v1399_v0, %v1337_v15  ;;  %v1265_v2 = vadd.f32 %v2372_v56, %v1264_v51  ;;  %v1342_v56 = vmul.f32 %v2388_v27, %v2388_v27 }
 0x177   : > { %v1266_v3 = vadd.f32 %v1265_v2, %v2386_v19  ;;  %v1401_v46 = vadd.f32 %v1400_v42, %v1338_v22  ;;  %v1343_v19 = vmul.f32 %v2402_v59, %v2402_v59 }
 0x179   : > { %v1402_v5 = vadd.f32 %v1401_v46, %v1339_v48  ;;  %v1267_v61 = vadd.f32 %v1266_v3, %v2392_v33 }
 0x17b   : > { %v1268_v1 = vadd.f32 %v2384_v16, %v1267_v61  ;;  %v1403_v8 = vadd.f32 %v1402_v5, %v1340_v7  ;;  %v1345_v16 = vmul.f32 %v2400_v55, %v2400_v55 }
 0x17d   : > { %v1404_v11 = vadd.f32 %v1403_v8, %v1341_v45  ;;  %v1269_v12 = vadd.f32 %v2388_v27, %v1268_v1  ;;  %v1346_v27 = vmul.f32 %v2404_v4, %v2404_v4 }
 0x17f   : > { %v1270_v10 = vadd.f32 %v1269_v12, %v2402_v59  ;;  %v1405_v13 = vadd.f32 %v1404_v11, %v1342_v56 }
 0x181   : > { %v1406_v63 = vadd.f32 %v1405_v13, %v1343_v19  ;;  %v1271_v33 = vadd.f32 %v1270_v10, %v2408_v9 }
 0x183   : > { %v1272_v18 = vadd.f32 %v2400_v55, %v1271_v33  ;;  %v1407_v6 = vadd.f32 %v1406_v63, %v1344_v14 }
 0x185   : > { %v1273_v59 = vadd.f32 %v2404_v4, %v1272_v18  ;;  %v1408_v20 = vadd.f32 %v1407_v6, %v1345_v16 }
 0x187   : > { %v1274_v21 = vrot.slane %v1273_v59, 4  ;;  %v1409_v25 = vadd.f32 %v1408_v20, %v1346_v27 }
 0x189   : > { %v1275_v24 = vadd.f32 %v1274_v21, %v1273_v59  ;;  %v1410_v9 = vrot.slane %v1409_v25, 4 }
 0x18b   : > { %v1276_v26 = vrot.slane %v1275_v24, 2  ;;  %v1411_v29 = vadd.f32 %v1410_v9, %v1409_v25 }
 0x18d   : > { %v1277_v34 = vadd.f32 %v1276_v26, %v1275_v24  ;;  %v1412_v31 = vrot.slane %v1411_v29, 2 }
 0x18f   : > { %v1278_v23 = vrot.slane %v1277_v34, 1  ;;  %v1413_v55 = vadd.f32 %v1412_v31, %v1411_v29 }
 0x191   : > { %v1279_v35 = vadd.f32 %v1278_v23, %v1277_v34  ;;  %v1414_v30 = vrot.slane %v1413_v55, 1 }
 0x193   : > { %v1280_v37 = vadd.f32 %v1279_v35, %v1210_v32  ;;  %v1415_v53 = vadd.f32 %v1414_v30, %v1413_v55 }
 0x195   : > { %1281 = vst [vmem:[%s2271_s29] sm:$0x1] %v1280_v37  ;;  %v1416_v4 = vadd.f32 %v1415_v53, %v1282_v36 }
 0x197   : > { %1417 = vst [vmem:[%s2277_s6] sm:$0x1] %v1416_v4 }
 0x198 PF: > { %s15_s17 = sadd.s32 1, %s2165_s17   ;;  %s2530_s15 = smov %s2161_s16 }
 0x199   : > { %p12_p5 = scmp.ge.s32.totalorder %s15_s17, 6   ;;  %s2531_s16 = smov %s2533_s18 }
 0x19b   :  { %14 = sbr.rel (!%p12_p5) target bundleno = 2 (0x2), region = 89 }

// kernel: generator_forward.16
= control target key start
LH: loop header
LB: loop body
LE: loop exit
PB: predicated region body
PF: predicated region fallthrough
CT: control target
= control target key end

     0   :  { %s1411_s12 = smov 0   ;;  %s1641_s0 = inlined_call_operand.vmem [shape: bf16[2048,128], index: 0, kind: input, shape index: {}]   ;;  %s1642_s1 = inlined_call_operand.vmem [shape: f32[1,128], index: 1, kind: input, shape index: {}]   ;;  %s1643_s2 = inlined_call_operand.vmem [shape: f32[1,128], index: 2, kind: input, shape index: {}]   ;;  %s1644_s3 = inlined_call_operand.vmem [shape: bf16[2048,128], index: 3, kind: output, shape index: {}]  }
   0x1 LB: > { %s884_s13 = sadd.s32 4294967295, %s1389_s12   ;;  %p888_p0 = scmp.ge.s32.totalorder %s1389_s12, 1  ;;  %s1389_s12 = sphi %s1411_s12, %s13_s12  }
   0x2   : > { %p138_p1 = scmp.lt.s32.totalorder %s1389_s12, 5 }
   0x4   : > { %p139_p2 = pnand %p888_p0, %p138_p1 }
   0x5   : > { %s889_s14 = sshll.u32 (!%p139_p2), %s884_s13, 6  ;;  %v1432_v0 = vld [vmem:[%s1642_s1] ss:$0 sm:$0xff] (!%p139_p2) }
   0x6   : > { %142 = sbr.rel (%p139_p2) target bundleno = 95 (0x5f), region = 32  ;;  %p163_p3 = scmp.lt.s32.totalorder (!%p139_p2), %s889_s14, 255  ;;  %v1441_v9 = vld [vmem:[%s1643_s2] ss:$0 sm:$0xff] (!%p139_p2) }
   0xd   : > { %s1646_s14 = smov (!%p163_p3, %s889_s14), 255 }
   0xe   : > { %s890_s15 = sshll.u32 %s1646_s14, 2 }
   0xf   : > { %s1427_s18 = scalar_lea.vmem %s1641_s0, %s890_s15  ;;  %s1466_s25 = scalar_lea.vmem %s1644_s3, %s890_s15 }
  0x10   : > { %v1026_v1 = vld [vmem:[%s1427_s18] sm:$0xff]   ;;  %v1313_v2 = vld [vmem:[%s1427_s18 + $0x8] sm:$0xff]   ;;  %v1314_v3 = vld [vmem:[%s1427_s18 + $0x10] sm:$0xff]  }
  0x11   : > { %v1027_v4 = vunpack.c.l.bf16 %v1026_v1  ;;  %v1028_v5 = vunpack.c.h.bf16 %v1026_v1  ;;  %v1031_v6 = vunpack.c.l.bf16 %v1313_v2  ;;  %v1032_v7 = vunpack.c.h.bf16 %v1313_v2  ;;  %v1315_v8 = vld [vmem:[%s1427_s18 + $0x18] sm:$0xff]   ;;  %v1316_v30 = vld [vmem:[%s1427_s18 + $0x20] sm:$0xff]   ;;  %v1317_v35 = vld [vmem:[%s1427_s18 + $0x28] sm:$0xff]  }
  0x12   : > { %v1035_v10 = vunpack.c.l.bf16 %v1314_v3  ;;  %v1036_v11 = vunpack.c.h.bf16 %v1314_v3  ;;  %v1039_v12 = vunpack.c.l.bf16 %v1315_v8  ;;  %v1040_v13 = vunpack.c.h.bf16 %v1315_v8  ;;  %v1318_v40 = vld [vmem:[%s1427_s18 + $0x30] sm:$0xff]   ;;  %v1319_v45 = vld [vmem:[%s1427_s18 + $0x38] sm:$0xff]   ;;  %v1320_v3 = vld [vmem:[%s1427_s18 + $0x40] sm:$0xff]  }
  0x13   : > { %v309_v14 = vmul.f32 %v1027_v4, %v1432_v0  ;;  %v310_v15 = vmul.f32 %v1028_v5, %v1432_v0  ;;  %v311_v16 = vmul.f32 %v1031_v6, %v1432_v0  ;;  %v312_v17 = vmul.f32 %v1032_v7, %v1432_v0 }
  0x14   : > { %v313_v18 = vmul.f32 %v1035_v10, %v1432_v0  ;;  %v314_v19 = vmul.f32 %v1036_v11, %v1432_v0  ;;  %v315_v20 = vmul.f32 %v1039_v12, %v1432_v0  ;;  %v316_v21 = vmul.f32 %v1040_v13, %v1432_v0  ;;  %v1321_v13 = vld [vmem:[%s1427_s18 + $0x48] sm:$0xff]  }
  0x15   : > { %v380_v22 = vadd.f32 %v1441_v9, %v309_v14  ;;  %v381_v23 = vadd.f32 %v1441_v9, %v310_v15  ;;  %v382_v24 = vadd.f32 %v1441_v9, %v311_v16  ;;  %v383_v25 = vadd.f32 %v1441_v9, %v312_v17 }
  0x16   : > { %v384_v26 = vadd.f32 %v1441_v9, %v313_v18  ;;  %v385_v27 = vadd.f32 %v1441_v9, %v314_v19  ;;  %v386_v28 = vadd.f32 %v1441_v9, %v315_v20  ;;  %v387_v29 = vadd.f32 %v1441_v9, %v316_v21  ;;  %v1322_v18 = vld [vmem:[%s1427_s18 + $0x50] sm:$0xff]  }
  0x17   : > { %v444_v31 = vmax.f32 %v380_v22, 0.0  ;;  %v445_v32 = vmax.f32 %v381_v23, 0.0  ;;  %v446_v33 = vmax.f32 %v382_v24, 0.0  ;;  %v447_v34 = vmax.f32 %v383_v25, 0.0  ;;  %v1323_v23 = vld [vmem:[%s1427_s18 + $0x58] sm:$0xff]  }
  0x18   : > { %v448_v36 = vmax.f32 %v384_v26, 0.0  ;;  %v449_v37 = vmax.f32 %v385_v27, 0.0  ;;  %v450_v38 = vmax.f32 %v386_v28, 0.0  ;;  %v451_v39 = vmax.f32 %v387_v29, 0.0 }
  0x19   : > { %v1156_v41 = vpack.c.bf16 %v445_v32, %v444_v31  ;;  %v1161_v42 = vpack.c.bf16 %v447_v34, %v446_v33  ;;  %v1043_v43 = vunpack.c.l.bf16 %v1316_v30  ;;  %v1044_v44 = vunpack.c.h.bf16 %v1316_v30 }
  0x1a   : > { %v1166_v46 = vpack.c.bf16 %v449_v37, %v448_v36  ;;  %v1171_v47 = vpack.c.bf16 %v451_v39, %v450_v38  ;;  %v1047_v48 = vunpack.c.l.bf16 %v1317_v35  ;;  %v1048_v49 = vunpack.c.h.bf16 %v1317_v35 }
  0x1b   : > { %1157 = vst [vmem:[%s1466_s25] sm:$0xff] %v1156_v41   ;;  %1344 = vst [vmem:[%s1466_s25 + $0x8] sm:$0xff] %v1161_v42   ;;  %v317_v50 = vmul.f32 %v1043_v43, %v1432_v0  ;;  %v318_v51 = vmul.f32 %v1044_v44, %v1432_v0  ;;  %v1051_v52 = vunpack.c.l.bf16 %v1318_v40  ;;  %v1052_v53 = vunpack.c.h.bf16 %v1318_v40  ;;  %v1324_v40 = vld [vmem:[%s1427_s18 + $0x60] sm:$0xff]  }
  0x1c   : > { %1345 = vst [vmem:[%s1466_s25 + $0x10] sm:$0xff] %v1166_v46   ;;  %1346 = vst [vmem:[%s1466_s25 + $0x18] sm:$0xff] %v1171_v47   ;;  %v319_v54 = vmul.f32 %v1047_v48, %v1432_v0  ;;  %v320_v55 = vmul.f32 %v1048_v49, %v1432_v0  ;;  %v1055_v56 = vunpack.c.l.bf16 %v1319_v45  ;;  %v1056_v57 = vunpack.c.h.bf16 %v1319_v45 }
  0x1d   : > { %v388_v58 = vadd.f32 %v1441_v9, %v317_v50  ;;  %v389_v59 = vadd.f32 %v1441_v9, %v318_v51  ;;  %v321_v60 = vmul.f32 %v1051_v52, %v1432_v0  ;;  %v322_v61 = vmul.f32 %v1052_v53, %v1432_v0  ;;  %v1325_v53 = vld [vmem:[%s1427_s18 + $0x68] sm:$0xff]  }
  0x1e   : > { %v390_v62 = vadd.f32 %v1441_v9, %v319_v54  ;;  %v391_v63 = vadd.f32 %v1441_v9, %v320_v55  ;;  %v323_v1 = vmul.f32 %v1055_v56, %v1432_v0  ;;  %v324_v2 = vmul.f32 %v1056_v57, %v1432_v0 }
  0x1f   : > { %v452_v4 = vmax.f32 %v388_v58, 0.0  ;;  %v453_v5 = vmax.f32 %v389_v59, 0.0  ;;  %v392_v6 = vadd.f32 %v1441_v9, %v321_v60  ;;  %v393_v7 = vadd.f32 %v1441_v9, %v322_v61  ;;  %v1326_v58 = vld [vmem:[%s1427_s18 + $0x70] sm:$0xff]  }
  0x20   : > { %v454_v8 = vmax.f32 %v390_v62, 0.0  ;;  %v455_v10 = vmax.f32 %v391_v63, 0.0  ;;  %v394_v11 = vadd.f32 %v1441_v9, %v323_v1  ;;  %v395_v12 = vadd.f32 %v1441_v9, %v324_v2  ;;  %v1327_v63 = vld [vmem:[%s1427_s18 + $0x78] sm:$0xff]  }
  0x21   : > { %v1176_v14 = vpack.c.bf16 %v453_v5, %v452_v4  ;;  %v456_v15 = vmax.f32 %v392_v6, 0.0  ;;  %v457_v16 = vmax.f32 %v393_v7, 0.0  ;;  %v1059_v17 = vunpack.c.l.bf16 %v1320_v3 }
  0x22   : > { %v1181_v19 = vpack.c.bf16 %v455_v10, %v454_v8  ;;  %v458_v20 = vmax.f32 %v394_v11, 0.0  ;;  %v459_v21 = vmax.f32 %v395_v12, 0.0  ;;  %v1060_v22 = vunpack.c.h.bf16 %v1320_v3 }
  0x23   : > { %1347 = vst [vmem:[%s1466_s25 + $0x20] sm:$0xff] %v1176_v14   ;;  %v1186_v24 = vpack.c.bf16 %v457_v16, %v456_v15  ;;  %v325_v25 = vmul.f32 %v1059_v17, %v1432_v0  ;;  %v1063_v26 = vunpack.c.l.bf16 %v1321_v13  ;;  %v1064_v27 = vunpack.c.h.bf16 %v1321_v13  ;;  %v1328_v14 = vld [vmem:[%s1427_s18 + $0x80] sm:$0xff]  }
  0x24   : > { %1348 = vst [vmem:[%s1466_s25 + $0x28] sm:$0xff] %v1181_v19   ;;  %v1191_v28 = vpack.c.bf16 %v459_v21, %v458_v20  ;;  %v326_v29 = vmul.f32 %v1060_v22, %v1432_v0  ;;  %v1067_v30 = vunpack.c.l.bf16 %v1322_v18  ;;  %v1068_v31 = vunpack.c.h.bf16 %v1322_v18 }
  0x25   : > { %1349 = vst [vmem:[%s1466_s25 + $0x30] sm:$0xff] %v1186_v24   ;;  %v396_v32 = vadd.f32 %v1441_v9, %v325_v25  ;;  %v327_v33 = vmul.f32 %v1063_v26, %v1432_v0  ;;  %v328_v34 = vmul.f32 %v1064_v27, %v1432_v0  ;;  %v1071_v35 = vunpack.c.l.bf16 %v1323_v23 }
  0x26   : > { %1350 = vst [vmem:[%s1466_s25 + $0x38] sm:$0xff] %v1191_v28   ;;  %v397_v36 = vadd.f32 %v1441_v9, %v326_v29  ;;  %v329_v37 = vmul.f32 %v1067_v30, %v1432_v0  ;;  %v330_v38 = vmul.f32 %v1068_v31, %v1432_v0  ;;  %v1072_v39 = vunpack.c.h.bf16 %v1323_v23  ;;  %v1329_v31 = vld [vmem:[%s1427_s18 + $0x88] sm:$0xff]  }
  0x27   : > { %v460_v41 = vmax.f32 %v396_v32, 0.0  ;;  %v398_v42 = vadd.f32 %v1441_v9, %v327_v33  ;;  %v399_v43 = vadd.f32 %v1441_v9, %v328_v34  ;;  %v331_v44 = vmul.f32 %v1071_v35, %v1432_v0 }
  0x28   : > { %v461_v45 = vmax.f32 %v397_v36, 0.0  ;;  %v400_v46 = vadd.f32 %v1441_v9, %v329_v37  ;;  %v401_v47 = vadd.f32 %v1441_v9, %v330_v38  ;;  %v332_v48 = vmul.f32 %v1072_v39, %v1432_v0  ;;  %v1330_v36 = vld [vmem:[%s1427_s18 + $0x90] sm:$0xff]  }
  0x29   : > { %v462_v49 = vmax.f32 %v398_v42, 0.0  ;;  %v463_v50 = vmax.f32 %v399_v43, 0.0  ;;  %v402_v51 = vadd.f32 %v1441_v9, %v331_v44  ;;  %v1075_v52 = vunpack.c.l.bf16 %v1324_v40 }
  0x2a   : > { %v1196_v54 = vpack.c.bf16 %v461_v45, %v460_v41  ;;  %v464_v55 = vmax.f32 %v400_v46, 0.0  ;;  %v465_v56 = vmax.f32 %v401_v47, 0.0  ;;  %v403_v57 = vadd.f32 %v1441_v9, %v332_v48  ;;  %v1331_v41 = vld [vmem:[%s1427_s18 + $0x98] sm:$0xff]  }
  0x2b   : > { %v1201_v59 = vpack.c.bf16 %v463_v50, %v462_v49  ;;  %v466_v60 = vmax.f32 %v402_v51, 0.0  ;;  %v1076_v61 = vunpack.c.h.bf16 %v1324_v40  ;;  %v333_v62 = vmul.f32 %v1075_v52, %v1432_v0 }
  0x2c   : > { %1351 = vst [vmem:[%s1466_s25 + $0x40] sm:$0xff] %v1196_v54   ;;  %v1206_v1 = vpack.c.bf16 %v465_v56, %v464_v55  ;;  %v467_v2 = vmax.f32 %v403_v57, 0.0  ;;  %v1079_v3 = vunpack.c.l.bf16 %v1325_v53  ;;  %v1080_v4 = vunpack.c.h.bf16 %v1325_v53  ;;  %v1332_v54 = vld [vmem:[%s1427_s18 + $0xa0] sm:$0xff]  }
  0x2d   : > { %1352 = vst [vmem:[%s1466_s25 + $0x48] sm:$0xff] %v1201_v59   ;;  %v334_v5 = vmul.f32 %v1076_v61, %v1432_v0  ;;  %v404_v6 = vadd.f32 %v1441_v9, %v333_v62  ;;  %v1083_v7 = vunpack.c.l.bf16 %v1326_v58  ;;  %v1084_v8 = vunpack.c.h.bf16 %v1326_v58 }
  0x2e   : > { %1353 = vst [vmem:[%s1466_s25 + $0x50] sm:$0xff] %v1206_v1   ;;  %v1211_v10 = vpack.c.bf16 %v467_v2, %v466_v60  ;;  %v335_v11 = vmul.f32 %v1079_v3, %v1432_v0  ;;  %v336_v12 = vmul.f32 %v1080_v4, %v1432_v0  ;;  %v1087_v13 = vunpack.c.l.bf16 %v1327_v63  ;;  %v1333_v4 = vld [vmem:[%s1427_s18 + $0xa8] sm:$0xff]  }
  0x2f   : > { %v405_v15 = vadd.f32 %v1441_v9, %v334_v5  ;;  %v468_v16 = vmax.f32 %v404_v6, 0.0  ;;  %v337_v17 = vmul.f32 %v1083_v7, %v1432_v0  ;;  %v338_v18 = vmul.f32 %v1084_v8, %v1432_v0 }
  0x30   : > { %1354 = vst [vmem:[%s1466_s25 + $0x58] sm:$0xff] %v1211_v10   ;;  %v406_v19 = vadd.f32 %v1441_v9, %v335_v11  ;;  %v407_v20 = vadd.f32 %v1441_v9, %v336_v12  ;;  %v1088_v21 = vunpack.c.h.bf16 %v1327_v63  ;;  %v339_v22 = vmul.f32 %v1087_v13, %v1432_v0 }
  0x31   : > { %v469_v23 = vmax.f32 %v405_v15, 0.0  ;;  %v408_v24 = vadd.f32 %v1441_v9, %v337_v17  ;;  %v409_v25 = vadd.f32 %v1441_v9, %v338_v18  ;;  %v1091_v26 = vunpack.c.l.bf16 %v1328_v14 }
  0x32   : > { %v470_v27 = vmax.f32 %v406_v19, 0.0  ;;  %v471_v28 = vmax.f32 %v407_v20, 0.0  ;;  %v340_v29 = vmul.f32 %v1088_v21, %v1432_v0  ;;  %v410_v30 = vadd.f32 %v1441_v9, %v339_v22  ;;  %v1335_v19 = vld [vmem:[%s1427_s18 + $0xb8] sm:$0xff]  }
  0x33   : > { %v1216_v32 = vpack.c.bf16 %v469_v23, %v468_v16  ;;  %v472_v33 = vmax.f32 %v408_v24, 0.0  ;;  %v473_v34 = vmax.f32 %v409_v25, 0.0  ;;  %v1092_v35 = vunpack.c.h.bf16 %v1328_v14  ;;  %v1334_v14 = vld [vmem:[%s1427_s18 + $0xb0] sm:$0xff]  }
  0x34   : > { %v1221_v37 = vpack.c.bf16 %v471_v28, %v470_v27  ;;  %v411_v38 = vadd.f32 %v1441_v9, %v340_v29  ;;  %v474_v39 = vmax.f32 %v410_v30, 0.0  ;;  %v341_v40 = vmul.f32 %v1091_v26, %v1432_v0 }
  0x35   : > { %1355 = vst [vmem:[%s1466_s25 + $0x60] sm:$0xff] %v1216_v32   ;;  %v1226_v42 = vpack.c.bf16 %v473_v34, %v472_v33  ;;  %v342_v43 = vmul.f32 %v1092_v35, %v1432_v0  ;;  %v1095_v44 = vunpack.c.l.bf16 %v1329_v31  ;;  %v1096_v45 = vunpack.c.h.bf16 %v1329_v31  ;;  %v1336_v32 = vld [vmem:[%s1427_s18 + $0xc0] sm:$0xff]  }
  0x36   : > { %1356 = vst [vmem:[%s1466_s25 + $0x68] sm:$0xff] %v1221_v37   ;;  %v475_v46 = vmax.f32 %v411_v38, 0.0  ;;  %v412_v47 = vadd.f32 %v1441_v9, %v341_v40  ;;  %v1099_v48 = vunpack.c.l.bf16 %v1330_v36  ;;  %v1100_v49 = vunpack.c.h.bf16 %v1330_v36 }
  0x37   : > { %1357 = vst [vmem:[%s1466_s25 + $0x70] sm:$0xff] %v1226_v42   ;;  %v413_v50 = vadd.f32 %v1441_v9, %v342_v43  ;;  %v343_v51 = vmul.f32 %v1095_v44, %v1432_v0  ;;  %v344_v52 = vmul.f32 %v1096_v45, %v1432_v0  ;;  %v1103_v53 = vunpack.c.l.bf16 %v1331_v41  ;;  %v1337_v45 = vld [vmem:[%s1427_s18 + $0xc8] sm:$0xff]  }
  0x38   : > { %v1231_v55 = vpack.c.bf16 %v475_v46, %v474_v39  ;;  %v476_v56 = vmax.f32 %v412_v47, 0.0  ;;  %v345_v57 = vmul.f32 %v1099_v48, %v1432_v0  ;;  %v346_v58 = vmul.f32 %v1100_v49, %v1432_v0 }
  0x39   : > { %v477_v59 = vmax.f32 %v413_v50, 0.0  ;;  %v414_v60 = vadd.f32 %v1441_v9, %v343_v51  ;;  %v415_v61 = vadd.f32 %v1441_v9, %v344_v52  ;;  %v1104_v62 = vunpack.c.h.bf16 %v1331_v41 }
  0x3a   : > { %1358 = vst [vmem:[%s1466_s25 + $0x78] sm:$0xff] %v1231_v55   ;;  %v416_v63 = vadd.f32 %v1441_v9, %v345_v57  ;;  %v417_v1 = vadd.f32 %v1441_v9, %v346_v58  ;;  %v347_v2 = vmul.f32 %v1103_v53, %v1432_v0  ;;  %v1107_v3 = vunpack.c.l.bf16 %v1332_v54 }
  0x3b   : > { %v1236_v5 = vpack.c.bf16 %v477_v59, %v476_v56  ;;  %v478_v6 = vmax.f32 %v414_v60, 0.0  ;;  %v479_v7 = vmax.f32 %v415_v61, 0.0  ;;  %v348_v8 = vmul.f32 %v1104_v62, %v1432_v0 }
  0x3c   : > { %v480_v10 = vmax.f32 %v416_v63, 0.0  ;;  %v481_v11 = vmax.f32 %v417_v1, 0.0  ;;  %v418_v12 = vadd.f32 %v1441_v9, %v347_v2  ;;  %v1108_v13 = vunpack.c.h.bf16 %v1332_v54  ;;  %v1338_v54 = vld [vmem:[%s1427_s18 + $0xd0] sm:$0xff]   ;;  %v1339_v63 = vld [vmem:[%s1427_s18 + $0xd8] sm:$0xff]  }
  0x3d   : > { %1359 = vst [vmem:[%s1466_s25 + $0x80] sm:$0xff] %v1236_v5   ;;  %v1241_v15 = vpack.c.bf16 %v479_v7, %v478_v6  ;;  %v419_v16 = vadd.f32 %v1441_v9, %v348_v8  ;;  %v349_v17 = vmul.f32 %v1107_v3, %v1432_v0  ;;  %v1111_v18 = vunpack.c.l.bf16 %v1333_v4 }
  0x3e   : > { %v1246_v20 = vpack.c.bf16 %v481_v11, %v480_v10  ;;  %v482_v21 = vmax.f32 %v418_v12, 0.0  ;;  %v350_v22 = vmul.f32 %v1108_v13, %v1432_v0  ;;  %v1112_v23 = vunpack.c.h.bf16 %v1333_v4  ;;  %v1340_v10 = vld [vmem:[%s1427_s18 + $0xe0] sm:$0xff]  }
  0x3f   : > { %1360 = vst [vmem:[%s1466_s25 + $0x88] sm:$0xff] %v1241_v15   ;;  %v483_v24 = vmax.f32 %v419_v16, 0.0  ;;  %v420_v25 = vadd.f32 %v1441_v9, %v349_v17  ;;  %v351_v26 = vmul.f32 %v1111_v18, %v1432_v0  ;;  %v1115_v27 = vunpack.c.l.bf16 %v1334_v14 }
  0x40   : > { %1361 = vst [vmem:[%s1466_s25 + $0x90] sm:$0xff] %v1246_v20   ;;  %v421_v28 = vadd.f32 %v1441_v9, %v350_v22  ;;  %v352_v29 = vmul.f32 %v1112_v23, %v1432_v0  ;;  %v1116_v30 = vunpack.c.h.bf16 %v1334_v14  ;;  %v1119_v31 = vunpack.c.l.bf16 %v1335_v19  ;;  %v1341_v23 = vld [vmem:[%s1427_s18 + $0xe8] sm:$0xff]  }
  0x41   : > { %v1251_v33 = vpack.c.bf16 %v483_v24, %v482_v21  ;;  %v484_v34 = vmax.f32 %v420_v25, 0.0  ;;  %v422_v35 = vadd.f32 %v1441_v9, %v351_v26  ;;  %v353_v36 = vmul.f32 %v1115_v27, %v1432_v0 }
  0x42   : > { %v485_v37 = vmax.f32 %v421_v28, 0.0  ;;  %v423_v38 = vadd.f32 %v1441_v9, %v352_v29  ;;  %v354_v39 = vmul.f32 %v1116_v30, %v1432_v0  ;;  %v1120_v40 = vunpack.c.h.bf16 %v1335_v19 }
  0x43   : > { %1362 = vst [vmem:[%s1466_s25 + $0x98] sm:$0xff] %v1251_v33   ;;  %v486_v41 = vmax.f32 %v422_v35, 0.0  ;;  %v424_v42 = vadd.f32 %v1441_v9, %v353_v36  ;;  %v355_v43 = vmul.f32 %v1119_v31, %v1432_v0  ;;  %v1123_v44 = vunpack.c.l.bf16 %v1336_v32 }
  0x44   : > { %v1256_v46 = vpack.c.bf16 %v485_v37, %v484_v34  ;;  %v487_v47 = vmax.f32 %v423_v38, 0.0  ;;  %v425_v48 = vadd.f32 %v1441_v9, %v354_v39  ;;  %v356_v49 = vmul.f32 %v1120_v40, %v1432_v0 }
  0x45   : > { %v488_v50 = vmax.f32 %v424_v42, 0.0  ;;  %v426_v51 = vadd.f32 %v1441_v9, %v355_v43  ;;  %v1124_v52 = vunpack.c.h.bf16 %v1336_v32  ;;  %v357_v53 = vmul.f32 %v1123_v44, %v1432_v0  ;;  %v1342_v32 = vld [vmem:[%s1427_s18 + $0xf0] sm:$0xff]  }
  0x46   : > { %1363 = vst [vmem:[%s1466_s25 + $0xa0] sm:$0xff] %v1256_v46   ;;  %v1261_v55 = vpack.c.bf16 %v487_v47, %v486_v41  ;;  %v489_v56 = vmax.f32 %v425_v48, 0.0  ;;  %v427_v57 = vadd.f32 %v1441_v9, %v356_v49  ;;  %v1127_v58 = vunpack.c.l.bf16 %v1337_v45  ;;  %v1343_v41 = vld [vmem:[%s1427_s18 + $0xf8] sm:$0xff]  }
  0x47   : > { %v490_v59 = vmax.f32 %v426_v51, 0.0  ;;  %v358_v60 = vmul.f32 %v1124_v52, %v1432_v0  ;;  %v428_v61 = vadd.f32 %v1441_v9, %v357_v53  ;;  %v1128_v62 = vunpack.c.h.bf16 %v1337_v45 }
  0x48   : > { %1364 = vst [vmem:[%s1466_s25 + $0xa8] sm:$0xff] %v1261_v55   ;;  %v1266_v1 = vpack.c.bf16 %v489_v56, %v488_v50  ;;  %v491_v2 = vmax.f32 %v427_v57, 0.0  ;;  %v359_v3 = vmul.f32 %v1127_v58, %v1432_v0  ;;  %v1131_v4 = vunpack.c.l.bf16 %v1338_v54 }
  0x49   : > { %v429_v5 = vadd.f32 %v1441_v9, %v358_v60  ;;  %v492_v6 = vmax.f32 %v428_v61, 0.0  ;;  %v360_v7 = vmul.f32 %v1128_v62, %v1432_v0  ;;  %v1132_v8 = vunpack.c.h.bf16 %v1338_v54 }
  0x4a   : > { %1365 = vst [vmem:[%s1466_s25 + $0xb0] sm:$0xff] %v1266_v1   ;;  %v1271_v11 = vpack.c.bf16 %v491_v2, %v490_v59  ;;  %v430_v12 = vadd.f32 %v1441_v9, %v359_v3  ;;  %v361_v13 = vmul.f32 %v1131_v4, %v1432_v0  ;;  %v1135_v14 = vunpack.c.l.bf16 %v1339_v63 }
  0x4b   : > { %v493_v15 = vmax.f32 %v429_v5, 0.0  ;;  %v431_v16 = vadd.f32 %v1441_v9, %v360_v7  ;;  %v362_v17 = vmul.f32 %v1132_v8, %v1432_v0  ;;  %v1136_v18 = vunpack.c.h.bf16 %v1339_v63 }
  0x4c   : > { %1366 = vst [vmem:[%s1466_s25 + $0xb8] sm:$0xff] %v1271_v11   ;;  %v494_v19 = vmax.f32 %v430_v12, 0.0  ;;  %v432_v20 = vadd.f32 %v1441_v9, %v361_v13  ;;  %v363_v21 = vmul.f32 %v1135_v14, %v1432_v0  ;;  %v1139_v22 = vunpack.c.l.bf16 %v1340_v10 }
  0x4d   : > { %v1276_v24 = vpack.c.bf16 %v493_v15, %v492_v6  ;;  %v495_v25 = vmax.f32 %v431_v16, 0.0  ;;  %v433_v26 = vadd.f32 %v1441_v9, %v362_v17  ;;  %v364_v27 = vmul.f32 %v1136_v18, %v1432_v0 }
  0x4e   : > { %v496_v28 = vmax.f32 %v432_v20, 0.0  ;;  %v434_v29 = vadd.f32 %v1441_v9, %v363_v21  ;;  %v1140_v30 = vunpack.c.h.bf16 %v1340_v10  ;;  %v365_v31 = vmul.f32 %v1139_v22, %v1432_v0 }
  0x4f   : > { %1367 = vst [vmem:[%s1466_s25 + $0xc0] sm:$0xff] %v1276_v24   ;;  %v1281_v33 = vpack.c.bf16 %v495_v25, %v494_v19  ;;  %v497_v34 = vmax.f32 %v433_v26, 0.0  ;;  %v435_v35 = vadd.f32 %v1441_v9, %v364_v27  ;;  %v1143_v36 = vunpack.c.l.bf16 %v1341_v23 }
  0x50   : > { %v498_v37 = vmax.f32 %v434_v29, 0.0  ;;  %v366_v38 = vmul.f32 %v1140_v30, %v1432_v0  ;;  %v436_v39 = vadd.f32 %v1441_v9, %v365_v31  ;;  %v1144_v40 = vunpack.c.h.bf16 %v1341_v23 }
  0x51   : > { %1368 = vst [vmem:[%s1466_s25 + $0xc8] sm:$0xff] %v1281_v33   ;;  %v1286_v42 = vpack.c.bf16 %v497_v34, %v496_v28  ;;  %v499_v43 = vmax.f32 %v435_v35, 0.0  ;;  %v367_v44 = vmul.f32 %v1143_v36, %v1432_v0  ;;  %v1147_v45 = vunpack.c.l.bf16 %v1342_v32 }
  0x52   : > { %v437_v46 = vadd.f32 %v1441_v9, %v366_v38  ;;  %v500_v47 = vmax.f32 %v436_v39, 0.0  ;;  %v368_v48 = vmul.f32 %v1144_v40, %v1432_v0  ;;  %v1148_v49 = vunpack.c.h.bf16 %v1342_v32 }
  0x53   : > { %1369 = vst [vmem:[%s1466_s25 + $0xd0] sm:$0xff] %v1286_v42   ;;  %v1291_v50 = vpack.c.bf16 %v499_v43, %v498_v37  ;;  %v438_v51 = vadd.f32 %v1441_v9, %v367_v44  ;;  %v369_v52 = vmul.f32 %v1147_v45, %v1432_v0  ;;  %v1151_v53 = vunpack.c.l.bf16 %v1343_v41 }
  0x54   : > { %v501_v54 = vmax.f32 %v437_v46, 0.0  ;;  %v439_v55 = vadd.f32 %v1441_v9, %v368_v48  ;;  %v370_v56 = vmul.f32 %v1148_v49, %v1432_v0  ;;  %v1152_v57 = vunpack.c.h.bf16 %v1343_v41 }
  0x55   : > { %1370 = vst [vmem:[%s1466_s25 + $0xd8] sm:$0xff] %v1291_v50   ;;  %v502_v58 = vmax.f32 %v438_v51, 0.0  ;;  %v440_v59 = vadd.f32 %v1441_v9, %v369_v52  ;;  %v371_v60 = vmul.f32 %v1151_v53, %v1432_v0 }
  0x56   : > { %v1296_v61 = vpack.c.bf16 %v501_v54, %v500_v47  ;;  %v503_v62 = vmax.f32 %v439_v55, 0.0  ;;  %v441_v63 = vadd.f32 %v1441_v9, %v370_v56  ;;  %v372_v1 = vmul.f32 %v1152_v57, %v1432_v0 }
  0x57   : > { %v504_v2 = vmax.f32 %v440_v59, 0.0  ;;  %v442_v3 = vadd.f32 %v1441_v9, %v371_v60 }
  0x58   : > { %1371 = vst [vmem:[%s1466_s25 + $0xe0] sm:$0xff] %v1296_v61   ;;  %v1301_v4 = vpack.c.bf16 %v503_v62, %v502_v58  ;;  %v505_v5 = vmax.f32 %v441_v63, 0.0  ;;  %v443_v6 = vadd.f32 %v1441_v9, %v372_v1 }
  0x59   : > { %v506_v7 = vmax.f32 %v442_v3, 0.0 }
  0x5a   : > { %1372 = vst [vmem:[%s1466_s25 + $0xe8] sm:$0xff] %v1301_v4   ;;  %v1306_v8 = vpack.c.bf16 %v505_v5, %v504_v2  ;;  %v507_v10 = vmax.f32 %v443_v6, 0.0 }
  0x5c   : > { %1373 = vst [vmem:[%s1466_s25 + $0xf0] sm:$0xff] %v1306_v8   ;;  %v1311_v11 = vpack.c.bf16 %v507_v10, %v506_v7 }
  0x5e   : > { %1374 = vst [vmem:[%s1466_s25 + $0xf8] sm:$0xff] %v1311_v11  }
  0x5f PF: > { %s13_s12 = sadd.s32 1, %s1389_s12  }
  0x60   : > { %p10_p4 = scmp.ge.s32.totalorder %s13_s12, 6  }
  0x62   :  { %12 = sbr.rel (!%p10_p4) target bundleno = 1 (0x1), region = 62 }

// kernel: generator_forward.17
= control target key start
LH: loop header
LB: loop body
LE: loop exit
PB: predicated region body
PF: predicated region fallthrough
CT: control target
= control target key end

     0   :  { %s1498_s9 = smov 0   ;;  %s1500_s10 = smov 0   ;;  %s1666_s0 = inlined_call_operand.vmem [shape: bf16[4,2048,128], index: 0, kind: input, shape index: {}]   ;;  %s1667_s1 = inlined_call_operand.vmem [shape: bf16[4,128,128], index: 1, kind: input, shape index: {}]   ;;  %s1668_s2 = inlined_call_operand.vmem [shape: f32[4,2048,128], index: 2, kind: output, shape index: {}]  }
   0x1   :  { %s1502_s11 = smov 0   ;;  %s1504_s12 = smov 0  }
   0x2   :  { %s1506_s13 = smov 0  }
   0x3 LB: > { %s21_s14 = sadd.s32 1, %s1473_s11  ;;  %s24_s15 = sadd.s32 1, %s1477_s12  ;;  %s1481_s13 = sphi %s1506_s13, %s12_s13   ;;  %s1477_s12 = sphi %s1504_s12, %s1672_s12   ;;  %s1473_s11 = sphi %s1502_s11, %s1671_s11   ;;  %s1469_s10 = sphi %s1500_s10, %s1670_s10   ;;  %s1465_s9 = sphi %s1498_s9, %s1669_s9  }
   0x4   : > { %p22_p0 = scmp.ge.s32.totalorder %s21_s14, 4  ;;  %p1047_p1 = scmp.ge.s32.totalorder %s1481_s13, 1 }
   0x5   : > { %p143_p2 = scmp.lt.s32.totalorder %s1481_s13, 17 }
   0x6   : > { %s1674_s14 = smov (%p22_p0, %s21_s14), 0  ;;  %s1676_s15 = smov (!%p22_p0, %s24_s15), %s1477_s12 }
   0x7   : > { %p144_p3 = pnand %p1047_p1, %p143_p2  ;;  %p26_p4 = scmp.ge.s32.totalorder %s1676_s15, 4 }
   0x8   : > { %s1048_s16 = sshll.u32 (!%p144_p3), %s1465_s9, 6  ;;  %p179_p5 = scmp.lt.s32.totalorder (!%p144_p3), %s1469_s10, 3 }
   0x9   : > { %s1678_s15 = smov (%p26_p4, %s1676_s15), 0  ;;  %147 = sbr.rel (%p144_p3) target bundleno = 342 (0x156), region = 28 }
   0xa   : > { %p181_p6 = scmp.lt.s32.totalorder (!%p144_p3), %s1048_s16, 255 }
  0x10   : > { %s1680_s10 = smov (!%p179_p5, %s1469_s10), 3  ;;  %s1682_s16 = smov (!%p181_p6, %s1048_s16), 255 }
  0x11   : > { %s1049_s17 = sshll.u32 %s1680_s10, 8  ;;  %s1098_s18 = sshll.u32 %s1680_s10, 6 }
  0x12   : > { %s1531_s21 = scalar_lea.vmem %s1667_s1, %s1098_s18  ;;  %s1533_s22 = sadd.s32 %s1049_s17, %s1682_s16 }
  0x13   : > { %v1275_v0 = vld [vmem:[%s1531_s21] sm:$0xff]   ;;  %v1276_v1 = vld [vmem:[%s1531_s21 + $0x8] sm:$0xff]   ;;  %s1050_s23 = sshll.u32 %s1533_s22, 2  ;;  %v1277_v2 = vld [vmem:[%s1531_s21 + $0x10] sm:$0xff]   ;;  %s1055_s27 = sshll.u32 %s1533_s22, 3 }
  0x14   : > { %1139 = vmatprep.subr.bf16.mxu0 %v1275_v0  ;;  %1219 = vmatprep.subr.bf16.mxu1 %v1275_v0  ;;  %s1542_s26 = scalar_lea.vmem %s1666_s0, %s1050_s23  ;;  %v1278_v3 = vld [vmem:[%s1531_s21 + $0x18] sm:$0xff]   ;;  %v1279_v6 = vld [vmem:[%s1531_s21 + $0x20] sm:$0xff]   ;;  %v1280_v7 = vld [vmem:[%s1531_s21 + $0x28] sm:$0xff]   ;;  %s1585_s30 = scalar_lea.vmem %s1668_s2, %s1055_s27 }
  0x15   : > { %1140 = vmatpush3.bf16.msra.mxu0 %v1275_v0  ;;  %1227 = vmatpush3.bf16.msra.mxu1 %v1275_v0  ;;  %v1283_v4 = vld [vmem:[%s1542_s26] sm:$0xff]   ;;  %v1281_v8 = vld [vmem:[%s1531_s21 + $0x30] sm:$0xff]   ;;  %v1282_v9 = vld [vmem:[%s1531_s21 + $0x38] sm:$0xff]  }
  0x16   : > { %1141 = vmatprep.subr.bf16.mxu0 %v1276_v1  ;;  %1220 = vmatprep.subr.bf16.mxu1 %v1276_v1  ;;  %v1284_v5 = vld [vmem:[%s1542_s26 + $0x80] sm:$0xff]   ;;  %v1285_v10 = vld [vmem:[%s1542_s26 + $0x8] sm:$0xff]   ;;  %v1287_v12 = vld [vmem:[%s1542_s26 + $0x10] sm:$0xff]  }
  0x17   : > { %1155 = vmatprep.mubr.bf16.mxu0 %v1283_v4  ;;  %1187 = vmatprep.mubr.bf16.mxu1 %v1284_v5  ;;  %v1286_v11 = vld [vmem:[%s1542_s26 + $0x88] sm:$0xff]   ;;  %v1288_v13 = vld [vmem:[%s1542_s26 + $0x90] sm:$0xff]   ;;  %v1289_v14 = vld [vmem:[%s1542_s26 + $0x18] sm:$0xff]  }
  0x18   : > { %v1290_v15 = vld [vmem:[%s1542_s26 + $0x98] sm:$0xff]   ;;  %v1291_v16 = vld [vmem:[%s1542_s26 + $0x20] sm:$0xff]   ;;  %v1293_v18 = vld [vmem:[%s1542_s26 + $0x28] sm:$0xff]  }
  0x19   : > { %1142 = vmatpush3.bf16.msra.mxu0 %v1276_v1  ;;  %1228 = vmatpush3.bf16.msra.mxu1 %v1276_v1  ;;  %v1292_v17 = vld [vmem:[%s1542_s26 + $0xa0] sm:$0xff]   ;;  %v1294_v19 = vld [vmem:[%s1542_s26 + $0xa8] sm:$0xff]   ;;  %v1295_v20 = vld [vmem:[%s1542_s26 + $0x30] sm:$0xff]  }
  0x1a   : > { %1143 = vmatprep.subr.bf16.mxu0 %v1277_v2  ;;  %1221 = vmatprep.subr.bf16.mxu1 %v1277_v2  ;;  %v1296_v21 = vld [vmem:[%s1542_s26 + $0xb0] sm:$0xff]   ;;  %v1297_v22 = vld [vmem:[%s1542_s26 + $0x38] sm:$0xff]   ;;  %v1299_v24 = vld [vmem:[%s1542_s26 + $0x40] sm:$0xff]  }
  0x1b   : > { %v1298_v23 = vld [vmem:[%s1542_s26 + $0xb8] sm:$0xff]   ;;  %v1300_v25 = vld [vmem:[%s1542_s26 + $0xc0] sm:$0xff]   ;;  %v1301_v26 = vld [vmem:[%s1542_s26 + $0x48] sm:$0xff]  }
  0x1c   : > { %v1302_v27 = vld [vmem:[%s1542_s26 + $0xc8] sm:$0xff]   ;;  %v1303_v28 = vld [vmem:[%s1542_s26 + $0x50] sm:$0xff]   ;;  %v1305_v30 = vld [vmem:[%s1542_s26 + $0x58] sm:$0xff]  }
  0x1d   : > { %1144 = vmatpush3.bf16.msra.mxu0 %v1277_v2  ;;  %1229 = vmatpush3.bf16.msra.mxu1 %v1277_v2  ;;  %v1304_v29 = vld [vmem:[%s1542_s26 + $0xd0] sm:$0xff]   ;;  %v1306_v31 = vld [vmem:[%s1542_s26 + $0xd8] sm:$0xff]   ;;  %v1307_v32 = vld [vmem:[%s1542_s26 + $0x60] sm:$0xff]  }
  0x1e   : > { %1145 = vmatprep.subr.bf16.mxu0 %v1278_v3  ;;  %1222 = vmatprep.subr.bf16.mxu1 %v1278_v3  ;;  %v1308_v33 = vld [vmem:[%s1542_s26 + $0xe0] sm:$0xff]   ;;  %v1309_v34 = vld [vmem:[%s1542_s26 + $0x68] sm:$0xff]   ;;  %v1311_v36 = vld [vmem:[%s1542_s26 + $0x70] sm:$0xff]  }
  0x1f   : > { %v1310_v35 = vld [vmem:[%s1542_s26 + $0xe8] sm:$0xff]   ;;  %v1312_v37 = vld [vmem:[%s1542_s26 + $0xf0] sm:$0xff]   ;;  %v1313_v38 = vld [vmem:[%s1542_s26 + $0x78] sm:$0xff]  }
  0x20   : > { %v1314_v39 = vld [vmem:[%s1542_s26 + $0xf8] sm:$0xff]  }
  0x21   : > { %1146 = vmatpush3.bf16.msra.mxu0 %v1278_v3  ;;  %1230 = vmatpush3.bf16.msra.mxu1 %v1278_v3 }
  0x22   : > { %1147 = vmatprep.subr.bf16.mxu0 %v1279_v6  ;;  %1223 = vmatprep.subr.bf16.mxu1 %v1279_v6 }
  0x25   : > { %1148 = vmatpush3.bf16.msra.mxu0 %v1279_v6  ;;  %1231 = vmatpush3.bf16.msra.mxu1 %v1279_v6 }
  0x26   : > { %1149 = vmatprep.subr.bf16.mxu0 %v1280_v7  ;;  %1224 = vmatprep.subr.bf16.mxu1 %v1280_v7 }
  0x29   : > { %1150 = vmatpush3.bf16.msra.mxu0 %v1280_v7  ;;  %1232 = vmatpush3.bf16.msra.mxu1 %v1280_v7 }
  0x2a   : > { %1151 = vmatprep.subr.bf16.mxu0 %v1281_v8  ;;  %1225 = vmatprep.subr.bf16.mxu1 %v1281_v8 }
  0x2d   : > { %1152 = vmatpush3.bf16.msra.mxu0 %v1281_v8  ;;  %1233 = vmatpush3.bf16.msra.mxu1 %v1281_v8 }
  0x2e   : > { %1153 = vmatprep.subr.bf16.mxu0 %v1282_v9  ;;  %1226 = vmatprep.subr.bf16.mxu1 %v1282_v9 }
  0x31   : > { %1154 = vmatpush3.bf16.msra.mxu0 %v1282_v9  ;;  %1234 = vmatpush3.bf16.msra.mxu1 %v1282_v9 }
  0x34   : > { %1156 = vmatmul.mubr.bf16.vlgmr.msra.gmra.mrb[0].mxu0 %v1285_v10  ;;  %1188 = vmatmul.mubr.bf16.vlgmr.msra.gmra.mrb[0].mxu1 %v1286_v11 }
  0x35   : > { %1159 = vmatprep.mubr.bf16.mxu0 %v1287_v12  ;;  %1191 = vmatprep.mubr.bf16.mxu1 %v1288_v13 }
  0x3c   : > { %1160 = vmatmul.mubr.bf16.gmra.mrb[4].mxu0 %v1289_v14  ;;  %1192 = vmatmul.mubr.bf16.gmra.mrb[4].mxu1 %v1290_v15 }
  0x3d   : > { %1163 = vmatprep.mubr.bf16.mxu0 %v1291_v16  ;;  %1195 = vmatprep.mubr.bf16.mxu1 %v1292_v17 }
  0x44   : > { %1164 = vmatmul.mubr.bf16.gmra.mrb[8].mxu0 %v1293_v18  ;;  %1196 = vmatmul.mubr.bf16.gmra.mrb[8].mxu1 %v1294_v19 }
  0x45   : > { %1167 = vmatprep.mubr.bf16.mxu0 %v1295_v20  ;;  %1199 = vmatprep.mubr.bf16.mxu1 %v1296_v21 }
  0x4c   : > { %1168 = vmatmul.mubr.bf16.gmra.mrb[12].mxu0 %v1297_v22  ;;  %1200 = vmatmul.mubr.bf16.gmra.mrb[12].mxu1 %v1298_v23 }
  0x4d   : > { %1171 = vmatprep.mubr.bf16.mxu0 %v1299_v24  ;;  %1203 = vmatprep.mubr.bf16.mxu1 %v1300_v25 }
  0x54   : > { %1172 = vmatmul.mubr.bf16.gmra.mrb[16].mxu0 %v1301_v26  ;;  %1204 = vmatmul.mubr.bf16.gmra.mrb[16].mxu1 %v1302_v27 }
  0x55   : > { %1175 = vmatprep.mubr.bf16.mxu0 %v1303_v28  ;;  %1207 = vmatprep.mubr.bf16.mxu1 %v1304_v29 }
  0x5c   : > { %1176 = vmatmul.mubr.bf16.gmra.mrb[20].mxu0 %v1305_v30  ;;  %1208 = vmatmul.mubr.bf16.gmra.mrb[20].mxu1 %v1306_v31 }
  0x5d   : > { %1179 = vmatprep.mubr.bf16.mxu0 %v1307_v32  ;;  %1211 = vmatprep.mubr.bf16.mxu1 %v1308_v33 }
  0x64   : > { %1180 = vmatmul.mubr.bf16.gmra.mrb[24].mxu0 %v1309_v34  ;;  %1212 = vmatmul.mubr.bf16.gmra.mrb[24].mxu1 %v1310_v35 }
  0x65   : > { %1183 = vmatprep.mubr.bf16.mxu0 %v1311_v36  ;;  %1215 = vmatprep.mubr.bf16.mxu1 %v1312_v37 }
  0x6c   : > { %1184 = vmatmul.mubr.bf16.gmra.mrb[28].mxu0 %v1313_v38  ;;  %1216 = vmatmul.mubr.bf16.gmra.mrb[28].mxu1 %v1314_v39 }
 0x107   : > { %v1157_v40 = vpop.f32.mrb[0].mxu0  ;;  %v1189_v41 = vpop.f32.mrb[0].mxu1 }
 0x108   : > { %1315 = vtanh.f32 %v1157_v40  ;;  %v558_v42 = vpop.f32.mrb[1].mxu0  ;;  %v686_v43 = vpop.f32.mrb[1].mxu1 }
 0x109   : > { %1317 = vtanh.f32 %v1189_v41  ;;  %v1158_v44 = vpop.f32.mrb[2].mxu0  ;;  %v1190_v45 = vpop.f32.mrb[2].mxu1 }
 0x10a   : > { %1319 = vtanh.f32 %v558_v42  ;;  %v561_v46 = vpop.f32.mrb[3].mxu0  ;;  %v689_v47 = vpop.f32.mrb[3].mxu1 }
 0x10b   : > { %1321 = vtanh.f32 %v686_v43 }
 0x10c   : > { %1323 = vtanh.f32 %v1158_v44 }
 0x10d   : > { %1325 = vtanh.f32 %v1190_v45 }
 0x10e   : > { %1327 = vtanh.f32 %v561_v46 }
 0x10f   : > { %1329 = vtanh.f32 %v689_v47  ;;  %v1161_v48 = vpop.f32.mrb[4].mxu0  ;;  %v1193_v49 = vpop.f32.mrb[4].mxu1 }
 0x110   : > { %1331 = vtanh.f32 %v1161_v48  ;;  %v574_v50 = vpop.f32.mrb[5].mxu0  ;;  %v702_v51 = vpop.f32.mrb[5].mxu1 }
 0x111   : > { %1333 = vtanh.f32 %v1193_v49  ;;  %v1162_v52 = vpop.f32.mrb[6].mxu0  ;;  %v1194_v53 = vpop.f32.mrb[6].mxu1 }
 0x112   : > { %v1316_v54 = vpop.eup %1315  ;;  %1335 = vtanh.f32 %v574_v50  ;;  %v577_v55 = vpop.f32.mrb[7].mxu0 }
 0x113   : > { %v705_v56 = vpop.f32.mrb[7].mxu1  ;;  %v1318_v57 = vpop.eup %1317  ;;  %879 = vst [vmem:[%s1585_s30 + $0x10] sm:$0xff] %v1316_v54  ;;  %1337 = vtanh.f32 %v702_v51 }
 0x114   : > { %v1320_v58 = vpop.eup %1319  ;;  %911 = vst [vmem:[%s1585_s30 + $0x110] sm:$0xff] %v1318_v57  ;;  %1339 = vtanh.f32 %v1162_v52 }
 0x115   : > { %v1322_v59 = vpop.eup %1321  ;;  %877 = vst [vmem:[%s1585_s30] sm:$0xff] %v1320_v58  ;;  %1341 = vtanh.f32 %v1194_v53 }
 0x116   : > { %v1324_v60 = vpop.eup %1323  ;;  %909 = vst [vmem:[%s1585_s30 + $0x100] sm:$0xff] %v1322_v59  ;;  %1343 = vtanh.f32 %v577_v55 }
 0x117   : > { %v1326_v61 = vpop.eup %1325  ;;  %880 = vst [vmem:[%s1585_s30 + $0x18] sm:$0xff] %v1324_v60  ;;  %1345 = vtanh.f32 %v705_v56  ;;  %v1165_v62 = vpop.f32.mrb[8].mxu0 }
 0x118   : > { %v1197_v63 = vpop.f32.mrb[8].mxu1  ;;  %v1328_v0 = vpop.eup %1327  ;;  %912 = vst [vmem:[%s1585_s30 + $0x118] sm:$0xff] %v1326_v61  ;;  %1347 = vtanh.f32 %v1165_v62 }
 0x119   : > { %v590_v1 = vpop.f32.mrb[9].mxu0  ;;  %v718_v2 = vpop.f32.mrb[9].mxu1  ;;  %878 = vst [vmem:[%s1585_s30 + $0x8] sm:$0xff] %v1328_v0  ;;  %1349 = vtanh.f32 %v1197_v63 }
 0x11a   : > { %v1330_v3 = vpop.eup %1329  ;;  %v1166_v4 = vpop.f32.mrb[10].mxu0  ;;  %1351 = vtanh.f32 %v590_v1 }
 0x11b   : > { %v1198_v5 = vpop.f32.mrb[10].mxu1  ;;  %v1332_v6 = vpop.eup %1331  ;;  %910 = vst [vmem:[%s1585_s30 + $0x108] sm:$0xff] %v1330_v3  ;;  %1353 = vtanh.f32 %v718_v2 }
 0x11c   : > { %v593_v7 = vpop.f32.mrb[11].mxu0  ;;  %v721_v8 = vpop.f32.mrb[11].mxu1  ;;  %883 = vst [vmem:[%s1585_s30 + $0x30] sm:$0xff] %v1332_v6  ;;  %1355 = vtanh.f32 %v1166_v4 }
 0x11d   : > { %v1334_v9 = vpop.eup %1333  ;;  %1357 = vtanh.f32 %v1198_v5 }
 0x11e   : > { %v1336_v10 = vpop.eup %1335  ;;  %915 = vst [vmem:[%s1585_s30 + $0x130] sm:$0xff] %v1334_v9  ;;  %1359 = vtanh.f32 %v593_v7 }
 0x11f   : > { %v1338_v11 = vpop.eup %1337  ;;  %881 = vst [vmem:[%s1585_s30 + $0x20] sm:$0xff] %v1336_v10  ;;  %1361 = vtanh.f32 %v721_v8  ;;  %v1169_v14 = vpop.f32.mrb[12].mxu0 }
 0x120   : > { %v1340_v12 = vpop.eup %1339  ;;  %913 = vst [vmem:[%s1585_s30 + $0x120] sm:$0xff] %v1338_v11  ;;  %v1201_v15 = vpop.f32.mrb[12].mxu1  ;;  %1363 = vtanh.f32 %v1169_v14 }
 0x121   : > { %v1342_v13 = vpop.eup %1341  ;;  %884 = vst [vmem:[%s1585_s30 + $0x38] sm:$0xff] %v1340_v12  ;;  %v606_v17 = vpop.f32.mrb[13].mxu0  ;;  %1365 = vtanh.f32 %v1201_v15 }
 0x122   : > { %v1344_v16 = vpop.eup %1343  ;;  %916 = vst [vmem:[%s1585_s30 + $0x138] sm:$0xff] %v1342_v13  ;;  %v734_v18 = vpop.f32.mrb[13].mxu1  ;;  %1367 = vtanh.f32 %v606_v17 }
 0x123   : > { %v1346_v19 = vpop.eup %1345  ;;  %882 = vst [vmem:[%s1585_s30 + $0x28] sm:$0xff] %v1344_v16  ;;  %v1170_v20 = vpop.f32.mrb[14].mxu0  ;;  %1369 = vtanh.f32 %v734_v18 }
 0x124   : > { %v1202_v21 = vpop.f32.mrb[14].mxu1  ;;  %v1348_v22 = vpop.eup %1347  ;;  %914 = vst [vmem:[%s1585_s30 + $0x128] sm:$0xff] %v1346_v19  ;;  %1371 = vtanh.f32 %v1170_v20 }
 0x125   : > { %v609_v23 = vpop.f32.mrb[15].mxu0  ;;  %v737_v24 = vpop.f32.mrb[15].mxu1  ;;  %887 = vst [vmem:[%s1585_s30 + $0x50] sm:$0xff] %v1348_v22  ;;  %1373 = vtanh.f32 %v1202_v21 }
 0x126   : > { %v1350_v25 = vpop.eup %1349  ;;  %1375 = vtanh.f32 %v609_v23 }
 0x127   : > { %v1352_v26 = vpop.eup %1351  ;;  %919 = vst [vmem:[%s1585_s30 + $0x150] sm:$0xff] %v1350_v25  ;;  %1377 = vtanh.f32 %v737_v24  ;;  %v1173_v30 = vpop.f32.mrb[16].mxu0 }
 0x128   : > { %v1354_v27 = vpop.eup %1353  ;;  %885 = vst [vmem:[%s1585_s30 + $0x40] sm:$0xff] %v1352_v26  ;;  %v1205_v31 = vpop.f32.mrb[16].mxu1  ;;  %1379 = vtanh.f32 %v1173_v30 }
 0x129   : > { %v1356_v28 = vpop.eup %1355  ;;  %917 = vst [vmem:[%s1585_s30 + $0x140] sm:$0xff] %v1354_v27  ;;  %v622_v33 = vpop.f32.mrb[17].mxu0  ;;  %1381 = vtanh.f32 %v1205_v31 }
 0x12a   : > { %v1358_v29 = vpop.eup %1357  ;;  %888 = vst [vmem:[%s1585_s30 + $0x58] sm:$0xff] %v1356_v28  ;;  %v750_v34 = vpop.f32.mrb[17].mxu1  ;;  %1383 = vtanh.f32 %v622_v33 }
 0x12b   : > { %v1360_v32 = vpop.eup %1359  ;;  %920 = vst [vmem:[%s1585_s30 + $0x158] sm:$0xff] %v1358_v29  ;;  %v1174_v36 = vpop.f32.mrb[18].mxu0  ;;  %1385 = vtanh.f32 %v750_v34 }
 0x12c   : > { %v1362_v35 = vpop.eup %1361  ;;  %886 = vst [vmem:[%s1585_s30 + $0x48] sm:$0xff] %v1360_v32  ;;  %v1206_v37 = vpop.f32.mrb[18].mxu1  ;;  %1387 = vtanh.f32 %v1174_v36 }
 0x12d   : > { %v1364_v38 = vpop.eup %1363  ;;  %918 = vst [vmem:[%s1585_s30 + $0x148] sm:$0xff] %v1362_v35  ;;  %v625_v39 = vpop.f32.mrb[19].mxu0  ;;  %1389 = vtanh.f32 %v1206_v37 }
 0x12e   : > { %v753_v40 = vpop.f32.mrb[19].mxu1  ;;  %v1366_v41 = vpop.eup %1365  ;;  %891 = vst [vmem:[%s1585_s30 + $0x70] sm:$0xff] %v1364_v38  ;;  %1391 = vtanh.f32 %v625_v39 }
 0x12f   : > { %v1368_v42 = vpop.eup %1367  ;;  %923 = vst [vmem:[%s1585_s30 + $0x170] sm:$0xff] %v1366_v41  ;;  %1393 = vtanh.f32 %v753_v40  ;;  %v1177_v46 = vpop.f32.mrb[20].mxu0 }
 0x130   : > { %v1370_v43 = vpop.eup %1369  ;;  %889 = vst [vmem:[%s1585_s30 + $0x60] sm:$0xff] %v1368_v42  ;;  %v1209_v47 = vpop.f32.mrb[20].mxu1  ;;  %1395 = vtanh.f32 %v1177_v46 }
 0x131   : > { %v1372_v44 = vpop.eup %1371  ;;  %921 = vst [vmem:[%s1585_s30 + $0x160] sm:$0xff] %v1370_v43  ;;  %v638_v49 = vpop.f32.mrb[21].mxu0  ;;  %1397 = vtanh.f32 %v1209_v47 }
 0x132   : > { %v1374_v45 = vpop.eup %1373  ;;  %892 = vst [vmem:[%s1585_s30 + $0x78] sm:$0xff] %v1372_v44  ;;  %v766_v50 = vpop.f32.mrb[21].mxu1  ;;  %1399 = vtanh.f32 %v638_v49 }
 0x133   : > { %v1376_v48 = vpop.eup %1375  ;;  %924 = vst [vmem:[%s1585_s30 + $0x178] sm:$0xff] %v1374_v45  ;;  %v1178_v52 = vpop.f32.mrb[22].mxu0  ;;  %1401 = vtanh.f32 %v766_v50 }
 0x134   : > { %v1378_v51 = vpop.eup %1377  ;;  %890 = vst [vmem:[%s1585_s30 + $0x68] sm:$0xff] %v1376_v48  ;;  %v1210_v53 = vpop.f32.mrb[22].mxu1  ;;  %1403 = vtanh.f32 %v1178_v52 }
 0x135   : > { %v1380_v54 = vpop.eup %1379  ;;  %922 = vst [vmem:[%s1585_s30 + $0x168] sm:$0xff] %v1378_v51  ;;  %v641_v55 = vpop.f32.mrb[23].mxu0  ;;  %1405 = vtanh.f32 %v1210_v53 }
 0x136   : > { %v769_v56 = vpop.f32.mrb[23].mxu1  ;;  %v1382_v57 = vpop.eup %1381  ;;  %895 = vst [vmem:[%s1585_s30 + $0x90] sm:$0xff] %v1380_v54  ;;  %1407 = vtanh.f32 %v641_v55 }
 0x137   : > { %v1384_v58 = vpop.eup %1383  ;;  %927 = vst [vmem:[%s1585_s30 + $0x190] sm:$0xff] %v1382_v57  ;;  %1409 = vtanh.f32 %v769_v56  ;;  %v1181_v62 = vpop.f32.mrb[24].mxu0 }
 0x138   : > { %v1386_v59 = vpop.eup %1385  ;;  %893 = vst [vmem:[%s1585_s30 + $0x80] sm:$0xff] %v1384_v58  ;;  %v1213_v63 = vpop.f32.mrb[24].mxu1  ;;  %1411 = vtanh.f32 %v1181_v62 }
 0x139   : > { %v1388_v60 = vpop.eup %1387  ;;  %925 = vst [vmem:[%s1585_s30 + $0x180] sm:$0xff] %v1386_v59  ;;  %v654_v1 = vpop.f32.mrb[25].mxu0  ;;  %1413 = vtanh.f32 %v1213_v63 }
 0x13a   : > { %v1390_v61 = vpop.eup %1389  ;;  %896 = vst [vmem:[%s1585_s30 + $0x98] sm:$0xff] %v1388_v60  ;;  %v782_v2 = vpop.f32.mrb[25].mxu1  ;;  %1415 = vtanh.f32 %v654_v1 }
 0x13b   : > { %v1392_v0 = vpop.eup %1391  ;;  %928 = vst [vmem:[%s1585_s30 + $0x198] sm:$0xff] %v1390_v61  ;;  %v1182_v4 = vpop.f32.mrb[26].mxu0  ;;  %1417 = vtanh.f32 %v782_v2 }
 0x13c   : > { %v1394_v3 = vpop.eup %1393  ;;  %894 = vst [vmem:[%s1585_s30 + $0x88] sm:$0xff] %v1392_v0  ;;  %v1214_v5 = vpop.f32.mrb[26].mxu1  ;;  %1419 = vtanh.f32 %v1182_v4 }
 0x13d   : > { %v1396_v6 = vpop.eup %1395  ;;  %926 = vst [vmem:[%s1585_s30 + $0x188] sm:$0xff] %v1394_v3  ;;  %v657_v7 = vpop.f32.mrb[27].mxu0  ;;  %1421 = vtanh.f32 %v1214_v5 }
 0x13e   : > { %v785_v8 = vpop.f32.mrb[27].mxu1  ;;  %v1398_v9 = vpop.eup %1397  ;;  %899 = vst [vmem:[%s1585_s30 + $0xb0] sm:$0xff] %v1396_v6  ;;  %1423 = vtanh.f32 %v657_v7 }
 0x13f   : > { %v1400_v10 = vpop.eup %1399  ;;  %931 = vst [vmem:[%s1585_s30 + $0x1b0] sm:$0xff] %v1398_v9  ;;  %1425 = vtanh.f32 %v785_v8  ;;  %v1185_v14 = vpop.f32.mrb[28].mxu0 }
 0x140   : > { %v1402_v11 = vpop.eup %1401  ;;  %897 = vst [vmem:[%s1585_s30 + $0xa0] sm:$0xff] %v1400_v10  ;;  %v1217_v15 = vpop.f32.mrb[28].mxu1  ;;  %1427 = vtanh.f32 %v1185_v14 }
 0x141   : > { %v1404_v12 = vpop.eup %1403  ;;  %929 = vst [vmem:[%s1585_s30 + $0x1a0] sm:$0xff] %v1402_v11  ;;  %v670_v17 = vpop.f32.mrb[29].mxu0  ;;  %1429 = vtanh.f32 %v1217_v15 }
 0x142   : > { %v1406_v13 = vpop.eup %1405  ;;  %900 = vst [vmem:[%s1585_s30 + $0xb8] sm:$0xff] %v1404_v12  ;;  %v798_v18 = vpop.f32.mrb[29].mxu1  ;;  %1431 = vtanh.f32 %v670_v17 }
 0x143   : > { %v1408_v16 = vpop.eup %1407  ;;  %932 = vst [vmem:[%s1585_s30 + $0x1b8] sm:$0xff] %v1406_v13  ;;  %v1186_v20 = vpop.f32.mrb[30].mxu0  ;;  %1433 = vtanh.f32 %v798_v18 }
 0x144   : > { %v1410_v19 = vpop.eup %1409  ;;  %898 = vst [vmem:[%s1585_s30 + $0xa8] sm:$0xff] %v1408_v16  ;;  %v1218_v21 = vpop.f32.mrb[30].mxu1  ;;  %1435 = vtanh.f32 %v1186_v20 }
 0x145   : > { %v1412_v22 = vpop.eup %1411  ;;  %930 = vst [vmem:[%s1585_s30 + $0x1a8] sm:$0xff] %v1410_v19  ;;  %v673_v23 = vpop.f32.mrb[31].mxu0  ;;  %1437 = vtanh.f32 %v1218_v21 }
 0x146   : > { %v801_v24 = vpop.f32.mrb[31].mxu1  ;;  %v1414_v25 = vpop.eup %1413  ;;  %903 = vst [vmem:[%s1585_s30 + $0xd0] sm:$0xff] %v1412_v22  ;;  %1439 = vtanh.f32 %v673_v23 }
 0x147   : > { %v1416_v26 = vpop.eup %1415  ;;  %935 = vst [vmem:[%s1585_s30 + $0x1d0] sm:$0xff] %v1414_v25  ;;  %1441 = vtanh.f32 %v801_v24 }
 0x148   : > { %v1418_v27 = vpop.eup %1417  ;;  %901 = vst [vmem:[%s1585_s30 + $0xc0] sm:$0xff] %v1416_v26 }
 0x149   : > { %v1420_v28 = vpop.eup %1419  ;;  %933 = vst [vmem:[%s1585_s30 + $0x1c0] sm:$0xff] %v1418_v27 }
 0x14a   : > { %v1422_v29 = vpop.eup %1421  ;;  %904 = vst [vmem:[%s1585_s30 + $0xd8] sm:$0xff] %v1420_v28 }
 0x14b   : > { %v1424_v30 = vpop.eup %1423  ;;  %936 = vst [vmem:[%s1585_s30 + $0x1d8] sm:$0xff] %v1422_v29 }
 0x14c   : > { %v1426_v31 = vpop.eup %1425  ;;  %902 = vst [vmem:[%s1585_s30 + $0xc8] sm:$0xff] %v1424_v30 }
 0x14d   : > { %v1428_v32 = vpop.eup %1427  ;;  %934 = vst [vmem:[%s1585_s30 + $0x1c8] sm:$0xff] %v1426_v31 }
 0x14e   : > { %v1430_v33 = vpop.eup %1429  ;;  %907 = vst [vmem:[%s1585_s30 + $0xf0] sm:$0xff] %v1428_v32 }
 0x14f   : > { %v1432_v34 = vpop.eup %1431  ;;  %939 = vst [vmem:[%s1585_s30 + $0x1f0] sm:$0xff] %v1430_v33 }
 0x150   : > { %v1434_v35 = vpop.eup %1433  ;;  %905 = vst [vmem:[%s1585_s30 + $0xe0] sm:$0xff] %v1432_v34 }
 0x151   : > { %v1436_v36 = vpop.eup %1435  ;;  %937 = vst [vmem:[%s1585_s30 + $0x1e0] sm:$0xff] %v1434_v35 }
 0x152   : > { %v1438_v37 = vpop.eup %1437  ;;  %908 = vst [vmem:[%s1585_s30 + $0xf8] sm:$0xff] %v1436_v36 }
 0x153   : > { %v1440_v38 = vpop.eup %1439  ;;  %940 = vst [vmem:[%s1585_s30 + $0x1f8] sm:$0xff] %v1438_v37 }
 0x154   : > { %v1442_v39 = vpop.eup %1441  ;;  %906 = vst [vmem:[%s1585_s30 + $0xe8] sm:$0xff] %v1440_v38 }
 0x155   : > { %938 = vst [vmem:[%s1585_s30 + $0x1e8] sm:$0xff] %v1442_v39 }
 0x156 PF: > { %s12_s13 = sadd.s32 1, %s1481_s13   ;;  %s1669_s9 = smov %s1473_s11 }
 0x157   : > { %p9_p7 = scmp.ge.s32.totalorder %s12_s13, 18   ;;  %s1670_s10 = smov %s1477_s12 }
 0x158   : > { %s1671_s11 = smov %s1674_s14  ;;  %s1672_s12 = smov %s1678_s15 }
 0x159   :  { %11 = sbr.rel (!%p9_p7) target bundleno = 3 (0x3), region = 61 }

</bundles_post_ra>
